<compile_context>
chip_gen: v6e
topology: v6e:2x2x1
jax: 0.10.0
libtpu: 0.0.40
codegen_flags: <defaults>
</compile_context>

<pallas_src>
import functools
import math

import jax
import jax.numpy as jnp
import numpy as np
from jax import lax
from jax.experimental import pallas as pl
from jax.experimental.pallas import tpu as pltpu

EPS = 1e-5                    # PyTorch BatchNorm1d default eps
MXU_DTYPE = jnp.bfloat16      # MXU operand dtype (f32 accumulation everywhere)


def _out_len(L_in, stride):
    # Every down-sampling op in this net (conv k7/p3/s2, k3/p1/s2, k1/p0/s2 and
    # maxpool k3/p1/s2) maps L_in -> (L_in - 1)//2 + 1; stride 1 keeps the length.
    return L_in if stride == 1 else (L_in - 1) // 2 + 1


# ----------------------------------------------------------------------------
# Wrapper-side (numpy) constant builders: 0/1 selectors, exact in bf16
# ----------------------------------------------------------------------------
def _selector_stack(L_in, L_out, shifts, B):
    """Stacked gather selectors: S[s][b*L_in + t, b*L_out + j] = 1 iff
    t == j*stride + s (stride = 1 if L_out == L_in else 2) and 0 <= t < L_in.
    Out-of-range taps select nothing -> exact Conv1d zero padding."""
    stride = 1 if L_out == L_in else 2
    S = np.zeros((len(shifts), B * L_in, B * L_out), np.float32)
    for si, s in enumerate(shifts):
        for b in range(B):
            for j in range(L_out):
                t = j * stride + s
                if 0 <= t < L_in:
                    S[si, b * L_in + t, b * L_out + j] = 1.0
    return jnp.asarray(S, MXU_DTYPE)


def _pool_selector(L, B):
    """(B, B*L) 0/1 matrix selecting sample b's lanes (AdaptiveAvgPool1d(1);
    the 1/L scale is applied in f32 inside the kernel)."""
    P = np.zeros((B, B * L), np.float32)
    for b in range(B):
        P[b, b * L:(b + 1) * L] = 1.0
    return jnp.asarray(P, MXU_DTYPE)


# ----------------------------------------------------------------------------
# The fused kernel: entire forward pass in one pallas_call
# ----------------------------------------------------------------------------
def _resnet1d_kernel(*refs, cfg):
    B, L_in0, sel_layout, blocks_cfg = cfg
    out_ref = refs[-1]
    it = iter(refs[:-1])

    x_ref = next(it)
    sel = {}
    for (L_in, L_out, shifts) in sel_layout:
        ref = next(it)
        for slot, s in enumerate(shifts):
            sel[(L_in, L_out, s)] = (ref, slot)
    pool_ref = next(it)

    def gather(a_bf, L_in, L_out, s):
        """bf16 MXU gather of one shifted/strided/zero-padded tap (lossless)."""
        ref, slot = sel[(L_in, L_out, s)]
        return jnp.dot(a_bf, ref[slot], preferred_element_type=jnp.float32)

    def conv(a, w_ref, *, K, pad, L_in, stride):
        """a: (C_in, B*L_in) f32, w_ref: (K, C_out, C_in) bf16 ->
        (C_out, B*L_out) f32 via K accumulating dots (no concat)."""
        L_out = _out_len(L_in, stride)
        c_in = a.shape[0]
        a_bf = a.astype(MXU_DTYPE)
        acc = None
        for k in range(K):
            s = k - pad
            if stride == 1 and s == 0:
                tap = a                              # identity tap: no gather
            else:
                tap = gather(a_bf, L_in, L_out, s)   # f32-valued, bf16-exact
            wk = w_ref[k]                            # (C_out, C_in) bf16
            if c_in == 1:
                # stem: rank-1 weight apply stays on the VPU in f32 (v5e-safe)
                contrib = wk.astype(jnp.float32) * tap
            else:
                contrib = jnp.dot(wk, tap.astype(MXU_DTYPE),
                                  preferred_element_type=jnp.float32)
            acc = contrib if acc is None else acc + contrib
        return acc, L_out

    def batchnorm(a, g_ref, b_ref, *, relu):
        """One-pass training-mode BN (batch stats, biased var) + optional ReLU."""
        inv_n = 1.0 / float(a.shape[1])
        s1 = jnp.sum(a, axis=1, keepdims=True)
        s2 = jnp.sum(a * a, axis=1, keepdims=True)
        mean = s1 * inv_n
        var = jnp.maximum(s2 * inv_n - mean * mean, 0.0)
        scale = g_ref[...] * lax.rsqrt(var + EPS)    # (C, 1)
        shift = b_ref[...] - mean * scale
        out = a * scale + shift                      # single FMA pass
        return jnp.maximum(out, 0.0) if relu else out

    def maxpool3(a, L_in):
        """k=3 / s=2 / p=1 max pool; input is post-ReLU so zero padding == -inf."""
        L_out = _out_len(L_in, 2)
        a_bf = a.astype(MXU_DTYPE)
        m = None
        for s in (-1, 0, 1):
            v = gather(a_bf, L_in, L_out, s)
            m = v if m is None else jnp.maximum(m, v)
        return m, L_out

    # ---- stem: Conv(k7,s2,p3) -> BN -> ReLU -> MaxPool(k3,s2,p1) ----
    a = x_ref[...]                                   # (1, B*L)
    a, L_cur = conv(a, next(it), K=7, pad=3, L_in=L_in0, stride=2)
    a = batchnorm(a, next(it), next(it), relu=True)
    a, L_cur = maxpool3(a, L_cur)

    # ---- residual blocks ----
    for (stride, has_sc) in blocks_cfg:
        c1 = next(it); g1 = next(it); b1 = next(it)
        c2 = next(it); g2 = next(it); b2 = next(it)
        out, L_mid = conv(a, c1, K=3, pad=1, L_in=L_cur, stride=stride)
        out = batchnorm(out, g1, b1, relu=True)
        out, _ = conv(out, c2, K=3, pad=1, L_in=L_mid, stride=1)
        out = batchnorm(out, g2, b2, relu=False)
        if has_sc:
            # PyTorch hard-codes the projection shortcut to stride 2
            sc, _ = conv(a, next(it), K=1, pad=0, L_in=L_cur, stride=2)
            sc = batchnorm(sc, next(it), next(it), relu=False)
        else:
            sc = a
        a = jnp.maximum(out + sc, 0.0)
        L_cur = L_mid

    leftover = list(it)
    assert not leftover, f"unconsumed kernel operands: {len(leftover)}"

    # ---- AdaptiveAvgPool1d(1) -> lane-dense (B, C_last) output ----
    pooled = lax.dot_general(pool_ref[...], a.astype(MXU_DTYPE),
                             (((1,), (1,)), ((), ())),
                             preferred_element_type=jnp.float32)
    out_ref[...] = pooled * (1.0 / float(L_cur))


# ----------------------------------------------------------------------------
# Wrapper: selector precomputation + parameter flattening + single pallas_call
# ----------------------------------------------------------------------------
def resnet1d_forward(x, params):
    """x: (B, 1, L) float32 -> (B, C_last) float32 (training-mode BN)."""
    B, C_in, L = x.shape
    assert C_in == 1, "Resnet1d stem expects a single input channel"
    x2d = x.astype(jnp.float32).reshape(1, B * L)        # lane index = b*L + t

    # ---- walk the architecture once: lengths + unique selector needs ----
    sel_shifts = {}

    def need(L_in, stride, shifts):
        L_out = _out_len(L_in, stride)
        use = [s for s in shifts if not (stride == 1 and s == 0)]  # identity tap free
        if use:
            sel_shifts.setdefault((L_in, L_out), set()).update(use)
        return L_out

    blocks_cfg = []
    L_cur = need(L, 2, range(-3, 4))            # stem conv k7 p3 s2
    L_cur = need(L_cur, 2, (-1, 0, 1))          # maxpool k3 p1 s2
    for blk in params["blocks"]:
        stride = blk["stride"]
        p = blk["params"]
        has_sc = "sc_w" in p
        if has_sc:
            assert stride == 2, "projection shortcut is hard-coded to stride 2"
        else:
            assert stride == 1, "identity shortcut requires stride 1"
        L_mid = need(L_cur, stride, (-1, 0, 1))     # C1
        need(L_mid, 1, (-1, 0, 1))                  # C2
        if has_sc:
            need(L_cur, 2, (0,))                    # 1x1 stride-2 shortcut
        blocks_cfg.append((stride, has_sc))
        L_cur = L_mid
    L_last = L_cur

    sel_layout, sel_inputs = [], []
    for (li, lo) in sorted(sel_shifts, reverse=True):
        shifts = tuple(sorted(sel_shifts[(li, lo)]))
        sel_layout.append((li, lo, shifts))
        sel_inputs.append(_selector_stack(li, lo, shifts, B))

    # ---- flatten parameters (MXU operands bf16, BN params f32) ----
    inputs = [x2d] + sel_inputs + [_pool_selector(L_last, B)]

    def add_conv(w):                 # (C_out, C_in, K) -> (K, C_out, C_in) bf16
        inputs.append(jnp.transpose(w, (2, 0, 1)).astype(MXU_DTYPE))

    def add_bn(g, b):
        inputs.append(g.reshape(-1, 1).astype(jnp.float32))
        inputs.append(b.reshape(-1, 1).astype(jnp.float32))

    add_conv(params["stem_w"]); add_bn(params["stem_g"], params["stem_b"])
    for blk in params["blocks"]:
        p = blk["params"]
        add_conv(p["c1_w"]); add_bn(p["b1_g"], p["b1_b"])
        add_conv(p["c2_w"]); add_bn(p["b2_g"], p["b2_b"])
        if "sc_w" in p:
            add_conv(p["sc_w"]); add_bn(p["sc_g"], p["sc_b"])

    c_last = params["blocks"][-1]["params"]["c2_w"].shape[0]
    cfg = (B, L, tuple(sel_layout), tuple(blocks_cfg))

    return pl.pallas_call(
        functools.partial(_resnet1d_kernel, cfg=cfg),
        out_shape=jax.ShapeDtypeStruct((B, c_last), jnp.float32),
        in_specs=[pl.BlockSpec(memory_space=pltpu.MemorySpace.VMEM)] * len(inputs),
        out_specs=pl.BlockSpec(memory_space=pltpu.MemorySpace.VMEM),
        compiler_params=pltpu.CompilerParams(vmem_limit_bytes=32 * 1024 * 1024),
    )(*inputs)


# ----------------------------------------------------------------------------
# Parameter construction (deterministic; forward semantics only)
# ----------------------------------------------------------------------------
def _conv_init(key, c_out, c_in, k):
    std = math.sqrt(2.0 / float(c_in * k))
    return (std * jax.random.normal(key, (c_out, c_in, k))).astype(jnp.float32)


def _block_params(key, c_in, c_out):
    ks = jax.random.split(key, 3)
    p = {
        "c1_w": _conv_init(ks[0], c_out, c_in, 3),
        "b1_g": jnp.ones((c_out,), jnp.float32),
        "b1_b": jnp.zeros((c_out,), jnp.float32),
        "c2_w": _conv_init(ks[1], c_out, c_out, 3),
        "b2_g": jnp.ones((c_out,), jnp.float32),
        "b2_b": jnp.zeros((c_out,), jnp.float32),
    }
    if c_in != c_out:   # shortcut: Conv1d(k=1, stride=2) + (plain) BN
        p["sc_w"] = _conv_init(ks[2], c_out, c_in, 1)
        p["sc_g"] = jnp.ones((c_out,), jnp.float32)
        p["sc_b"] = jnp.zeros((c_out,), jnp.float32)
    return p


def init_params(key, blockdim):
    ks = jax.random.split(key, 5)
    params = {
        "stem_w": _conv_init(ks[0], blockdim[0], 1, 7),
        "stem_g": jnp.ones((blockdim[0],), jnp.float32),
        "stem_b": jnp.zeros((blockdim[0],), jnp.float32),
        "blocks": [],
    }
    strides = [1, 2, 2, 2]
    chans = [(blockdim[0], blockdim[1]), (blockdim[1], blockdim[2]),
             (blockdim[2], blockdim[3]), (blockdim[3], blockdim[4])]
    for i, ((ci, co), s) in enumerate(zip(chans, strides)):
        params["blocks"].append(
            {"stride": s, "params": _block_params(ks[i + 1], ci, co)})
    return params


# TODO(synk): the stochastic gamma/beta path of FeatureWiseTransformation1d_fw
# (Feature_trans=True + training) and eval-mode running-stats BN are not
# implemented; the module defaults (Feature_trans=False, training-mode BN) are.

if __name__ == "__main__":
    blockdim = [8, 8, 16, 32, 64]   # blockdim[0] == blockdim[1] (identity shortcut)
    B, L = 2, 128
    key = jax.random.PRNGKey(0)
    kx, kp = jax.random.split(key)
    x = jax.random.normal(kx, (B, 1, L), dtype=jnp.float32)   # NCL, like PyTorch Conv1d
    params = init_params(kp, blockdim)

    out = resnet1d_forward(x, params)
    out = jax.block_until_ready(out)
    assert out.shape == (B, blockdim[-1]), out.shape
    assert bool(jnp.all(jnp.isfinite(out)))
    print("KERNEL_OK")
</pallas_src>

<mosaic_0001>
module attributes {stable_mosaic.version = 11 : i64} {
  func.func @_resnet1d_kernel(%arg0: memref<1x256xf32, #tpu.memory_space<vmem>>, %arg1: memref<7x256x128xbf16, #tpu.memory_space<vmem>>, %arg2: memref<3x128x64xbf16, #tpu.memory_space<vmem>>, %arg3: memref<2x64x64xbf16, #tpu.memory_space<vmem>>, %arg4: memref<3x64x32xbf16, #tpu.memory_space<vmem>>, %arg5: memref<2x32x32xbf16, #tpu.memory_space<vmem>>, %arg6: memref<3x32x16xbf16, #tpu.memory_space<vmem>>, %arg7: memref<2x16x16xbf16, #tpu.memory_space<vmem>>, %arg8: memref<3x16x8xbf16, #tpu.memory_space<vmem>>, %arg9: memref<2x8x8xbf16, #tpu.memory_space<vmem>>, %arg10: memref<2x8xbf16, #tpu.memory_space<vmem>>, %arg11: memref<7x8x1xbf16, #tpu.memory_space<vmem>>, %arg12: memref<8x1xf32, #tpu.memory_space<vmem>>, %arg13: memref<8x1xf32, #tpu.memory_space<vmem>>, %arg14: memref<3x8x8xbf16, #tpu.memory_space<vmem>>, %arg15: memref<8x1xf32, #tpu.memory_space<vmem>>, %arg16: memref<8x1xf32, #tpu.memory_space<vmem>>, %arg17: memref<3x8x8xbf16, #tpu.memory_space<vmem>>, %arg18: memref<8x1xf32, #tpu.memory_space<vmem>>, %arg19: memref<8x1xf32, #tpu.memory_space<vmem>>, %arg20: memref<3x16x8xbf16, #tpu.memory_space<vmem>>, %arg21: memref<16x1xf32, #tpu.memory_space<vmem>>, %arg22: memref<16x1xf32, #tpu.memory_space<vmem>>, %arg23: memref<3x16x16xbf16, #tpu.memory_space<vmem>>, %arg24: memref<16x1xf32, #tpu.memory_space<vmem>>, %arg25: memref<16x1xf32, #tpu.memory_space<vmem>>, %arg26: memref<1x16x8xbf16, #tpu.memory_space<vmem>>, %arg27: memref<16x1xf32, #tpu.memory_space<vmem>>, %arg28: memref<16x1xf32, #tpu.memory_space<vmem>>, %arg29: memref<3x32x16xbf16, #tpu.memory_space<vmem>>, %arg30: memref<32x1xf32, #tpu.memory_space<vmem>>, %arg31: memref<32x1xf32, #tpu.memory_space<vmem>>, %arg32: memref<3x32x32xbf16, #tpu.memory_space<vmem>>, %arg33: memref<32x1xf32, #tpu.memory_space<vmem>>, %arg34: memref<32x1xf32, #tpu.memory_space<vmem>>, %arg35: memref<1x32x16xbf16, #tpu.memory_space<vmem>>, %arg36: memref<32x1xf32, #tpu.memory_space<vmem>>, %arg37: memref<32x1xf32, #tpu.memory_space<vmem>>, %arg38: memref<3x64x32xbf16, #tpu.memory_space<vmem>>, %arg39: memref<64x1xf32, #tpu.memory_space<vmem>>, %arg40: memref<64x1xf32, #tpu.memory_space<vmem>>, %arg41: memref<3x64x64xbf16, #tpu.memory_space<vmem>>, %arg42: memref<64x1xf32, #tpu.memory_space<vmem>>, %arg43: memref<64x1xf32, #tpu.memory_space<vmem>>, %arg44: memref<1x64x32xbf16, #tpu.memory_space<vmem>>, %arg45: memref<64x1xf32, #tpu.memory_space<vmem>>, %arg46: memref<64x1xf32, #tpu.memory_space<vmem>>, %arg47: memref<2x64xf32, #tpu.memory_space<vmem>>) attributes {dimension_semantics = [], scalar_prefetch = 0 : i64, scratch_operands = 0 : i64, tpu.core_type = #tpu.core_type<tc>} {
    %c0 = arith.constant 0 : index
    %c0_0 = arith.constant 0 : index
    %0 = vector.load %arg0[%c0, %c0_0] : memref<1x256xf32, #tpu.memory_space<vmem>>, vector<1x256xf32>
    %1 = arith.truncf %0 : vector<1x256xf32> to vector<1x256xbf16>
    %c0_1 = arith.constant 0 : index
    %c0_2 = arith.constant 0 : index
    %c0_3 = arith.constant 0 : index
    %2 = vector.load %arg1[%c0_1, %c0_2, %c0_3] : memref<7x256x128xbf16, #tpu.memory_space<vmem>>, vector<1x256x128xbf16>
    %3 = vector.shape_cast %2 : vector<1x256x128xbf16> to vector<256x128xbf16>
    %cst = arith.constant dense<0.000000e+00> : vector<1x128xf32>
    %4 = tpu.matmul %1, %3, %cst {dimension_numbers = #tpu.dot_dimension_numbers<[1], [0], [0], [1], [0, 0, 1, 1], [], []>} : vector<1x256xbf16>, vector<256x128xbf16>, vector<1x128xf32> -> vector<1x128xf32>
    %c0_4 = arith.constant 0 : index
    %c0_5 = arith.constant 0 : index
    %c0_6 = arith.constant 0 : index
    %5 = vector.load %arg11[%c0_4, %c0_5, %c0_6] : memref<7x8x1xbf16, #tpu.memory_space<vmem>>, vector<1x8x1xbf16>
    %6 = vector.shape_cast %5 : vector<1x8x1xbf16> to vector<8x1xbf16>
    %7 = arith.extf %6 : vector<8x1xbf16> to vector<8x1xf32>
    %8 = vector.broadcast %7 : vector<8x1xf32> to vector<8x128xf32>
    %9 = vector.broadcast %4 : vector<1x128xf32> to vector<8x128xf32>
    %10 = arith.mulf %8, %9 : vector<8x128xf32>
    %c1 = arith.constant 1 : index
    %c0_7 = arith.constant 0 : index
    %c0_8 = arith.constant 0 : index
    %11 = vector.load %arg1[%c1, %c0_7, %c0_8] : memref<7x256x128xbf16, #tpu.memory_space<vmem>>, vector<1x256x128xbf16>
    %12 = vector.shape_cast %11 : vector<1x256x128xbf16> to vector<256x128xbf16>
    %cst_9 = arith.constant dense<0.000000e+00> : vector<1x128xf32>
    %13 = tpu.matmul %1, %12, %cst_9 {dimension_numbers = #tpu.dot_dimension_numbers<[1], [0], [0], [1], [0, 0, 1, 1], [], []>} : vector<1x256xbf16>, vector<256x128xbf16>, vector<1x128xf32> -> vector<1x128xf32>
    %c1_10 = arith.constant 1 : index
    %c0_11 = arith.constant 0 : index
    %c0_12 = arith.constant 0 : index
    %14 = vector.load %arg11[%c1_10, %c0_11, %c0_12] : memref<7x8x1xbf16, #tpu.memory_space<vmem>>, vector<1x8x1xbf16>
    %15 = vector.shape_cast %14 : vector<1x8x1xbf16> to vector<8x1xbf16>
    %16 = arith.extf %15 : vector<8x1xbf16> to vector<8x1xf32>
    %17 = vector.broadcast %16 : vector<8x1xf32> to vector<8x128xf32>
    %18 = vector.broadcast %13 : vector<1x128xf32> to vector<8x128xf32>
    %19 = arith.mulf %17, %18 : vector<8x128xf32>
    %20 = arith.addf %10, %19 : vector<8x128xf32>
    %c2 = arith.constant 2 : index
    %c0_13 = arith.constant 0 : index
    %c0_14 = arith.constant 0 : index
    %21 = vector.load %arg1[%c2, %c0_13, %c0_14] : memref<7x256x128xbf16, #tpu.memory_space<vmem>>, vector<1x256x128xbf16>
    %22 = vector.shape_cast %21 : vector<1x256x128xbf16> to vector<256x128xbf16>
    %cst_15 = arith.constant dense<0.000000e+00> : vector<1x128xf32>
    %23 = tpu.matmul %1, %22, %cst_15 {dimension_numbers = #tpu.dot_dimension_numbers<[1], [0], [0], [1], [0, 0, 1, 1], [], []>} : vector<1x256xbf16>, vector<256x128xbf16>, vector<1x128xf32> -> vector<1x128xf32>
    %c2_16 = arith.constant 2 : index
    %c0_17 = arith.constant 0 : index
    %c0_18 = arith.constant 0 : index
    %24 = vector.load %arg11[%c2_16, %c0_17, %c0_18] : memref<7x8x1xbf16, #tpu.memory_space<vmem>>, vector<1x8x1xbf16>
    %25 = vector.shape_cast %24 : vector<1x8x1xbf16> to vector<8x1xbf16>
    %26 = arith.extf %25 : vector<8x1xbf16> to vector<8x1xf32>
    %27 = vector.broadcast %26 : vector<8x1xf32> to vector<8x128xf32>
    %28 = vector.broadcast %23 : vector<1x128xf32> to vector<8x128xf32>
    %29 = arith.mulf %27, %28 : vector<8x128xf32>
    %30 = arith.addf %20, %29 : vector<8x128xf32>
    %c3 = arith.constant 3 : index
    %c0_19 = arith.constant 0 : index
    %c0_20 = arith.constant 0 : index
    %31 = vector.load %arg1[%c3, %c0_19, %c0_20] : memref<7x256x128xbf16, #tpu.memory_space<vmem>>, vector<1x256x128xbf16>
    %32 = vector.shape_cast %31 : vector<1x256x128xbf16> to vector<256x128xbf16>
    %cst_21 = arith.constant dense<0.000000e+00> : vector<1x128xf32>
    %33 = tpu.matmul %1, %32, %cst_21 {dimension_numbers = #tpu.dot_dimension_numbers<[1], [0], [0], [1], [0, 0, 1, 1], [], []>} : vector<1x256xbf16>, vector<256x128xbf16>, vector<1x128xf32> -> vector<1x128xf32>
    %c3_22 = arith.constant 3 : index
    %c0_23 = arith.constant 0 : index
    %c0_24 = arith.constant 0 : index
    %34 = vector.load %arg11[%c3_22, %c0_23, %c0_24] : memref<7x8x1xbf16, #tpu.memory_space<vmem>>, vector<1x8x1xbf16>
    %35 = vector.shape_cast %34 : vector<1x8x1xbf16> to vector<8x1xbf16>
    %36 = arith.extf %35 : vector<8x1xbf16> to vector<8x1xf32>
    %37 = vector.broadcast %36 : vector<8x1xf32> to vector<8x128xf32>
    %38 = vector.broadcast %33 : vector<1x128xf32> to vector<8x128xf32>
    %39 = arith.mulf %37, %38 : vector<8x128xf32>
    %40 = arith.addf %30, %39 : vector<8x128xf32>
    %c4 = arith.constant 4 : index
    %c0_25 = arith.constant 0 : index
    %c0_26 = arith.constant 0 : index
    %41 = vector.load %arg1[%c4, %c0_25, %c0_26] : memref<7x256x128xbf16, #tpu.memory_space<vmem>>, vector<1x256x128xbf16>
    %42 = vector.shape_cast %41 : vector<1x256x128xbf16> to vector<256x128xbf16>
    %cst_27 = arith.constant dense<0.000000e+00> : vector<1x128xf32>
    %43 = tpu.matmul %1, %42, %cst_27 {dimension_numbers = #tpu.dot_dimension_numbers<[1], [0], [0], [1], [0, 0, 1, 1], [], []>} : vector<1x256xbf16>, vector<256x128xbf16>, vector<1x128xf32> -> vector<1x128xf32>
    %c4_28 = arith.constant 4 : index
    %c0_29 = arith.constant 0 : index
    %c0_30 = arith.constant 0 : index
    %44 = vector.load %arg11[%c4_28, %c0_29, %c0_30] : memref<7x8x1xbf16, #tpu.memory_space<vmem>>, vector<1x8x1xbf16>
    %45 = vector.shape_cast %44 : vector<1x8x1xbf16> to vector<8x1xbf16>
    %46 = arith.extf %45 : vector<8x1xbf16> to vector<8x1xf32>
    %47 = vector.broadcast %46 : vector<8x1xf32> to vector<8x128xf32>
    %48 = vector.broadcast %43 : vector<1x128xf32> to vector<8x128xf32>
    %49 = arith.mulf %47, %48 : vector<8x128xf32>
    %50 = arith.addf %40, %49 : vector<8x128xf32>
    %c5 = arith.constant 5 : index
    %c0_31 = arith.constant 0 : index
    %c0_32 = arith.constant 0 : index
    %51 = vector.load %arg1[%c5, %c0_31, %c0_32] : memref<7x256x128xbf16, #tpu.memory_space<vmem>>, vector<1x256x128xbf16>
    %52 = vector.shape_cast %51 : vector<1x256x128xbf16> to vector<256x128xbf16>
    %cst_33 = arith.constant dense<0.000000e+00> : vector<1x128xf32>
    %53 = tpu.matmul %1, %52, %cst_33 {dimension_numbers = #tpu.dot_dimension_numbers<[1], [0], [0], [1], [0, 0, 1, 1], [], []>} : vector<1x256xbf16>, vector<256x128xbf16>, vector<1x128xf32> -> vector<1x128xf32>
    %c5_34 = arith.constant 5 : index
    %c0_35 = arith.constant 0 : index
    %c0_36 = arith.constant 0 : index
    %54 = vector.load %arg11[%c5_34, %c0_35, %c0_36] : memref<7x8x1xbf16, #tpu.memory_space<vmem>>, vector<1x8x1xbf16>
    %55 = vector.shape_cast %54 : vector<1x8x1xbf16> to vector<8x1xbf16>
    %56 = arith.extf %55 : vector<8x1xbf16> to vector<8x1xf32>
    %57 = vector.broadcast %56 : vector<8x1xf32> to vector<8x128xf32>
    %58 = vector.broadcast %53 : vector<1x128xf32> to vector<8x128xf32>
    %59 = arith.mulf %57, %58 : vector<8x128xf32>
    %60 = arith.addf %50, %59 : vector<8x128xf32>
    %c6 = arith.constant 6 : index
    %c0_37 = arith.constant 0 : index
    %c0_38 = arith.constant 0 : index
    %61 = vector.load %arg1[%c6, %c0_37, %c0_38] : memref<7x256x128xbf16, #tpu.memory_space<vmem>>, vector<1x256x128xbf16>
    %62 = vector.shape_cast %61 : vector<1x256x128xbf16> to vector<256x128xbf16>
    %cst_39 = arith.constant dense<0.000000e+00> : vector<1x128xf32>
    %63 = tpu.matmul %1, %62, %cst_39 {dimension_numbers = #tpu.dot_dimension_numbers<[1], [0], [0], [1], [0, 0, 1, 1], [], []>} : vector<1x256xbf16>, vector<256x128xbf16>, vector<1x128xf32> -> vector<1x128xf32>
    %c6_40 = arith.constant 6 : index
    %c0_41 = arith.constant 0 : index
    %c0_42 = arith.constant 0 : index
    %64 = vector.load %arg11[%c6_40, %c0_41, %c0_42] : memref<7x8x1xbf16, #tpu.memory_space<vmem>>, vector<1x8x1xbf16>
    %65 = vector.shape_cast %64 : vector<1x8x1xbf16> to vector<8x1xbf16>
    %66 = arith.extf %65 : vector<8x1xbf16> to vector<8x1xf32>
    %67 = vector.broadcast %66 : vector<8x1xf32> to vector<8x128xf32>
    %68 = vector.broadcast %63 : vector<1x128xf32> to vector<8x128xf32>
    %69 = arith.mulf %67, %68 : vector<8x128xf32>
    %70 = arith.addf %60, %69 : vector<8x128xf32>
    %cst_43 = arith.constant dense<0.000000e+00> : vector<8xf32>
    %71 = vector.multi_reduction <add>, %70, %cst_43 [1] : vector<8x128xf32> to vector<8xf32>
    %72 = vector.shape_cast %71 : vector<8xf32> to vector<8x1xf32>
    %73 = arith.mulf %70, %70 : vector<8x128xf32>
    %cst_44 = arith.constant dense<0.000000e+00> : vector<8xf32>
    %74 = vector.multi_reduction <add>, %73, %cst_44 [1] : vector<8x128xf32> to vector<8xf32>
    %75 = vector.shape_cast %74 : vector<8xf32> to vector<8x1xf32>
    %cst_45 = arith.constant 7.812500e-03 : f32
    %76 = vector.broadcast %cst_45 : f32 to vector<8x1xf32>
    %77 = arith.mulf %72, %76 : vector<8x1xf32>
    %cst_46 = arith.constant 7.812500e-03 : f32
    %78 = vector.broadcast %cst_46 : f32 to vector<8x1xf32>
    %79 = arith.mulf %75, %78 : vector<8x1xf32>
    %80 = arith.mulf %77, %77 : vector<8x1xf32>
    %81 = arith.subf %79, %80 : vector<8x1xf32>
    %cst_47 = arith.constant 0.000000e+00 : f32
    %82 = vector.broadcast %cst_47 : f32 to vector<8x1xf32>
    %83 = arith.maximumf %81, %82 : vector<8x1xf32>
    %c0_48 = arith.constant 0 : index
    %c0_49 = arith.constant 0 : index
    %84 = vector.load %arg12[%c0_48, %c0_49] : memref<8x1xf32, #tpu.memory_space<vmem>>, vector<8x1xf32>
    %cst_50 = arith.constant 9.99999974E-6 : f32
    %85 = vector.broadcast %cst_50 : f32 to vector<8x1xf32>
    %86 = arith.addf %83, %85 : vector<8x1xf32>
    %87 = math.rsqrt %86 : vector<8x1xf32>
    %88 = arith.mulf %84, %87 : vector<8x1xf32>
    %c0_51 = arith.constant 0 : index
    %c0_52 = arith.constant 0 : index
    %89 = vector.load %arg13[%c0_51, %c0_52] : memref<8x1xf32, #tpu.memory_space<vmem>>, vector<8x1xf32>
    %90 = arith.mulf %77, %88 : vector<8x1xf32>
    %91 = arith.subf %89, %90 : vector<8x1xf32>
    %92 = vector.broadcast %88 : vector<8x1xf32> to vector<8x128xf32>
    %93 = arith.mulf %70, %92 : vector<8x128xf32>
    %94 = vector.broadcast %91 : vector<8x1xf32> to vector<8x128xf32>
    %95 = arith.addf %93, %94 : vector<8x128xf32>
    %cst_53 = arith.constant 0.000000e+00 : f32
    %96 = vector.broadcast %cst_53 : f32 to vector<8x128xf32>
    %97 = arith.maximumf %95, %96 : vector<8x128xf32>
    %98 = arith.truncf %97 : vector<8x128xf32> to vector<8x128xbf16>
    %c0_54 = arith.constant 0 : index
    %c0_55 = arith.constant 0 : index
    %c0_56 = arith.constant 0 : index
    %99 = vector.load %arg2[%c0_54, %c0_55, %c0_56] : memref<3x128x64xbf16, #tpu.memory_space<vmem>>, vector<1x128x64xbf16>
    %100 = vector.shape_cast %99 : vector<1x128x64xbf16> to vector<128x64xbf16>
    %cst_57 = arith.constant dense<0.000000e+00> : vector<8x64xf32>
    %101 = tpu.matmul %98, %100, %cst_57 {dimension_numbers = #tpu.dot_dimension_numbers<[1], [0], [0], [1], [0, 0, 1, 1], [], []>} : vector<8x128xbf16>, vector<128x64xbf16>, vector<8x64xf32> -> vector<8x64xf32>
    %c1_58 = arith.constant 1 : index
    %c0_59 = arith.constant 0 : index
    %c0_60 = arith.constant 0 : index
    %102 = vector.load %arg2[%c1_58, %c0_59, %c0_60] : memref<3x128x64xbf16, #tpu.memory_space<vmem>>, vector<1x128x64xbf16>
    %103 = vector.shape_cast %102 : vector<1x128x64xbf16> to vector<128x64xbf16>
    %cst_61 = arith.constant dense<0.000000e+00> : vector<8x64xf32>
    %104 = tpu.matmul %98, %103, %cst_61 {dimension_numbers = #tpu.dot_dimension_numbers<[1], [0], [0], [1], [0, 0, 1, 1], [], []>} : vector<8x128xbf16>, vector<128x64xbf16>, vector<8x64xf32> -> vector<8x64xf32>
    %105 = arith.maximumf %101, %104 : vector<8x64xf32>
    %c2_62 = arith.constant 2 : index
    %c0_63 = arith.constant 0 : index
    %c0_64 = arith.constant 0 : index
    %106 = vector.load %arg2[%c2_62, %c0_63, %c0_64] : memref<3x128x64xbf16, #tpu.memory_space<vmem>>, vector<1x128x64xbf16>
    %107 = vector.shape_cast %106 : vector<1x128x64xbf16> to vector<128x64xbf16>
    %cst_65 = arith.constant dense<0.000000e+00> : vector<8x64xf32>
    %108 = tpu.matmul %98, %107, %cst_65 {dimension_numbers = #tpu.dot_dimension_numbers<[1], [0], [0], [1], [0, 0, 1, 1], [], []>} : vector<8x128xbf16>, vector<128x64xbf16>, vector<8x64xf32> -> vector<8x64xf32>
    %109 = arith.maximumf %105, %108 : vector<8x64xf32>
    %110 = arith.truncf %109 : vector<8x64xf32> to vector<8x64xbf16>
    %c0_66 = arith.constant 0 : index
    %c0_67 = arith.constant 0 : index
    %c0_68 = arith.constant 0 : index
    %111 = vector.load %arg3[%c0_66, %c0_67, %c0_68] : memref<2x64x64xbf16, #tpu.memory_space<vmem>>, vector<1x64x64xbf16>
    %112 = vector.shape_cast %111 : vector<1x64x64xbf16> to vector<64x64xbf16>
    %cst_69 = arith.constant dense<0.000000e+00> : vector<8x64xf32>
    %113 = tpu.matmul %110, %112, %cst_69 {dimension_numbers = #tpu.dot_dimension_numbers<[1], [0], [0], [1], [0, 0, 1, 1], [], []>} : vector<8x64xbf16>, vector<64x64xbf16>, vector<8x64xf32> -> vector<8x64xf32>
    %c0_70 = arith.constant 0 : index
    %c0_71 = arith.constant 0 : index
    %c0_72 = arith.constant 0 : index
    %114 = vector.load %arg14[%c0_70, %c0_71, %c0_72] : memref<3x8x8xbf16, #tpu.memory_space<vmem>>, vector<1x8x8xbf16>
    %115 = vector.shape_cast %114 : vector<1x8x8xbf16> to vector<8x8xbf16>
    %116 = arith.truncf %113 : vector<8x64xf32> to vector<8x64xbf16>
    %cst_73 = arith.constant dense<0.000000e+00> : vector<8x64xf32>
    %117 = tpu.matmul %115, %116, %cst_73 {dimension_numbers = #tpu.dot_dimension_numbers<[1], [0], [0], [1], [0, 0, 1, 1], [], []>} : vector<8x8xbf16>, vector<8x64xbf16>, vector<8x64xf32> -> vector<8x64xf32>
    %c1_74 = arith.constant 1 : index
    %c0_75 = arith.constant 0 : index
    %c0_76 = arith.constant 0 : index
    %118 = vector.load %arg14[%c1_74, %c0_75, %c0_76] : memref<3x8x8xbf16, #tpu.memory_space<vmem>>, vector<1x8x8xbf16>
    %119 = vector.shape_cast %118 : vector<1x8x8xbf16> to vector<8x8xbf16>
    %120 = arith.truncf %109 : vector<8x64xf32> to vector<8x64xbf16>
    %cst_77 = arith.constant dense<0.000000e+00> : vector<8x64xf32>
    %121 = tpu.matmul %119, %120, %cst_77 {dimension_numbers = #tpu.dot_dimension_numbers<[1], [0], [0], [1], [0, 0, 1, 1], [], []>} : vector<8x8xbf16>, vector<8x64xbf16>, vector<8x64xf32> -> vector<8x64xf32>
    %122 = arith.addf %117, %121 : vector<8x64xf32>
    %c1_78 = arith.constant 1 : index
    %c0_79 = arith.constant 0 : index
    %c0_80 = arith.constant 0 : index
    %123 = vector.load %arg3[%c1_78, %c0_79, %c0_80] : memref<2x64x64xbf16, #tpu.memory_space<vmem>>, vector<1x64x64xbf16>
    %124 = vector.shape_cast %123 : vector<1x64x64xbf16> to vector<64x64xbf16>
    %cst_81 = arith.constant dense<0.000000e+00> : vector<8x64xf32>
    %125 = tpu.matmul %110, %124, %cst_81 {dimension_numbers = #tpu.dot_dimension_numbers<[1], [0], [0], [1], [0, 0, 1, 1], [], []>} : vector<8x64xbf16>, vector<64x64xbf16>, vector<8x64xf32> -> vector<8x64xf32>
    %c2_82 = arith.constant 2 : index
    %c0_83 = arith.constant 0 : index
    %c0_84 = arith.constant 0 : index
    %126 = vector.load %arg14[%c2_82, %c0_83, %c0_84] : memref<3x8x8xbf16, #tpu.memory_space<vmem>>, vector<1x8x8xbf16>
    %127 = vector.shape_cast %126 : vector<1x8x8xbf16> to vector<8x8xbf16>
    %128 = arith.truncf %125 : vector<8x64xf32> to vector<8x64xbf16>
    %cst_85 = arith.constant dense<0.000000e+00> : vector<8x64xf32>
    %129 = tpu.matmul %127, %128, %cst_85 {dimension_numbers = #tpu.dot_dimension_numbers<[1], [0], [0], [1], [0, 0, 1, 1], [], []>} : vector<8x8xbf16>, vector<8x64xbf16>, vector<8x64xf32> -> vector<8x64xf32>
    %130 = arith.addf %122, %129 : vector<8x64xf32>
    %cst_86 = arith.constant dense<0.000000e+00> : vector<8xf32>
    %131 = vector.multi_reduction <add>, %130, %cst_86 [1] : vector<8x64xf32> to vector<8xf32>
    %132 = vector.shape_cast %131 : vector<8xf32> to vector<8x1xf32>
    %133 = arith.mulf %130, %130 : vector<8x64xf32>
    %cst_87 = arith.constant dense<0.000000e+00> : vector<8xf32>
    %134 = vector.multi_reduction <add>, %133, %cst_87 [1] : vector<8x64xf32> to vector<8xf32>
    %135 = vector.shape_cast %134 : vector<8xf32> to vector<8x1xf32>
    %cst_88 = arith.constant 1.562500e-02 : f32
    %136 = vector.broadcast %cst_88 : f32 to vector<8x1xf32>
    %137 = arith.mulf %132, %136 : vector<8x1xf32>
    %cst_89 = arith.constant 1.562500e-02 : f32
    %138 = vector.broadcast %cst_89 : f32 to vector<8x1xf32>
    %139 = arith.mulf %135, %138 : vector<8x1xf32>
    %140 = arith.mulf %137, %137 : vector<8x1xf32>
    %141 = arith.subf %139, %140 : vector<8x1xf32>
    %cst_90 = arith.constant 0.000000e+00 : f32
    %142 = vector.broadcast %cst_90 : f32 to vector<8x1xf32>
    %143 = arith.maximumf %141, %142 : vector<8x1xf32>
    %c0_91 = arith.constant 0 : index
    %c0_92 = arith.constant 0 : index
    %144 = vector.load %arg15[%c0_91, %c0_92] : memref<8x1xf32, #tpu.memory_space<vmem>>, vector<8x1xf32>
    %cst_93 = arith.constant 9.99999974E-6 : f32
    %145 = vector.broadcast %cst_93 : f32 to vector<8x1xf32>
    %146 = arith.addf %143, %145 : vector<8x1xf32>
    %147 = math.rsqrt %146 : vector<8x1xf32>
    %148 = arith.mulf %144, %147 : vector<8x1xf32>
    %c0_94 = arith.constant 0 : index
    %c0_95 = arith.constant 0 : index
    %149 = vector.load %arg16[%c0_94, %c0_95] : memref<8x1xf32, #tpu.memory_space<vmem>>, vector<8x1xf32>
    %150 = arith.mulf %137, %148 : vector<8x1xf32>
    %151 = arith.subf %149, %150 : vector<8x1xf32>
    %152 = vector.broadcast %148 : vector<8x1xf32> to vector<8x64xf32>
    %153 = arith.mulf %130, %152 : vector<8x64xf32>
    %154 = vector.broadcast %151 : vector<8x1xf32> to vector<8x64xf32>
    %155 = arith.addf %153, %154 : vector<8x64xf32>
    %cst_96 = arith.constant 0.000000e+00 : f32
    %156 = vector.broadcast %cst_96 : f32 to vector<8x64xf32>
    %157 = arith.maximumf %155, %156 : vector<8x64xf32>
    %158 = arith.truncf %157 : vector<8x64xf32> to vector<8x64xbf16>
    %c0_97 = arith.constant 0 : index
    %c0_98 = arith.constant 0 : index
    %c0_99 = arith.constant 0 : index
    %159 = vector.load %arg3[%c0_97, %c0_98, %c0_99] : memref<2x64x64xbf16, #tpu.memory_space<vmem>>, vector<1x64x64xbf16>
    %160 = vector.shape_cast %159 : vector<1x64x64xbf16> to vector<64x64xbf16>
    %cst_100 = arith.constant dense<0.000000e+00> : vector<8x64xf32>
    %161 = tpu.matmul %158, %160, %cst_100 {dimension_numbers = #tpu.dot_dimension_numbers<[1], [0], [0], [1], [0, 0, 1, 1], [], []>} : vector<8x64xbf16>, vector<64x64xbf16>, vector<8x64xf32> -> vector<8x64xf32>
    %c0_101 = arith.constant 0 : index
    %c0_102 = arith.constant 0 : index
    %c0_103 = arith.constant 0 : index
    %162 = vector.load %arg17[%c0_101, %c0_102, %c0_103] : memref<3x8x8xbf16, #tpu.memory_space<vmem>>, vector<1x8x8xbf16>
    %163 = vector.shape_cast %162 : vector<1x8x8xbf16> to vector<8x8xbf16>
    %164 = arith.truncf %161 : vector<8x64xf32> to vector<8x64xbf16>
    %cst_104 = arith.constant dense<0.000000e+00> : vector<8x64xf32>
    %165 = tpu.matmul %163, %164, %cst_104 {dimension_numbers = #tpu.dot_dimension_numbers<[1], [0], [0], [1], [0, 0, 1, 1], [], []>} : vector<8x8xbf16>, vector<8x64xbf16>, vector<8x64xf32> -> vector<8x64xf32>
    %c1_105 = arith.constant 1 : index
    %c0_106 = arith.constant 0 : index
    %c0_107 = arith.constant 0 : index
    %166 = vector.load %arg17[%c1_105, %c0_106, %c0_107] : memref<3x8x8xbf16, #tpu.memory_space<vmem>>, vector<1x8x8xbf16>
    %167 = vector.shape_cast %166 : vector<1x8x8xbf16> to vector<8x8xbf16>
    %168 = arith.truncf %157 : vector<8x64xf32> to vector<8x64xbf16>
    %cst_108 = arith.constant dense<0.000000e+00> : vector<8x64xf32>
    %169 = tpu.matmul %167, %168, %cst_108 {dimension_numbers = #tpu.dot_dimension_numbers<[1], [0], [0], [1], [0, 0, 1, 1], [], []>} : vector<8x8xbf16>, vector<8x64xbf16>, vector<8x64xf32> -> vector<8x64xf32>
    %170 = arith.addf %165, %169 : vector<8x64xf32>
    %c1_109 = arith.constant 1 : index
    %c0_110 = arith.constant 0 : index
    %c0_111 = arith.constant 0 : index
    %171 = vector.load %arg3[%c1_109, %c0_110, %c0_111] : memref<2x64x64xbf16, #tpu.memory_space<vmem>>, vector<1x64x64xbf16>
    %172 = vector.shape_cast %171 : vector<1x64x64xbf16> to vector<64x64xbf16>
    %cst_112 = arith.constant dense<0.000000e+00> : vector<8x64xf32>
    %173 = tpu.matmul %158, %172, %cst_112 {dimension_numbers = #tpu.dot_dimension_numbers<[1], [0], [0], [1], [0, 0, 1, 1], [], []>} : vector<8x64xbf16>, vector<64x64xbf16>, vector<8x64xf32> -> vector<8x64xf32>
    %c2_113 = arith.constant 2 : index
    %c0_114 = arith.constant 0 : index
    %c0_115 = arith.constant 0 : index
    %174 = vector.load %arg17[%c2_113, %c0_114, %c0_115] : memref<3x8x8xbf16, #tpu.memory_space<vmem>>, vector<1x8x8xbf16>
    %175 = vector.shape_cast %174 : vector<1x8x8xbf16> to vector<8x8xbf16>
    %176 = arith.truncf %173 : vector<8x64xf32> to vector<8x64xbf16>
    %cst_116 = arith.constant dense<0.000000e+00> : vector<8x64xf32>
    %177 = tpu.matmul %175, %176, %cst_116 {dimension_numbers = #tpu.dot_dimension_numbers<[1], [0], [0], [1], [0, 0, 1, 1], [], []>} : vector<8x8xbf16>, vector<8x64xbf16>, vector<8x64xf32> -> vector<8x64xf32>
    %178 = arith.addf %170, %177 : vector<8x64xf32>
    %cst_117 = arith.constant dense<0.000000e+00> : vector<8xf32>
    %179 = vector.multi_reduction <add>, %178, %cst_117 [1] : vector<8x64xf32> to vector<8xf32>
    %180 = vector.shape_cast %179 : vector<8xf32> to vector<8x1xf32>
    %181 = arith.mulf %178, %178 : vector<8x64xf32>
    %cst_118 = arith.constant dense<0.000000e+00> : vector<8xf32>
    %182 = vector.multi_reduction <add>, %181, %cst_118 [1] : vector<8x64xf32> to vector<8xf32>
    %183 = vector.shape_cast %182 : vector<8xf32> to vector<8x1xf32>
    %cst_119 = arith.constant 1.562500e-02 : f32
    %184 = vector.broadcast %cst_119 : f32 to vector<8x1xf32>
    %185 = arith.mulf %180, %184 : vector<8x1xf32>
    %cst_120 = arith.constant 1.562500e-02 : f32
    %186 = vector.broadcast %cst_120 : f32 to vector<8x1xf32>
    %187 = arith.mulf %183, %186 : vector<8x1xf32>
    %188 = arith.mulf %185, %185 : vector<8x1xf32>
    %189 = arith.subf %187, %188 : vector<8x1xf32>
    %cst_121 = arith.constant 0.000000e+00 : f32
    %190 = vector.broadcast %cst_121 : f32 to vector<8x1xf32>
    %191 = arith.maximumf %189, %190 : vector<8x1xf32>
    %c0_122 = arith.constant 0 : index
    %c0_123 = arith.constant 0 : index
    %192 = vector.load %arg18[%c0_122, %c0_123] : memref<8x1xf32, #tpu.memory_space<vmem>>, vector<8x1xf32>
    %cst_124 = arith.constant 9.99999974E-6 : f32
    %193 = vector.broadcast %cst_124 : f32 to vector<8x1xf32>
    %194 = arith.addf %191, %193 : vector<8x1xf32>
    %195 = math.rsqrt %194 : vector<8x1xf32>
    %196 = arith.mulf %192, %195 : vector<8x1xf32>
    %c0_125 = arith.constant 0 : index
    %c0_126 = arith.constant 0 : index
    %197 = vector.load %arg19[%c0_125, %c0_126] : memref<8x1xf32, #tpu.memory_space<vmem>>, vector<8x1xf32>
    %198 = arith.mulf %185, %196 : vector<8x1xf32>
    %199 = arith.subf %197, %198 : vector<8x1xf32>
    %200 = vector.broadcast %196 : vector<8x1xf32> to vector<8x64xf32>
    %201 = arith.mulf %178, %200 : vector<8x64xf32>
    %202 = vector.broadcast %199 : vector<8x1xf32> to vector<8x64xf32>
    %203 = arith.addf %201, %202 : vector<8x64xf32>
    %204 = arith.addf %203, %109 : vector<8x64xf32>
    %cst_127 = arith.constant 0.000000e+00 : f32
    %205 = vector.broadcast %cst_127 : f32 to vector<8x64xf32>
    %206 = arith.maximumf %204, %205 : vector<8x64xf32>
    %207 = arith.truncf %206 : vector<8x64xf32> to vector<8x64xbf16>
    %c0_128 = arith.constant 0 : index
    %c0_129 = arith.constant 0 : index
    %c0_130 = arith.constant 0 : index
    %208 = vector.load %arg4[%c0_128, %c0_129, %c0_130] : memref<3x64x32xbf16, #tpu.memory_space<vmem>>, vector<1x64x32xbf16>
    %209 = vector.shape_cast %208 : vector<1x64x32xbf16> to vector<64x32xbf16>
    %cst_131 = arith.constant dense<0.000000e+00> : vector<8x32xf32>
    %210 = tpu.matmul %207, %209, %cst_131 {dimension_numbers = #tpu.dot_dimension_numbers<[1], [0], [0], [1], [0, 0, 1, 1], [], []>} : vector<8x64xbf16>, vector<64x32xbf16>, vector<8x32xf32> -> vector<8x32xf32>
    %c0_132 = arith.constant 0 : index
    %c0_133 = arith.constant 0 : index
    %c0_134 = arith.constant 0 : index
    %211 = vector.load %arg20[%c0_132, %c0_133, %c0_134] : memref<3x16x8xbf16, #tpu.memory_space<vmem>>, vector<1x16x8xbf16>
    %212 = vector.shape_cast %211 : vector<1x16x8xbf16> to vector<16x8xbf16>
    %213 = arith.truncf %210 : vector<8x32xf32> to vector<8x32xbf16>
    %cst_135 = arith.constant dense<0.000000e+00> : vector<16x32xf32>
    %214 = tpu.matmul %212, %213, %cst_135 {dimension_numbers = #tpu.dot_dimension_numbers<[1], [0], [0], [1], [0, 0, 1, 1], [], []>} : vector<16x8xbf16>, vector<8x32xbf16>, vector<16x32xf32> -> vector<16x32xf32>
    %c1_136 = arith.constant 1 : index
    %c0_137 = arith.constant 0 : index
    %c0_138 = arith.constant 0 : index
    %215 = vector.load %arg4[%c1_136, %c0_137, %c0_138] : memref<3x64x32xbf16, #tpu.memory_space<vmem>>, vector<1x64x32xbf16>
    %216 = vector.shape_cast %215 : vector<1x64x32xbf16> to vector<64x32xbf16>
    %cst_139 = arith.constant dense<0.000000e+00> : vector<8x32xf32>
    %217 = tpu.matmul %207, %216, %cst_139 {dimension_numbers = #tpu.dot_dimension_numbers<[1], [0], [0], [1], [0, 0, 1, 1], [], []>} : vector<8x64xbf16>, vector<64x32xbf16>, vector<8x32xf32> -> vector<8x32xf32>
    %c1_140 = arith.constant 1 : index
    %c0_141 = arith.constant 0 : index
    %c0_142 = arith.constant 0 : index
    %218 = vector.load %arg20[%c1_140, %c0_141, %c0_142] : memref<3x16x8xbf16, #tpu.memory_space<vmem>>, vector<1x16x8xbf16>
    %219 = vector.shape_cast %218 : vector<1x16x8xbf16> to vector<16x8xbf16>
    %220 = arith.truncf %217 : vector<8x32xf32> to vector<8x32xbf16>
    %cst_143 = arith.constant dense<0.000000e+00> : vector<16x32xf32>
    %221 = tpu.matmul %219, %220, %cst_143 {dimension_numbers = #tpu.dot_dimension_numbers<[1], [0], [0], [1], [0, 0, 1, 1], [], []>} : vector<16x8xbf16>, vector<8x32xbf16>, vector<16x32xf32> -> vector<16x32xf32>
    %222 = arith.addf %214, %221 : vector<16x32xf32>
    %c2_144 = arith.constant 2 : index
    %c0_145 = arith.constant 0 : index
    %c0_146 = arith.constant 0 : index
    %223 = vector.load %arg4[%c2_144, %c0_145, %c0_146] : memref<3x64x32xbf16, #tpu.memory_space<vmem>>, vector<1x64x32xbf16>
    %224 = vector.shape_cast %223 : vector<1x64x32xbf16> to vector<64x32xbf16>
    %cst_147 = arith.constant dense<0.000000e+00> : vector<8x32xf32>
    %225 = tpu.matmul %207, %224, %cst_147 {dimension_numbers = #tpu.dot_dimension_numbers<[1], [0], [0], [1], [0, 0, 1, 1], [], []>} : vector<8x64xbf16>, vector<64x32xbf16>, vector<8x32xf32> -> vector<8x32xf32>
    %c2_148 = arith.constant 2 : index
    %c0_149 = arith.constant 0 : index
    %c0_150 = arith.constant 0 : index
    %226 = vector.load %arg20[%c2_148, %c0_149, %c0_150] : memref<3x16x8xbf16, #tpu.memory_space<vmem>>, vector<1x16x8xbf16>
    %227 = vector.shape_cast %226 : vector<1x16x8xbf16> to vector<16x8xbf16>
    %228 = arith.truncf %225 : vector<8x32xf32> to vector<8x32xbf16>
    %cst_151 = arith.constant dense<0.000000e+00> : vector<16x32xf32>
    %229 = tpu.matmul %227, %228, %cst_151 {dimension_numbers = #tpu.dot_dimension_numbers<[1], [0], [0], [1], [0, 0, 1, 1], [], []>} : vector<16x8xbf16>, vector<8x32xbf16>, vector<16x32xf32> -> vector<16x32xf32>
    %230 = arith.addf %222, %229 : vector<16x32xf32>
    %cst_152 = arith.constant dense<0.000000e+00> : vector<16xf32>
    %231 = vector.multi_reduction <add>, %230, %cst_152 [1] : vector<16x32xf32> to vector<16xf32>
    %232 = vector.shape_cast %231 : vector<16xf32> to vector<16x1xf32>
    %233 = arith.mulf %230, %230 : vector<16x32xf32>
    %cst_153 = arith.constant dense<0.000000e+00> : vector<16xf32>
    %234 = vector.multi_reduction <add>, %233, %cst_153 [1] : vector<16x32xf32> to vector<16xf32>
    %235 = vector.shape_cast %234 : vector<16xf32> to vector<16x1xf32>
    %cst_154 = arith.constant 3.125000e-02 : f32
    %236 = vector.broadcast %cst_154 : f32 to vector<16x1xf32>
    %237 = arith.mulf %232, %236 : vector<16x1xf32>
    %cst_155 = arith.constant 3.125000e-02 : f32
    %238 = vector.broadcast %cst_155 : f32 to vector<16x1xf32>
    %239 = arith.mulf %235, %238 : vector<16x1xf32>
    %240 = arith.mulf %237, %237 : vector<16x1xf32>
    %241 = arith.subf %239, %240 : vector<16x1xf32>
    %cst_156 = arith.constant 0.000000e+00 : f32
    %242 = vector.broadcast %cst_156 : f32 to vector<16x1xf32>
    %243 = arith.maximumf %241, %242 : vector<16x1xf32>
    %c0_157 = arith.constant 0 : index
    %c0_158 = arith.constant 0 : index
    %244 = vector.load %arg21[%c0_157, %c0_158] : memref<16x1xf32, #tpu.memory_space<vmem>>, vector<16x1xf32>
    %cst_159 = arith.constant 9.99999974E-6 : f32
    %245 = vector.broadcast %cst_159 : f32 to vector<16x1xf32>
    %246 = arith.addf %243, %245 : vector<16x1xf32>
    %247 = math.rsqrt %246 : vector<16x1xf32>
    %248 = arith.mulf %244, %247 : vector<16x1xf32>
    %c0_160 = arith.constant 0 : index
    %c0_161 = arith.constant 0 : index
    %249 = vector.load %arg22[%c0_160, %c0_161] : memref<16x1xf32, #tpu.memory_space<vmem>>, vector<16x1xf32>
    %250 = arith.mulf %237, %248 : vector<16x1xf32>
    %251 = arith.subf %249, %250 : vector<16x1xf32>
    %252 = vector.broadcast %248 : vector<16x1xf32> to vector<16x32xf32>
    %253 = arith.mulf %230, %252 : vector<16x32xf32>
    %254 = vector.broadcast %251 : vector<16x1xf32> to vector<16x32xf32>
    %255 = arith.addf %253, %254 : vector<16x32xf32>
    %cst_162 = arith.constant 0.000000e+00 : f32
    %256 = vector.broadcast %cst_162 : f32 to vector<16x32xf32>
    %257 = arith.maximumf %255, %256 : vector<16x32xf32>
    %258 = arith.truncf %257 : vector<16x32xf32> to vector<16x32xbf16>
    %c0_163 = arith.constant 0 : index
    %c0_164 = arith.constant 0 : index
    %c0_165 = arith.constant 0 : index
    %259 = vector.load %arg5[%c0_163, %c0_164, %c0_165] : memref<2x32x32xbf16, #tpu.memory_space<vmem>>, vector<1x32x32xbf16>
    %260 = vector.shape_cast %259 : vector<1x32x32xbf16> to vector<32x32xbf16>
    %cst_166 = arith.constant dense<0.000000e+00> : vector<16x32xf32>
    %261 = tpu.matmul %258, %260, %cst_166 {dimension_numbers = #tpu.dot_dimension_numbers<[1], [0], [0], [1], [0, 0, 1, 1], [], []>} : vector<16x32xbf16>, vector<32x32xbf16>, vector<16x32xf32> -> vector<16x32xf32>
    %c0_167 = arith.constant 0 : index
    %c0_168 = arith.constant 0 : index
    %c0_169 = arith.constant 0 : index
    %262 = vector.load %arg23[%c0_167, %c0_168, %c0_169] : memref<3x16x16xbf16, #tpu.memory_space<vmem>>, vector<1x16x16xbf16>
    %263 = vector.shape_cast %262 : vector<1x16x16xbf16> to vector<16x16xbf16>
    %264 = arith.truncf %261 : vector<16x32xf32> to vector<16x32xbf16>
    %cst_170 = arith.constant dense<0.000000e+00> : vector<16x32xf32>
    %265 = tpu.matmul %263, %264, %cst_170 {dimension_numbers = #tpu.dot_dimension_numbers<[1], [0], [0], [1], [0, 0, 1, 1], [], []>} : vector<16x16xbf16>, vector<16x32xbf16>, vector<16x32xf32> -> vector<16x32xf32>
    %c1_171 = arith.constant 1 : index
    %c0_172 = arith.constant 0 : index
    %c0_173 = arith.constant 0 : index
    %266 = vector.load %arg23[%c1_171, %c0_172, %c0_173] : memref<3x16x16xbf16, #tpu.memory_space<vmem>>, vector<1x16x16xbf16>
    %267 = vector.shape_cast %266 : vector<1x16x16xbf16> to vector<16x16xbf16>
    %268 = arith.truncf %257 : vector<16x32xf32> to vector<16x32xbf16>
    %cst_174 = arith.constant dense<0.000000e+00> : vector<16x32xf32>
    %269 = tpu.matmul %267, %268, %cst_174 {dimension_numbers = #tpu.dot_dimension_numbers<[1], [0], [0], [1], [0, 0, 1, 1], [], []>} : vector<16x16xbf16>, vector<16x32xbf16>, vector<16x32xf32> -> vector<16x32xf32>
    %270 = arith.addf %265, %269 : vector<16x32xf32>
    %c1_175 = arith.constant 1 : index
    %c0_176 = arith.constant 0 : index
    %c0_177 = arith.constant 0 : index
    %271 = vector.load %arg5[%c1_175, %c0_176, %c0_177] : memref<2x32x32xbf16, #tpu.memory_space<vmem>>, vector<1x32x32xbf16>
    %272 = vector.shape_cast %271 : vector<1x32x32xbf16> to vector<32x32xbf16>
    %cst_178 = arith.constant dense<0.000000e+00> : vector<16x32xf32>
    %273 = tpu.matmul %258, %272, %cst_178 {dimension_numbers = #tpu.dot_dimension_numbers<[1], [0], [0], [1], [0, 0, 1, 1], [], []>} : vector<16x32xbf16>, vector<32x32xbf16>, vector<16x32xf32> -> vector<16x32xf32>
    %c2_179 = arith.constant 2 : index
    %c0_180 = arith.constant 0 : index
    %c0_181 = arith.constant 0 : index
    %274 = vector.load %arg23[%c2_179, %c0_180, %c0_181] : memref<3x16x16xbf16, #tpu.memory_space<vmem>>, vector<1x16x16xbf16>
    %275 = vector.shape_cast %274 : vector<1x16x16xbf16> to vector<16x16xbf16>
    %276 = arith.truncf %273 : vector<16x32xf32> to vector<16x32xbf16>
    %cst_182 = arith.constant dense<0.000000e+00> : vector<16x32xf32>
    %277 = tpu.matmul %275, %276, %cst_182 {dimension_numbers = #tpu.dot_dimension_numbers<[1], [0], [0], [1], [0, 0, 1, 1], [], []>} : vector<16x16xbf16>, vector<16x32xbf16>, vector<16x32xf32> -> vector<16x32xf32>
    %278 = arith.addf %270, %277 : vector<16x32xf32>
    %cst_183 = arith.constant dense<0.000000e+00> : vector<16xf32>
    %279 = vector.multi_reduction <add>, %278, %cst_183 [1] : vector<16x32xf32> to vector<16xf32>
    %280 = vector.shape_cast %279 : vector<16xf32> to vector<16x1xf32>
    %281 = arith.mulf %278, %278 : vector<16x32xf32>
    %cst_184 = arith.constant dense<0.000000e+00> : vector<16xf32>
    %282 = vector.multi_reduction <add>, %281, %cst_184 [1] : vector<16x32xf32> to vector<16xf32>
    %283 = vector.shape_cast %282 : vector<16xf32> to vector<16x1xf32>
    %cst_185 = arith.constant 3.125000e-02 : f32
    %284 = vector.broadcast %cst_185 : f32 to vector<16x1xf32>
    %285 = arith.mulf %280, %284 : vector<16x1xf32>
    %cst_186 = arith.constant 3.125000e-02 : f32
    %286 = vector.broadcast %cst_186 : f32 to vector<16x1xf32>
    %287 = arith.mulf %283, %286 : vector<16x1xf32>
    %288 = arith.mulf %285, %285 : vector<16x1xf32>
    %289 = arith.subf %287, %288 : vector<16x1xf32>
    %cst_187 = arith.constant 0.000000e+00 : f32
    %290 = vector.broadcast %cst_187 : f32 to vector<16x1xf32>
    %291 = arith.maximumf %289, %290 : vector<16x1xf32>
    %c0_188 = arith.constant 0 : index
    %c0_189 = arith.constant 0 : index
    %292 = vector.load %arg24[%c0_188, %c0_189] : memref<16x1xf32, #tpu.memory_space<vmem>>, vector<16x1xf32>
    %cst_190 = arith.constant 9.99999974E-6 : f32
    %293 = vector.broadcast %cst_190 : f32 to vector<16x1xf32>
    %294 = arith.addf %291, %293 : vector<16x1xf32>
    %295 = math.rsqrt %294 : vector<16x1xf32>
    %296 = arith.mulf %292, %295 : vector<16x1xf32>
    %c0_191 = arith.constant 0 : index
    %c0_192 = arith.constant 0 : index
    %297 = vector.load %arg25[%c0_191, %c0_192] : memref<16x1xf32, #tpu.memory_space<vmem>>, vector<16x1xf32>
    %298 = arith.mulf %285, %296 : vector<16x1xf32>
    %299 = arith.subf %297, %298 : vector<16x1xf32>
    %300 = vector.broadcast %296 : vector<16x1xf32> to vector<16x32xf32>
    %301 = arith.mulf %278, %300 : vector<16x32xf32>
    %302 = vector.broadcast %299 : vector<16x1xf32> to vector<16x32xf32>
    %303 = arith.addf %301, %302 : vector<16x32xf32>
    %304 = arith.truncf %206 : vector<8x64xf32> to vector<8x64xbf16>
    %c1_193 = arith.constant 1 : index
    %c0_194 = arith.constant 0 : index
    %c0_195 = arith.constant 0 : index
    %305 = vector.load %arg4[%c1_193, %c0_194, %c0_195] : memref<3x64x32xbf16, #tpu.memory_space<vmem>>, vector<1x64x32xbf16>
    %306 = vector.shape_cast %305 : vector<1x64x32xbf16> to vector<64x32xbf16>
    %cst_196 = arith.constant dense<0.000000e+00> : vector<8x32xf32>
    %307 = tpu.matmul %304, %306, %cst_196 {dimension_numbers = #tpu.dot_dimension_numbers<[1], [0], [0], [1], [0, 0, 1, 1], [], []>} : vector<8x64xbf16>, vector<64x32xbf16>, vector<8x32xf32> -> vector<8x32xf32>
    %c0_197 = arith.constant 0 : index
    %c0_198 = arith.constant 0 : index
    %c0_199 = arith.constant 0 : index
    %308 = vector.load %arg26[%c0_197, %c0_198, %c0_199] : memref<1x16x8xbf16, #tpu.memory_space<vmem>>, vector<1x16x8xbf16>
    %309 = vector.shape_cast %308 : vector<1x16x8xbf16> to vector<16x8xbf16>
    %310 = arith.truncf %307 : vector<8x32xf32> to vector<8x32xbf16>
    %cst_200 = arith.constant dense<0.000000e+00> : vector<16x32xf32>
    %311 = tpu.matmul %309, %310, %cst_200 {dimension_numbers = #tpu.dot_dimension_numbers<[1], [0], [0], [1], [0, 0, 1, 1], [], []>} : vector<16x8xbf16>, vector<8x32xbf16>, vector<16x32xf32> -> vector<16x32xf32>
    %cst_201 = arith.constant dense<0.000000e+00> : vector<16xf32>
    %312 = vector.multi_reduction <add>, %311, %cst_201 [1] : vector<16x32xf32> to vector<16xf32>
    %313 = vector.shape_cast %312 : vector<16xf32> to vector<16x1xf32>
    %314 = arith.mulf %311, %311 : vector<16x32xf32>
    %cst_202 = arith.constant dense<0.000000e+00> : vector<16xf32>
    %315 = vector.multi_reduction <add>, %314, %cst_202 [1] : vector<16x32xf32> to vector<16xf32>
    %316 = vector.shape_cast %315 : vector<16xf32> to vector<16x1xf32>
    %cst_203 = arith.constant 3.125000e-02 : f32
    %317 = vector.broadcast %cst_203 : f32 to vector<16x1xf32>
    %318 = arith.mulf %313, %317 : vector<16x1xf32>
    %cst_204 = arith.constant 3.125000e-02 : f32
    %319 = vector.broadcast %cst_204 : f32 to vector<16x1xf32>
    %320 = arith.mulf %316, %319 : vector<16x1xf32>
    %321 = arith.mulf %318, %318 : vector<16x1xf32>
    %322 = arith.subf %320, %321 : vector<16x1xf32>
    %cst_205 = arith.constant 0.000000e+00 : f32
    %323 = vector.broadcast %cst_205 : f32 to vector<16x1xf32>
    %324 = arith.maximumf %322, %323 : vector<16x1xf32>
    %c0_206 = arith.constant 0 : index
    %c0_207 = arith.constant 0 : index
    %325 = vector.load %arg27[%c0_206, %c0_207] : memref<16x1xf32, #tpu.memory_space<vmem>>, vector<16x1xf32>
    %cst_208 = arith.constant 9.99999974E-6 : f32
    %326 = vector.broadcast %cst_208 : f32 to vector<16x1xf32>
    %327 = arith.addf %324, %326 : vector<16x1xf32>
    %328 = math.rsqrt %327 : vector<16x1xf32>
    %329 = arith.mulf %325, %328 : vector<16x1xf32>
    %c0_209 = arith.constant 0 : index
    %c0_210 = arith.constant 0 : index
    %330 = vector.load %arg28[%c0_209, %c0_210] : memref<16x1xf32, #tpu.memory_space<vmem>>, vector<16x1xf32>
    %331 = arith.mulf %318, %329 : vector<16x1xf32>
    %332 = arith.subf %330, %331 : vector<16x1xf32>
    %333 = vector.broadcast %329 : vector<16x1xf32> to vector<16x32xf32>
    %334 = arith.mulf %311, %333 : vector<16x32xf32>
    %335 = vector.broadcast %332 : vector<16x1xf32> to vector<16x32xf32>
    %336 = arith.addf %334, %335 : vector<16x32xf32>
    %337 = arith.addf %303, %336 : vector<16x32xf32>
    %cst_211 = arith.constant 0.000000e+00 : f32
    %338 = vector.broadcast %cst_211 : f32 to vector<16x32xf32>
    %339 = arith.maximumf %337, %338 : vector<16x32xf32>
    %340 = arith.truncf %339 : vector<16x32xf32> to vector<16x32xbf16>
    %c0_212 = arith.constant 0 : index
    %c0_213 = arith.constant 0 : index
    %c0_214 = arith.constant 0 : index
    %341 = vector.load %arg6[%c0_212, %c0_213, %c0_214] : memref<3x32x16xbf16, #tpu.memory_space<vmem>>, vector<1x32x16xbf16>
    %342 = vector.shape_cast %341 : vector<1x32x16xbf16> to vector<32x16xbf16>
    %cst_215 = arith.constant dense<0.000000e+00> : vector<16x16xf32>
    %343 = tpu.matmul %340, %342, %cst_215 {dimension_numbers = #tpu.dot_dimension_numbers<[1], [0], [0], [1], [0, 0, 1, 1], [], []>} : vector<16x32xbf16>, vector<32x16xbf16>, vector<16x16xf32> -> vector<16x16xf32>
    %c0_216 = arith.constant 0 : index
    %c0_217 = arith.constant 0 : index
    %c0_218 = arith.constant 0 : index
    %344 = vector.load %arg29[%c0_216, %c0_217, %c0_218] : memref<3x32x16xbf16, #tpu.memory_space<vmem>>, vector<1x32x16xbf16>
    %345 = vector.shape_cast %344 : vector<1x32x16xbf16> to vector<32x16xbf16>
    %346 = arith.truncf %343 : vector<16x16xf32> to vector<16x16xbf16>
    %cst_219 = arith.constant dense<0.000000e+00> : vector<32x16xf32>
    %347 = tpu.matmul %345, %346, %cst_219 {dimension_numbers = #tpu.dot_dimension_numbers<[1], [0], [0], [1], [0, 0, 1, 1], [], []>} : vector<32x16xbf16>, vector<16x16xbf16>, vector<32x16xf32> -> vector<32x16xf32>
    %c1_220 = arith.constant 1 : index
    %c0_221 = arith.constant 0 : index
    %c0_222 = arith.constant 0 : index
    %348 = vector.load %arg6[%c1_220, %c0_221, %c0_222] : memref<3x32x16xbf16, #tpu.memory_space<vmem>>, vector<1x32x16xbf16>
    %349 = vector.shape_cast %348 : vector<1x32x16xbf16> to vector<32x16xbf16>
    %cst_223 = arith.constant dense<0.000000e+00> : vector<16x16xf32>
    %350 = tpu.matmul %340, %349, %cst_223 {dimension_numbers = #tpu.dot_dimension_numbers<[1], [0], [0], [1], [0, 0, 1, 1], [], []>} : vector<16x32xbf16>, vector<32x16xbf16>, vector<16x16xf32> -> vector<16x16xf32>
    %c1_224 = arith.constant 1 : index
    %c0_225 = arith.constant 0 : index
    %c0_226 = arith.constant 0 : index
    %351 = vector.load %arg29[%c1_224, %c0_225, %c0_226] : memref<3x32x16xbf16, #tpu.memory_space<vmem>>, vector<1x32x16xbf16>
    %352 = vector.shape_cast %351 : vector<1x32x16xbf16> to vector<32x16xbf16>
    %353 = arith.truncf %350 : vector<16x16xf32> to vector<16x16xbf16>
    %cst_227 = arith.constant dense<0.000000e+00> : vector<32x16xf32>
    %354 = tpu.matmul %352, %353, %cst_227 {dimension_numbers = #tpu.dot_dimension_numbers<[1], [0], [0], [1], [0, 0, 1, 1], [], []>} : vector<32x16xbf16>, vector<16x16xbf16>, vector<32x16xf32> -> vector<32x16xf32>
    %355 = arith.addf %347, %354 : vector<32x16xf32>
    %c2_228 = arith.constant 2 : index
    %c0_229 = arith.constant 0 : index
    %c0_230 = arith.constant 0 : index
    %356 = vector.load %arg6[%c2_228, %c0_229, %c0_230] : memref<3x32x16xbf16, #tpu.memory_space<vmem>>, vector<1x32x16xbf16>
    %357 = vector.shape_cast %356 : vector<1x32x16xbf16> to vector<32x16xbf16>
    %cst_231 = arith.constant dense<0.000000e+00> : vector<16x16xf32>
    %358 = tpu.matmul %340, %357, %cst_231 {dimension_numbers = #tpu.dot_dimension_numbers<[1], [0], [0], [1], [0, 0, 1, 1], [], []>} : vector<16x32xbf16>, vector<32x16xbf16>, vector<16x16xf32> -> vector<16x16xf32>
    %c2_232 = arith.constant 2 : index
    %c0_233 = arith.constant 0 : index
    %c0_234 = arith.constant 0 : index
    %359 = vector.load %arg29[%c2_232, %c0_233, %c0_234] : memref<3x32x16xbf16, #tpu.memory_space<vmem>>, vector<1x32x16xbf16>
    %360 = vector.shape_cast %359 : vector<1x32x16xbf16> to vector<32x16xbf16>
    %361 = arith.truncf %358 : vector<16x16xf32> to vector<16x16xbf16>
    %cst_235 = arith.constant dense<0.000000e+00> : vector<32x16xf32>
    %362 = tpu.matmul %360, %361, %cst_235 {dimension_numbers = #tpu.dot_dimension_numbers<[1], [0], [0], [1], [0, 0, 1, 1], [], []>} : vector<32x16xbf16>, vector<16x16xbf16>, vector<32x16xf32> -> vector<32x16xf32>
    %363 = arith.addf %355, %362 : vector<32x16xf32>
    %cst_236 = arith.constant dense<0.000000e+00> : vector<32xf32>
    %364 = vector.multi_reduction <add>, %363, %cst_236 [1] : vector<32x16xf32> to vector<32xf32>
    %365 = vector.shape_cast %364 : vector<32xf32> to vector<32x1xf32>
    %366 = arith.mulf %363, %363 : vector<32x16xf32>
    %cst_237 = arith.constant dense<0.000000e+00> : vector<32xf32>
    %367 = vector.multi_reduction <add>, %366, %cst_237 [1] : vector<32x16xf32> to vector<32xf32>
    %368 = vector.shape_cast %367 : vector<32xf32> to vector<32x1xf32>
    %cst_238 = arith.constant 6.250000e-02 : f32
    %369 = vector.broadcast %cst_238 : f32 to vector<32x1xf32>
    %370 = arith.mulf %365, %369 : vector<32x1xf32>
    %cst_239 = arith.constant 6.250000e-02 : f32
    %371 = vector.broadcast %cst_239 : f32 to vector<32x1xf32>
    %372 = arith.mulf %368, %371 : vector<32x1xf32>
    %373 = arith.mulf %370, %370 : vector<32x1xf32>
    %374 = arith.subf %372, %373 : vector<32x1xf32>
    %cst_240 = arith.constant 0.000000e+00 : f32
    %375 = vector.broadcast %cst_240 : f32 to vector<32x1xf32>
    %376 = arith.maximumf %374, %375 : vector<32x1xf32>
    %c0_241 = arith.constant 0 : index
    %c0_242 = arith.constant 0 : index
    %377 = vector.load %arg30[%c0_241, %c0_242] : memref<32x1xf32, #tpu.memory_space<vmem>>, vector<32x1xf32>
    %cst_243 = arith.constant 9.99999974E-6 : f32
    %378 = vector.broadcast %cst_243 : f32 to vector<32x1xf32>
    %379 = arith.addf %376, %378 : vector<32x1xf32>
    %380 = math.rsqrt %379 : vector<32x1xf32>
    %381 = arith.mulf %377, %380 : vector<32x1xf32>
    %c0_244 = arith.constant 0 : index
    %c0_245 = arith.constant 0 : index
    %382 = vector.load %arg31[%c0_244, %c0_245] : memref<32x1xf32, #tpu.memory_space<vmem>>, vector<32x1xf32>
    %383 = arith.mulf %370, %381 : vector<32x1xf32>
    %384 = arith.subf %382, %383 : vector<32x1xf32>
    %385 = vector.broadcast %381 : vector<32x1xf32> to vector<32x16xf32>
    %386 = arith.mulf %363, %385 : vector<32x16xf32>
    %387 = vector.broadcast %384 : vector<32x1xf32> to vector<32x16xf32>
    %388 = arith.addf %386, %387 : vector<32x16xf32>
    %cst_246 = arith.constant 0.000000e+00 : f32
    %389 = vector.broadcast %cst_246 : f32 to vector<32x16xf32>
    %390 = arith.maximumf %388, %389 : vector<32x16xf32>
    %391 = arith.truncf %390 : vector<32x16xf32> to vector<32x16xbf16>
    %c0_247 = arith.constant 0 : index
    %c0_248 = arith.constant 0 : index
    %c0_249 = arith.constant 0 : index
    %392 = vector.load %arg7[%c0_247, %c0_248, %c0_249] : memref<2x16x16xbf16, #tpu.memory_space<vmem>>, vector<1x16x16xbf16>
    %393 = vector.shape_cast %392 : vector<1x16x16xbf16> to vector<16x16xbf16>
    %cst_250 = arith.constant dense<0.000000e+00> : vector<32x16xf32>
    %394 = tpu.matmul %391, %393, %cst_250 {dimension_numbers = #tpu.dot_dimension_numbers<[1], [0], [0], [1], [0, 0, 1, 1], [], []>} : vector<32x16xbf16>, vector<16x16xbf16>, vector<32x16xf32> -> vector<32x16xf32>
    %c0_251 = arith.constant 0 : index
    %c0_252 = arith.constant 0 : index
    %c0_253 = arith.constant 0 : index
    %395 = vector.load %arg32[%c0_251, %c0_252, %c0_253] : memref<3x32x32xbf16, #tpu.memory_space<vmem>>, vector<1x32x32xbf16>
    %396 = vector.shape_cast %395 : vector<1x32x32xbf16> to vector<32x32xbf16>
    %397 = arith.truncf %394 : vector<32x16xf32> to vector<32x16xbf16>
    %cst_254 = arith.constant dense<0.000000e+00> : vector<32x16xf32>
    %398 = tpu.matmul %396, %397, %cst_254 {dimension_numbers = #tpu.dot_dimension_numbers<[1], [0], [0], [1], [0, 0, 1, 1], [], []>} : vector<32x32xbf16>, vector<32x16xbf16>, vector<32x16xf32> -> vector<32x16xf32>
    %c1_255 = arith.constant 1 : index
    %c0_256 = arith.constant 0 : index
    %c0_257 = arith.constant 0 : index
    %399 = vector.load %arg32[%c1_255, %c0_256, %c0_257] : memref<3x32x32xbf16, #tpu.memory_space<vmem>>, vector<1x32x32xbf16>
    %400 = vector.shape_cast %399 : vector<1x32x32xbf16> to vector<32x32xbf16>
    %401 = arith.truncf %390 : vector<32x16xf32> to vector<32x16xbf16>
    %cst_258 = arith.constant dense<0.000000e+00> : vector<32x16xf32>
    %402 = tpu.matmul %400, %401, %cst_258 {dimension_numbers = #tpu.dot_dimension_numbers<[1], [0], [0], [1], [0, 0, 1, 1], [], []>} : vector<32x32xbf16>, vector<32x16xbf16>, vector<32x16xf32> -> vector<32x16xf32>
    %403 = arith.addf %398, %402 : vector<32x16xf32>
    %c1_259 = arith.constant 1 : index
    %c0_260 = arith.constant 0 : index
    %c0_261 = arith.constant 0 : index
    %404 = vector.load %arg7[%c1_259, %c0_260, %c0_261] : memref<2x16x16xbf16, #tpu.memory_space<vmem>>, vector<1x16x16xbf16>
    %405 = vector.shape_cast %404 : vector<1x16x16xbf16> to vector<16x16xbf16>
    %cst_262 = arith.constant dense<0.000000e+00> : vector<32x16xf32>
    %406 = tpu.matmul %391, %405, %cst_262 {dimension_numbers = #tpu.dot_dimension_numbers<[1], [0], [0], [1], [0, 0, 1, 1], [], []>} : vector<32x16xbf16>, vector<16x16xbf16>, vector<32x16xf32> -> vector<32x16xf32>
    %c2_263 = arith.constant 2 : index
    %c0_264 = arith.constant 0 : index
    %c0_265 = arith.constant 0 : index
    %407 = vector.load %arg32[%c2_263, %c0_264, %c0_265] : memref<3x32x32xbf16, #tpu.memory_space<vmem>>, vector<1x32x32xbf16>
    %408 = vector.shape_cast %407 : vector<1x32x32xbf16> to vector<32x32xbf16>
    %409 = arith.truncf %406 : vector<32x16xf32> to vector<32x16xbf16>
    %cst_266 = arith.constant dense<0.000000e+00> : vector<32x16xf32>
    %410 = tpu.matmul %408, %409, %cst_266 {dimension_numbers = #tpu.dot_dimension_numbers<[1], [0], [0], [1], [0, 0, 1, 1], [], []>} : vector<32x32xbf16>, vector<32x16xbf16>, vector<32x16xf32> -> vector<32x16xf32>
    %411 = arith.addf %403, %410 : vector<32x16xf32>
    %cst_267 = arith.constant dense<0.000000e+00> : vector<32xf32>
    %412 = vector.multi_reduction <add>, %411, %cst_267 [1] : vector<32x16xf32> to vector<32xf32>
    %413 = vector.shape_cast %412 : vector<32xf32> to vector<32x1xf32>
    %414 = arith.mulf %411, %411 : vector<32x16xf32>
    %cst_268 = arith.constant dense<0.000000e+00> : vector<32xf32>
    %415 = vector.multi_reduction <add>, %414, %cst_268 [1] : vector<32x16xf32> to vector<32xf32>
    %416 = vector.shape_cast %415 : vector<32xf32> to vector<32x1xf32>
    %cst_269 = arith.constant 6.250000e-02 : f32
    %417 = vector.broadcast %cst_269 : f32 to vector<32x1xf32>
    %418 = arith.mulf %413, %417 : vector<32x1xf32>
    %cst_270 = arith.constant 6.250000e-02 : f32
    %419 = vector.broadcast %cst_270 : f32 to vector<32x1xf32>
    %420 = arith.mulf %416, %419 : vector<32x1xf32>
    %421 = arith.mulf %418, %418 : vector<32x1xf32>
    %422 = arith.subf %420, %421 : vector<32x1xf32>
    %cst_271 = arith.constant 0.000000e+00 : f32
    %423 = vector.broadcast %cst_271 : f32 to vector<32x1xf32>
    %424 = arith.maximumf %422, %423 : vector<32x1xf32>
    %c0_272 = arith.constant 0 : index
    %c0_273 = arith.constant 0 : index
    %425 = vector.load %arg33[%c0_272, %c0_273] : memref<32x1xf32, #tpu.memory_space<vmem>>, vector<32x1xf32>
    %cst_274 = arith.constant 9.99999974E-6 : f32
    %426 = vector.broadcast %cst_274 : f32 to vector<32x1xf32>
    %427 = arith.addf %424, %426 : vector<32x1xf32>
    %428 = math.rsqrt %427 : vector<32x1xf32>
    %429 = arith.mulf %425, %428 : vector<32x1xf32>
    %c0_275 = arith.constant 0 : index
    %c0_276 = arith.constant 0 : index
    %430 = vector.load %arg34[%c0_275, %c0_276] : memref<32x1xf32, #tpu.memory_space<vmem>>, vector<32x1xf32>
    %431 = arith.mulf %418, %429 : vector<32x1xf32>
    %432 = arith.subf %430, %431 : vector<32x1xf32>
    %433 = vector.broadcast %429 : vector<32x1xf32> to vector<32x16xf32>
    %434 = arith.mulf %411, %433 : vector<32x16xf32>
    %435 = vector.broadcast %432 : vector<32x1xf32> to vector<32x16xf32>
    %436 = arith.addf %434, %435 : vector<32x16xf32>
    %437 = arith.truncf %339 : vector<16x32xf32> to vector<16x32xbf16>
    %c1_277 = arith.constant 1 : index
    %c0_278 = arith.constant 0 : index
    %c0_279 = arith.constant 0 : index
    %438 = vector.load %arg6[%c1_277, %c0_278, %c0_279] : memref<3x32x16xbf16, #tpu.memory_space<vmem>>, vector<1x32x16xbf16>
    %439 = vector.shape_cast %438 : vector<1x32x16xbf16> to vector<32x16xbf16>
    %cst_280 = arith.constant dense<0.000000e+00> : vector<16x16xf32>
    %440 = tpu.matmul %437, %439, %cst_280 {dimension_numbers = #tpu.dot_dimension_numbers<[1], [0], [0], [1], [0, 0, 1, 1], [], []>} : vector<16x32xbf16>, vector<32x16xbf16>, vector<16x16xf32> -> vector<16x16xf32>
    %c0_281 = arith.constant 0 : index
    %c0_282 = arith.constant 0 : index
    %c0_283 = arith.constant 0 : index
    %441 = vector.load %arg35[%c0_281, %c0_282, %c0_283] : memref<1x32x16xbf16, #tpu.memory_space<vmem>>, vector<1x32x16xbf16>
    %442 = vector.shape_cast %441 : vector<1x32x16xbf16> to vector<32x16xbf16>
    %443 = arith.truncf %440 : vector<16x16xf32> to vector<16x16xbf16>
    %cst_284 = arith.constant dense<0.000000e+00> : vector<32x16xf32>
    %444 = tpu.matmul %442, %443, %cst_284 {dimension_numbers = #tpu.dot_dimension_numbers<[1], [0], [0], [1], [0, 0, 1, 1], [], []>} : vector<32x16xbf16>, vector<16x16xbf16>, vector<32x16xf32> -> vector<32x16xf32>
    %cst_285 = arith.constant dense<0.000000e+00> : vector<32xf32>
    %445 = vector.multi_reduction <add>, %444, %cst_285 [1] : vector<32x16xf32> to vector<32xf32>
    %446 = vector.shape_cast %445 : vector<32xf32> to vector<32x1xf32>
    %447 = arith.mulf %444, %444 : vector<32x16xf32>
    %cst_286 = arith.constant dense<0.000000e+00> : vector<32xf32>
    %448 = vector.multi_reduction <add>, %447, %cst_286 [1] : vector<32x16xf32> to vector<32xf32>
    %449 = vector.shape_cast %448 : vector<32xf32> to vector<32x1xf32>
    %cst_287 = arith.constant 6.250000e-02 : f32
    %450 = vector.broadcast %cst_287 : f32 to vector<32x1xf32>
    %451 = arith.mulf %446, %450 : vector<32x1xf32>
    %cst_288 = arith.constant 6.250000e-02 : f32
    %452 = vector.broadcast %cst_288 : f32 to vector<32x1xf32>
    %453 = arith.mulf %449, %452 : vector<32x1xf32>
    %454 = arith.mulf %451, %451 : vector<32x1xf32>
    %455 = arith.subf %453, %454 : vector<32x1xf32>
    %cst_289 = arith.constant 0.000000e+00 : f32
    %456 = vector.broadcast %cst_289 : f32 to vector<32x1xf32>
    %457 = arith.maximumf %455, %456 : vector<32x1xf32>
    %c0_290 = arith.constant 0 : index
    %c0_291 = arith.constant 0 : index
    %458 = vector.load %arg36[%c0_290, %c0_291] : memref<32x1xf32, #tpu.memory_space<vmem>>, vector<32x1xf32>
    %cst_292 = arith.constant 9.99999974E-6 : f32
    %459 = vector.broadcast %cst_292 : f32 to vector<32x1xf32>
    %460 = arith.addf %457, %459 : vector<32x1xf32>
    %461 = math.rsqrt %460 : vector<32x1xf32>
    %462 = arith.mulf %458, %461 : vector<32x1xf32>
    %c0_293 = arith.constant 0 : index
    %c0_294 = arith.constant 0 : index
    %463 = vector.load %arg37[%c0_293, %c0_294] : memref<32x1xf32, #tpu.memory_space<vmem>>, vector<32x1xf32>
    %464 = arith.mulf %451, %462 : vector<32x1xf32>
    %465 = arith.subf %463, %464 : vector<32x1xf32>
    %466 = vector.broadcast %462 : vector<32x1xf32> to vector<32x16xf32>
    %467 = arith.mulf %444, %466 : vector<32x16xf32>
    %468 = vector.broadcast %465 : vector<32x1xf32> to vector<32x16xf32>
    %469 = arith.addf %467, %468 : vector<32x16xf32>
    %470 = arith.addf %436, %469 : vector<32x16xf32>
    %cst_295 = arith.constant 0.000000e+00 : f32
    %471 = vector.broadcast %cst_295 : f32 to vector<32x16xf32>
    %472 = arith.maximumf %470, %471 : vector<32x16xf32>
    %473 = arith.truncf %472 : vector<32x16xf32> to vector<32x16xbf16>
    %c0_296 = arith.constant 0 : index
    %c0_297 = arith.constant 0 : index
    %c0_298 = arith.constant 0 : index
    %474 = vector.load %arg8[%c0_296, %c0_297, %c0_298] : memref<3x16x8xbf16, #tpu.memory_space<vmem>>, vector<1x16x8xbf16>
    %475 = vector.shape_cast %474 : vector<1x16x8xbf16> to vector<16x8xbf16>
    %cst_299 = arith.constant dense<0.000000e+00> : vector<32x8xf32>
    %476 = tpu.matmul %473, %475, %cst_299 {dimension_numbers = #tpu.dot_dimension_numbers<[1], [0], [0], [1], [0, 0, 1, 1], [], []>} : vector<32x16xbf16>, vector<16x8xbf16>, vector<32x8xf32> -> vector<32x8xf32>
    %c0_300 = arith.constant 0 : index
    %c0_301 = arith.constant 0 : index
    %c0_302 = arith.constant 0 : index
    %477 = vector.load %arg38[%c0_300, %c0_301, %c0_302] : memref<3x64x32xbf16, #tpu.memory_space<vmem>>, vector<1x64x32xbf16>
    %478 = vector.shape_cast %477 : vector<1x64x32xbf16> to vector<64x32xbf16>
    %479 = arith.truncf %476 : vector<32x8xf32> to vector<32x8xbf16>
    %cst_303 = arith.constant dense<0.000000e+00> : vector<64x8xf32>
    %480 = tpu.matmul %478, %479, %cst_303 {dimension_numbers = #tpu.dot_dimension_numbers<[1], [0], [0], [1], [0, 0, 1, 1], [], []>} : vector<64x32xbf16>, vector<32x8xbf16>, vector<64x8xf32> -> vector<64x8xf32>
    %c1_304 = arith.constant 1 : index
    %c0_305 = arith.constant 0 : index
    %c0_306 = arith.constant 0 : index
    %481 = vector.load %arg8[%c1_304, %c0_305, %c0_306] : memref<3x16x8xbf16, #tpu.memory_space<vmem>>, vector<1x16x8xbf16>
    %482 = vector.shape_cast %481 : vector<1x16x8xbf16> to vector<16x8xbf16>
    %cst_307 = arith.constant dense<0.000000e+00> : vector<32x8xf32>
    %483 = tpu.matmul %473, %482, %cst_307 {dimension_numbers = #tpu.dot_dimension_numbers<[1], [0], [0], [1], [0, 0, 1, 1], [], []>} : vector<32x16xbf16>, vector<16x8xbf16>, vector<32x8xf32> -> vector<32x8xf32>
    %c1_308 = arith.constant 1 : index
    %c0_309 = arith.constant 0 : index
    %c0_310 = arith.constant 0 : index
    %484 = vector.load %arg38[%c1_308, %c0_309, %c0_310] : memref<3x64x32xbf16, #tpu.memory_space<vmem>>, vector<1x64x32xbf16>
    %485 = vector.shape_cast %484 : vector<1x64x32xbf16> to vector<64x32xbf16>
    %486 = arith.truncf %483 : vector<32x8xf32> to vector<32x8xbf16>
    %cst_311 = arith.constant dense<0.000000e+00> : vector<64x8xf32>
    %487 = tpu.matmul %485, %486, %cst_311 {dimension_numbers = #tpu.dot_dimension_numbers<[1], [0], [0], [1], [0, 0, 1, 1], [], []>} : vector<64x32xbf16>, vector<32x8xbf16>, vector<64x8xf32> -> vector<64x8xf32>
    %488 = arith.addf %480, %487 : vector<64x8xf32>
    %c2_312 = arith.constant 2 : index
    %c0_313 = arith.constant 0 : index
    %c0_314 = arith.constant 0 : index
    %489 = vector.load %arg8[%c2_312, %c0_313, %c0_314] : memref<3x16x8xbf16, #tpu.memory_space<vmem>>, vector<1x16x8xbf16>
    %490 = vector.shape_cast %489 : vector<1x16x8xbf16> to vector<16x8xbf16>
    %cst_315 = arith.constant dense<0.000000e+00> : vector<32x8xf32>
    %491 = tpu.matmul %473, %490, %cst_315 {dimension_numbers = #tpu.dot_dimension_numbers<[1], [0], [0], [1], [0, 0, 1, 1], [], []>} : vector<32x16xbf16>, vector<16x8xbf16>, vector<32x8xf32> -> vector<32x8xf32>
    %c2_316 = arith.constant 2 : index
    %c0_317 = arith.constant 0 : index
    %c0_318 = arith.constant 0 : index
    %492 = vector.load %arg38[%c2_316, %c0_317, %c0_318] : memref<3x64x32xbf16, #tpu.memory_space<vmem>>, vector<1x64x32xbf16>
    %493 = vector.shape_cast %492 : vector<1x64x32xbf16> to vector<64x32xbf16>
    %494 = arith.truncf %491 : vector<32x8xf32> to vector<32x8xbf16>
    %cst_319 = arith.constant dense<0.000000e+00> : vector<64x8xf32>
    %495 = tpu.matmul %493, %494, %cst_319 {dimension_numbers = #tpu.dot_dimension_numbers<[1], [0], [0], [1], [0, 0, 1, 1], [], []>} : vector<64x32xbf16>, vector<32x8xbf16>, vector<64x8xf32> -> vector<64x8xf32>
    %496 = arith.addf %488, %495 : vector<64x8xf32>
    %cst_320 = arith.constant dense<0.000000e+00> : vector<64xf32>
    %497 = vector.multi_reduction <add>, %496, %cst_320 [1] : vector<64x8xf32> to vector<64xf32>
    %498 = vector.shape_cast %497 : vector<64xf32> to vector<64x1xf32>
    %499 = arith.mulf %496, %496 : vector<64x8xf32>
    %cst_321 = arith.constant dense<0.000000e+00> : vector<64xf32>
    %500 = vector.multi_reduction <add>, %499, %cst_321 [1] : vector<64x8xf32> to vector<64xf32>
    %501 = vector.shape_cast %500 : vector<64xf32> to vector<64x1xf32>
    %cst_322 = arith.constant 1.250000e-01 : f32
    %502 = vector.broadcast %cst_322 : f32 to vector<64x1xf32>
    %503 = arith.mulf %498, %502 : vector<64x1xf32>
    %cst_323 = arith.constant 1.250000e-01 : f32
    %504 = vector.broadcast %cst_323 : f32 to vector<64x1xf32>
    %505 = arith.mulf %501, %504 : vector<64x1xf32>
    %506 = arith.mulf %503, %503 : vector<64x1xf32>
    %507 = arith.subf %505, %506 : vector<64x1xf32>
    %cst_324 = arith.constant 0.000000e+00 : f32
    %508 = vector.broadcast %cst_324 : f32 to vector<64x1xf32>
    %509 = arith.maximumf %507, %508 : vector<64x1xf32>
    %c0_325 = arith.constant 0 : index
    %c0_326 = arith.constant 0 : index
    %510 = vector.load %arg39[%c0_325, %c0_326] : memref<64x1xf32, #tpu.memory_space<vmem>>, vector<64x1xf32>
    %cst_327 = arith.constant 9.99999974E-6 : f32
    %511 = vector.broadcast %cst_327 : f32 to vector<64x1xf32>
    %512 = arith.addf %509, %511 : vector<64x1xf32>
    %513 = math.rsqrt %512 : vector<64x1xf32>
    %514 = arith.mulf %510, %513 : vector<64x1xf32>
    %c0_328 = arith.constant 0 : index
    %c0_329 = arith.constant 0 : index
    %515 = vector.load %arg40[%c0_328, %c0_329] : memref<64x1xf32, #tpu.memory_space<vmem>>, vector<64x1xf32>
    %516 = arith.mulf %503, %514 : vector<64x1xf32>
    %517 = arith.subf %515, %516 : vector<64x1xf32>
    %518 = vector.broadcast %514 : vector<64x1xf32> to vector<64x8xf32>
    %519 = arith.mulf %496, %518 : vector<64x8xf32>
    %520 = vector.broadcast %517 : vector<64x1xf32> to vector<64x8xf32>
    %521 = arith.addf %519, %520 : vector<64x8xf32>
    %cst_330 = arith.constant 0.000000e+00 : f32
    %522 = vector.broadcast %cst_330 : f32 to vector<64x8xf32>
    %523 = arith.maximumf %521, %522 : vector<64x8xf32>
    %524 = arith.truncf %523 : vector<64x8xf32> to vector<64x8xbf16>
    %c0_331 = arith.constant 0 : index
    %c0_332 = arith.constant 0 : index
    %c0_333 = arith.constant 0 : index
    %525 = vector.load %arg9[%c0_331, %c0_332, %c0_333] : memref<2x8x8xbf16, #tpu.memory_space<vmem>>, vector<1x8x8xbf16>
    %526 = vector.shape_cast %525 : vector<1x8x8xbf16> to vector<8x8xbf16>
    %cst_334 = arith.constant dense<0.000000e+00> : vector<64x8xf32>
    %527 = tpu.matmul %524, %526, %cst_334 {dimension_numbers = #tpu.dot_dimension_numbers<[1], [0], [0], [1], [0, 0, 1, 1], [], []>} : vector<64x8xbf16>, vector<8x8xbf16>, vector<64x8xf32> -> vector<64x8xf32>
    %c0_335 = arith.constant 0 : index
    %c0_336 = arith.constant 0 : index
    %c0_337 = arith.constant 0 : index
    %528 = vector.load %arg41[%c0_335, %c0_336, %c0_337] : memref<3x64x64xbf16, #tpu.memory_space<vmem>>, vector<1x64x64xbf16>
    %529 = vector.shape_cast %528 : vector<1x64x64xbf16> to vector<64x64xbf16>
    %530 = arith.truncf %527 : vector<64x8xf32> to vector<64x8xbf16>
    %cst_338 = arith.constant dense<0.000000e+00> : vector<64x8xf32>
    %531 = tpu.matmul %529, %530, %cst_338 {dimension_numbers = #tpu.dot_dimension_numbers<[1], [0], [0], [1], [0, 0, 1, 1], [], []>} : vector<64x64xbf16>, vector<64x8xbf16>, vector<64x8xf32> -> vector<64x8xf32>
    %c1_339 = arith.constant 1 : index
    %c0_340 = arith.constant 0 : index
    %c0_341 = arith.constant 0 : index
    %532 = vector.load %arg41[%c1_339, %c0_340, %c0_341] : memref<3x64x64xbf16, #tpu.memory_space<vmem>>, vector<1x64x64xbf16>
    %533 = vector.shape_cast %532 : vector<1x64x64xbf16> to vector<64x64xbf16>
    %534 = arith.truncf %523 : vector<64x8xf32> to vector<64x8xbf16>
    %cst_342 = arith.constant dense<0.000000e+00> : vector<64x8xf32>
    %535 = tpu.matmul %533, %534, %cst_342 {dimension_numbers = #tpu.dot_dimension_numbers<[1], [0], [0], [1], [0, 0, 1, 1], [], []>} : vector<64x64xbf16>, vector<64x8xbf16>, vector<64x8xf32> -> vector<64x8xf32>
    %536 = arith.addf %531, %535 : vector<64x8xf32>
    %c1_343 = arith.constant 1 : index
    %c0_344 = arith.constant 0 : index
    %c0_345 = arith.constant 0 : index
    %537 = vector.load %arg9[%c1_343, %c0_344, %c0_345] : memref<2x8x8xbf16, #tpu.memory_space<vmem>>, vector<1x8x8xbf16>
    %538 = vector.shape_cast %537 : vector<1x8x8xbf16> to vector<8x8xbf16>
    %cst_346 = arith.constant dense<0.000000e+00> : vector<64x8xf32>
    %539 = tpu.matmul %524, %538, %cst_346 {dimension_numbers = #tpu.dot_dimension_numbers<[1], [0], [0], [1], [0, 0, 1, 1], [], []>} : vector<64x8xbf16>, vector<8x8xbf16>, vector<64x8xf32> -> vector<64x8xf32>
    %c2_347 = arith.constant 2 : index
    %c0_348 = arith.constant 0 : index
    %c0_349 = arith.constant 0 : index
    %540 = vector.load %arg41[%c2_347, %c0_348, %c0_349] : memref<3x64x64xbf16, #tpu.memory_space<vmem>>, vector<1x64x64xbf16>
    %541 = vector.shape_cast %540 : vector<1x64x64xbf16> to vector<64x64xbf16>
    %542 = arith.truncf %539 : vector<64x8xf32> to vector<64x8xbf16>
    %cst_350 = arith.constant dense<0.000000e+00> : vector<64x8xf32>
    %543 = tpu.matmul %541, %542, %cst_350 {dimension_numbers = #tpu.dot_dimension_numbers<[1], [0], [0], [1], [0, 0, 1, 1], [], []>} : vector<64x64xbf16>, vector<64x8xbf16>, vector<64x8xf32> -> vector<64x8xf32>
    %544 = arith.addf %536, %543 : vector<64x8xf32>
    %cst_351 = arith.constant dense<0.000000e+00> : vector<64xf32>
    %545 = vector.multi_reduction <add>, %544, %cst_351 [1] : vector<64x8xf32> to vector<64xf32>
    %546 = vector.shape_cast %545 : vector<64xf32> to vector<64x1xf32>
    %547 = arith.mulf %544, %544 : vector<64x8xf32>
    %cst_352 = arith.constant dense<0.000000e+00> : vector<64xf32>
    %548 = vector.multi_reduction <add>, %547, %cst_352 [1] : vector<64x8xf32> to vector<64xf32>
    %549 = vector.shape_cast %548 : vector<64xf32> to vector<64x1xf32>
    %cst_353 = arith.constant 1.250000e-01 : f32
    %550 = vector.broadcast %cst_353 : f32 to vector<64x1xf32>
    %551 = arith.mulf %546, %550 : vector<64x1xf32>
    %cst_354 = arith.constant 1.250000e-01 : f32
    %552 = vector.broadcast %cst_354 : f32 to vector<64x1xf32>
    %553 = arith.mulf %549, %552 : vector<64x1xf32>
    %554 = arith.mulf %551, %551 : vector<64x1xf32>
    %555 = arith.subf %553, %554 : vector<64x1xf32>
    %cst_355 = arith.constant 0.000000e+00 : f32
    %556 = vector.broadcast %cst_355 : f32 to vector<64x1xf32>
    %557 = arith.maximumf %555, %556 : vector<64x1xf32>
    %c0_356 = arith.constant 0 : index
    %c0_357 = arith.constant 0 : index
    %558 = vector.load %arg42[%c0_356, %c0_357] : memref<64x1xf32, #tpu.memory_space<vmem>>, vector<64x1xf32>
    %cst_358 = arith.constant 9.99999974E-6 : f32
    %559 = vector.broadcast %cst_358 : f32 to vector<64x1xf32>
    %560 = arith.addf %557, %559 : vector<64x1xf32>
    %561 = math.rsqrt %560 : vector<64x1xf32>
    %562 = arith.mulf %558, %561 : vector<64x1xf32>
    %c0_359 = arith.constant 0 : index
    %c0_360 = arith.constant 0 : index
    %563 = vector.load %arg43[%c0_359, %c0_360] : memref<64x1xf32, #tpu.memory_space<vmem>>, vector<64x1xf32>
    %564 = arith.mulf %551, %562 : vector<64x1xf32>
    %565 = arith.subf %563, %564 : vector<64x1xf32>
    %566 = vector.broadcast %562 : vector<64x1xf32> to vector<64x8xf32>
    %567 = arith.mulf %544, %566 : vector<64x8xf32>
    %568 = vector.broadcast %565 : vector<64x1xf32> to vector<64x8xf32>
    %569 = arith.addf %567, %568 : vector<64x8xf32>
    %570 = arith.truncf %472 : vector<32x16xf32> to vector<32x16xbf16>
    %c1_361 = arith.constant 1 : index
    %c0_362 = arith.constant 0 : index
    %c0_363 = arith.constant 0 : index
    %571 = vector.load %arg8[%c1_361, %c0_362, %c0_363] : memref<3x16x8xbf16, #tpu.memory_space<vmem>>, vector<1x16x8xbf16>
    %572 = vector.shape_cast %571 : vector<1x16x8xbf16> to vector<16x8xbf16>
    %cst_364 = arith.constant dense<0.000000e+00> : vector<32x8xf32>
    %573 = tpu.matmul %570, %572, %cst_364 {dimension_numbers = #tpu.dot_dimension_numbers<[1], [0], [0], [1], [0, 0, 1, 1], [], []>} : vector<32x16xbf16>, vector<16x8xbf16>, vector<32x8xf32> -> vector<32x8xf32>
    %c0_365 = arith.constant 0 : index
    %c0_366 = arith.constant 0 : index
    %c0_367 = arith.constant 0 : index
    %574 = vector.load %arg44[%c0_365, %c0_366, %c0_367] : memref<1x64x32xbf16, #tpu.memory_space<vmem>>, vector<1x64x32xbf16>
    %575 = vector.shape_cast %574 : vector<1x64x32xbf16> to vector<64x32xbf16>
    %576 = arith.truncf %573 : vector<32x8xf32> to vector<32x8xbf16>
    %cst_368 = arith.constant dense<0.000000e+00> : vector<64x8xf32>
    %577 = tpu.matmul %575, %576, %cst_368 {dimension_numbers = #tpu.dot_dimension_numbers<[1], [0], [0], [1], [0, 0, 1, 1], [], []>} : vector<64x32xbf16>, vector<32x8xbf16>, vector<64x8xf32> -> vector<64x8xf32>
    %cst_369 = arith.constant dense<0.000000e+00> : vector<64xf32>
    %578 = vector.multi_reduction <add>, %577, %cst_369 [1] : vector<64x8xf32> to vector<64xf32>
    %579 = vector.shape_cast %578 : vector<64xf32> to vector<64x1xf32>
    %580 = arith.mulf %577, %577 : vector<64x8xf32>
    %cst_370 = arith.constant dense<0.000000e+00> : vector<64xf32>
    %581 = vector.multi_reduction <add>, %580, %cst_370 [1] : vector<64x8xf32> to vector<64xf32>
    %582 = vector.shape_cast %581 : vector<64xf32> to vector<64x1xf32>
    %cst_371 = arith.constant 1.250000e-01 : f32
    %583 = vector.broadcast %cst_371 : f32 to vector<64x1xf32>
    %584 = arith.mulf %579, %583 : vector<64x1xf32>
    %cst_372 = arith.constant 1.250000e-01 : f32
    %585 = vector.broadcast %cst_372 : f32 to vector<64x1xf32>
    %586 = arith.mulf %582, %585 : vector<64x1xf32>
    %587 = arith.mulf %584, %584 : vector<64x1xf32>
    %588 = arith.subf %586, %587 : vector<64x1xf32>
    %cst_373 = arith.constant 0.000000e+00 : f32
    %589 = vector.broadcast %cst_373 : f32 to vector<64x1xf32>
    %590 = arith.maximumf %588, %589 : vector<64x1xf32>
    %c0_374 = arith.constant 0 : index
    %c0_375 = arith.constant 0 : index
    %591 = vector.load %arg45[%c0_374, %c0_375] : memref<64x1xf32, #tpu.memory_space<vmem>>, vector<64x1xf32>
    %cst_376 = arith.constant 9.99999974E-6 : f32
    %592 = vector.broadcast %cst_376 : f32 to vector<64x1xf32>
    %593 = arith.addf %590, %592 : vector<64x1xf32>
    %594 = math.rsqrt %593 : vector<64x1xf32>
    %595 = arith.mulf %591, %594 : vector<64x1xf32>
    %c0_377 = arith.constant 0 : index
    %c0_378 = arith.constant 0 : index
    %596 = vector.load %arg46[%c0_377, %c0_378] : memref<64x1xf32, #tpu.memory_space<vmem>>, vector<64x1xf32>
    %597 = arith.mulf %584, %595 : vector<64x1xf32>
    %598 = arith.subf %596, %597 : vector<64x1xf32>
    %599 = vector.broadcast %595 : vector<64x1xf32> to vector<64x8xf32>
    %600 = arith.mulf %577, %599 : vector<64x8xf32>
    %601 = vector.broadcast %598 : vector<64x1xf32> to vector<64x8xf32>
    %602 = arith.addf %600, %601 : vector<64x8xf32>
    %603 = arith.addf %569, %602 : vector<64x8xf32>
    %cst_379 = arith.constant 0.000000e+00 : f32
    %604 = vector.broadcast %cst_379 : f32 to vector<64x8xf32>
    %605 = arith.maximumf %603, %604 : vector<64x8xf32>
    %c0_380 = arith.constant 0 : index
    %c0_381 = arith.constant 0 : index
    %606 = vector.load %arg10[%c0_380, %c0_381] : memref<2x8xbf16, #tpu.memory_space<vmem>>, vector<2x8xbf16>
    %607 = arith.truncf %605 : vector<64x8xf32> to vector<64x8xbf16>
    %cst_382 = arith.constant dense<0.000000e+00> : vector<2x64xf32>
    %608 = tpu.matmul %606, %607, %cst_382 {dimension_numbers = #tpu.dot_dimension_numbers<[1], [1], [0], [0], [0, 0, 1, 0], [], []>} : vector<2x8xbf16>, vector<64x8xbf16>, vector<2x64xf32> -> vector<2x64xf32>
    %cst_383 = arith.constant 2.500000e-01 : f32
    %609 = vector.broadcast %cst_383 : f32 to vector<2x64xf32>
    %610 = arith.mulf %608, %609 : vector<2x64xf32>
    %c0_384 = arith.constant 0 : index
    %c0_385 = arith.constant 0 : index
    %611 = vector.load %arg47[%c0_384, %c0_385] : memref<2x64xf32, #tpu.memory_space<vmem>>, vector<2x64xf32>
    tpu.vector_store %arg47[%c0_384, %c0_385], %610 {strides = array<i32>} : memref<2x64xf32, #tpu.memory_space<vmem>>, vector<2x64xf32>,
    return
  }
}

</mosaic_0001>

<bundles_post_ra>
// kernel: tpu_custom_call.1
= control target key start
LH: loop header
LB: loop body
LE: loop exit
PB: predicated region body
PF: predicated region fallthrough
CT: control target
= control target key end

     0   :  { %s8381_s6 = smov 1   ;;  %s8382_s10 = smov 2   ;;  %s9886_s0 = inlined_call_operand.smem [shape: u32[48], index: -1, kind: input, shape index: {}] }
   0x1   :  { %s8440_s5 = sld [smem:[%s9886_s0]]   ;;  %s8383_s14 = smov 3  }
   0x2   :  { %s8445_s9 = sld [smem:[%s9886_s0 + %s8381_s6]]   ;;  %s8384_s18 = smov 4  }
   0x3   :  { %s8450_s13 = sld [smem:[%s9886_s0 + %s8382_s10]]   ;;  %s8385_s22 = smov 5  }
   0x4   :  { %s8455_s17 = sld [smem:[%s9886_s0 + %s8383_s14]]   ;;  %s8386_s26 = smov 6  }
   0x5   :  { %s8460_s21 = sld [smem:[%s9886_s0 + %s8384_s18]]   ;;  %s8387_s30 = smov 7  }
   0x6   :  { %s8465_s25 = sld [smem:[%s9886_s0 + %s8385_s22]]   ;;  %s8388_s4 = smov 8  }
   0x7   :  { %s8470_s29 = sld [smem:[%s9886_s0 + %s8386_s26]]   ;;  %s8389_s10 = smov 9  }
   0x8   :  { %s8475_s3 = sld [smem:[%s9886_s0 + %s8387_s30]]   ;;  %s8390_s15 = smov 10  }
   0x9   :  { %s8480_s8 = sld [smem:[%s9886_s0 + %s8388_s4]]   ;;  %s8391_s20 = smov 11  }
   0xa   :  { %s8485_s14 = sld [smem:[%s9886_s0 + %s8389_s10]]   ;;  %s8392_s26 = smov 12  }
   0xb   :  { %s8490_s19 = sld [smem:[%s9886_s0 + %s8390_s15]]   ;;  %s8393_s1 = smov 13  }
   0xc   :  { %9915 = sst [smem:[#allocation5_spill]] %s8465_s25  ;;  %s8394_s7 = smov 14  }
   0xd   :  { %9916 = sst [smem:[#allocation6_spill]] %s8470_s29  ;;  %s8395_s15 = smov 15  }
   0xe   :  { %9917 = sst [smem:[#allocation7_spill]] %s8475_s3  ;;  %s8396_s22 = smov 16  }
   0xf   :  { %9918 = sst [smem:[#allocation8_spill]] %s8480_s8  ;;  %s8397_s28 = smov 17  }
  0x10   :  { %9919 = sst [smem:[#allocation9_spill]] %s8485_s14 }
  0x11   :  { %9920 = sst [smem:[#allocation10_spill]] %s8490_s19 }
  0x12   :  { %s8495_s24 = sld [smem:[%s9886_s0 + %s8391_s20]]  }
  0x13   :  { %s8500_s30 = sld [smem:[%s9886_s0 + %s8392_s26]]  }
  0x14   :  { %s8505_s6 = sld [smem:[%s9886_s0 + %s8393_s1]]  }
  0x15   :  { %s8510_s12 = sld [smem:[%s9886_s0 + %s8394_s7]]   ;;  %s8398_s7 = smov 18  }
  0x16   :  { %s8515_s20 = sld [smem:[%s9886_s0 + %s8395_s15]]   ;;  %s8399_s15 = smov 19  }
  0x17   :  { %s8520_s27 = sld [smem:[%s9886_s0 + %s8396_s22]]   ;;  %s8400_s22 = smov 20  }
  0x18   :  { %s8525_s4 = sld [smem:[%s9886_s0 + %s8397_s28]]   ;;  %s8401_s28 = smov 21  }
  0x19   :  { %s8530_s19 = sld [smem:[%s9886_s0 + %s8398_s7]]   ;;  %s8402_s7 = smov 22  }
  0x1a   :  { %s8535_s14 = sld [smem:[%s9886_s0 + %s8399_s15]]   ;;  %s8403_s15 = smov 23  }
  0x1b   :  { %s8540_s8 = sld [smem:[%s9886_s0 + %s8400_s22]]   ;;  %s8404_s22 = smov 24  }
  0x1c   :  { %s8545_s3 = sld [smem:[%s9886_s0 + %s8401_s28]]   ;;  %s8405_s28 = smov 25  }
  0x1d   :  { %s8550_s29 = sld [smem:[%s9886_s0 + %s8402_s7]]   ;;  %s8406_s7 = smov 26  }
  0x1e   :  { %s8555_s25 = sld [smem:[%s9886_s0 + %s8403_s15]]   ;;  %s8407_s15 = smov 27  }
  0x21   :  { %9921 = sst [smem:[#allocation11_spill]] %s8540_s8 }
  0x22   :  { %9922 = sst [smem:[#allocation12_spill]] %s8545_s3 }
  0x23   :  { %9923 = sst [smem:[#allocation13_spill]] %s8550_s29 }
  0x24   :  { %9924 = sst [smem:[#allocation14_spill]] %s8555_s25 }
  0x25   :  { %s8560_s8 = sld [smem:[%s9886_s0 + %s8404_s22]]   ;;  %s8408_s22 = smov 28  }
  0x26   :  { %s8565_s3 = sld [smem:[%s9886_s0 + %s8405_s28]]   ;;  %s8409_s28 = smov 29  }
  0x27   :  { %s8570_s29 = sld [smem:[%s9886_s0 + %s8406_s7]]   ;;  %s8410_s7 = smov 30  }
  0x28   :  { %s8575_s25 = sld [smem:[%s9886_s0 + %s8407_s15]]   ;;  %s8411_s15 = smov 31  }
  0x2b   :  { %9925 = sst [smem:[#allocation15_spill]] %s8560_s8 }
  0x2c   :  { %9926 = sst [smem:[#allocation16_spill]] %s8565_s3 }
  0x2d   :  { %9927 = sst [smem:[#allocation17_spill]] %s8570_s29 }
  0x2e   :  { %9928 = sst [smem:[#allocation18_spill]] %s8575_s25 }
  0x2f   :  { %s8580_s8 = sld [smem:[%s9886_s0 + %s8408_s22]]   ;;  %s8412_s22 = smov 32  }
  0x30   :  { %s8585_s3 = sld [smem:[%s9886_s0 + %s8409_s28]]   ;;  %s8413_s28 = smov 33  }
  0x31   :  { %s8590_s29 = sld [smem:[%s9886_s0 + %s8410_s7]]   ;;  %s8414_s7 = smov 34  }
  0x32   :  { %s8595_s25 = sld [smem:[%s9886_s0 + %s8411_s15]]   ;;  %s8415_s15 = smov 35  }
  0x35   :  { %9929 = sst [smem:[#allocation19_spill]] %s8580_s8 }
  0x36   :  { %9930 = sst [smem:[#allocation20_spill]] %s8585_s3 }
  0x37   :  { %9931 = sst [smem:[#allocation21_spill]] %s8590_s29 }
  0x38   :  { %9932 = sst [smem:[#allocation22_spill]] %s8595_s25 }
  0x39   :  { %s8600_s8 = sld [smem:[%s9886_s0 + %s8412_s22]]   ;;  %s8416_s22 = smov 36  }
  0x3a   :  { %s8605_s3 = sld [smem:[%s9886_s0 + %s8413_s28]]   ;;  %s8417_s28 = smov 37  }
  0x3b   :  { %s8610_s29 = sld [smem:[%s9886_s0 + %s8414_s7]]   ;;  %s8418_s7 = smov 38  }
  0x3c   :  { %s8615_s25 = sld [smem:[%s9886_s0 + %s8415_s15]]   ;;  %s8419_s15 = smov 39  }
  0x3f   :  { %9933 = sst [smem:[#allocation23_spill]] %s8600_s8 }
  0x40   :  { %9934 = sst [smem:[#allocation24_spill]] %s8605_s3 }
  0x41   :  { %9935 = sst [smem:[#allocation25_spill]] %s8610_s29 }
  0x42   :  { %9936 = sst [smem:[#allocation26_spill]] %s8615_s25 }
  0x43   :  { %s8620_s8 = sld [smem:[%s9886_s0 + %s8416_s22]]   ;;  %s8420_s22 = smov 40  }
  0x44   :  { %s8625_s3 = sld [smem:[%s9886_s0 + %s8417_s28]]   ;;  %s8421_s28 = smov 41  }
  0x45   :  { %s8630_s29 = sld [smem:[%s9886_s0 + %s8418_s7]]   ;;  %s8422_s7 = smov 42  }
  0x46   :  { %s8635_s25 = sld [smem:[%s9886_s0 + %s8419_s15]]   ;;  %s8423_s15 = smov 43  }
  0x49   :  { %9937 = sst [smem:[#allocation27_spill]] %s8620_s8 }
  0x4a   :  { %9938 = sst [smem:[#allocation28_spill]] %s8625_s3 }
  0x4b   :  { %9939 = sst [smem:[#allocation29_spill]] %s8630_s29 }
  0x4c   :  { %9940 = sst [smem:[#allocation30_spill]] %s8635_s25 }
  0x4d   :  { %s8640_s8 = sld [smem:[%s9886_s0 + %s8420_s22]]   ;;  %s8424_s22 = smov 44  }
  0x4e   :  { %s8645_s3 = sld [smem:[%s9886_s0 + %s8421_s28]]   ;;  %s8425_s28 = smov 45  }
  0x4f   :  { %s8650_s29 = sld [smem:[%s9886_s0 + %s8422_s7]]   ;;  %s8426_s7 = smov 46  }
  0x50   :  { %s8655_s25 = sld [smem:[%s9886_s0 + %s8423_s15]]   ;;  %s8427_s15 = smov 47  }
  0x53   :  { %9941 = sst [smem:[#allocation31_spill]] %s8640_s8 }
  0x54   :  { %9942 = sst [smem:[#allocation32_spill]] %s8645_s3 }
  0x55   :  { %9943 = sst [smem:[#allocation33_spill]] %s8650_s29 }
  0x56   :  { %9944 = sst [smem:[#allocation34_spill]] %s8655_s25 }
  0x57   :  { %s8660_s8 = sld [smem:[%s9886_s0 + %s8424_s22]]  }
  0x58   :  { %s8665_s3 = sld [smem:[%s9886_s0 + %s8425_s28]]  }
  0x59   :  { %s8670_s29 = sld [smem:[%s9886_s0 + %s8426_s7]]  }
  0x5a   :  { %s8675_s25 = sld [smem:[%s9886_s0 + %s8427_s15]]  }
  0x5b   :  { %v8049_v0 = vld [vmem:[%s8445_s9 + $0x78] sm:$0xff]   ;;  %v8428_v2 = vmov 0   ;;  %v8053_v5 = vld [vmem:[%s8445_s9 + $0x70] sm:$0xff]   ;;  %v8057_v9 = vld [vmem:[%s8445_s9 + $0x68] sm:$0xff]   ;;  %v198_v22 = vlaneseq }
  0x5c   :  { %v8050_v1 = vld [vmem:[%s8445_s9 + $0xf8] sm:$0xff]   ;;  %8042 = vset.pattern.permute.xlu0 %v8428_v2  ;;  %8048 = vset.pattern.permute.xlu1 %v8428_v2  ;;  %v8054_v6 = vld [vmem:[%s8445_s9 + $0xf0] sm:$0xff]   ;;  %v8058_v10 = vld [vmem:[%s8445_s9 + $0xe8] sm:$0xff]  }
  0x5d   :  { %7162 = vmatprep.subr.bf16.mxu0 %v8049_v0  ;;  %v8051_v3 = vld [vmem:[%s8445_s9 + $0x38] sm:$0xff]   ;;  %7184 = vmatprep.subr.bf16.mxu1 %v8050_v1  ;;  %v8055_v7 = vld [vmem:[%s8445_s9 + $0x30] sm:$0xff]   ;;  %v8059_v11 = vld [vmem:[%s8445_s9 + $0x28] sm:$0xff]   ;;  %v199_v27 = vshrl.u32 %v198_v22, 7 }
  0x5e   :  { %v8052_v4 = vld [vmem:[%s8445_s9 + $0xb8] sm:$0xff]   ;;  %7163 = vmatpush3.bf16.msra.mxu0 %v8051_v3  ;;  %v8056_v8 = vld [vmem:[%s8445_s9 + $0xb0] sm:$0xff]   ;;  %v8060_v12 = vld [vmem:[%s8445_s9 + $0xa8] sm:$0xff]  }
  0x5f   :  { %7185 = vmatpush3.bf16.msra.mxu1 %v8052_v4  ;;  %7164 = vmatprep.subr.bf16.mxu0 %v8053_v5  ;;  %v8061_v13 = vld [vmem:[%s8445_s9 + $0x60] sm:$0xff]   ;;  %v8065_v17 = vld [vmem:[%s8445_s9 + $0x58] sm:$0xff]   ;;  %v8069_v21 = vld [vmem:[%s8445_s9 + $0x50] sm:$0xff]   ;;  %v8706_v32 = vsub.s32 0, %v199_v27  ;;  %v204_v34 = vsub.s32 1, %v199_v27 }
  0x60   :  { %7186 = vmatprep.subr.bf16.mxu1 %v8054_v6  ;;  %v8062_v14 = vld [vmem:[%s8445_s9 + $0xe0] sm:$0xff]   ;;  %v8066_v18 = vld [vmem:[%s8445_s9 + $0xd8] sm:$0xff]   ;;  %v8070_v23 = vld [vmem:[%s8445_s9 + $0xd0] sm:$0xff]  }
  0x61   :  { %v8063_v15 = vld [vmem:[%s8445_s9 + $0x20] sm:$0xff]   ;;  %v8067_v19 = vld [vmem:[%s8445_s9 + $0x18] sm:$0xff]   ;;  %v8071_v24 = vld [vmem:[%s8445_s9 + $0x10] sm:$0xff]  }
  0x62   :  { %7165 = vmatpush3.bf16.msra.mxu0 %v8055_v7  ;;  %v8064_v16 = vld [vmem:[%s8445_s9 + $0xa0] sm:$0xff]   ;;  %v8068_v20 = vld [vmem:[%s8445_s9 + $0x98] sm:$0xff]   ;;  %v8072_v25 = vld [vmem:[%s8445_s9 + $0x90] sm:$0xff]  }
  0x63   :  { %7187 = vmatpush3.bf16.msra.mxu1 %v8056_v8  ;;  %7166 = vmatprep.subr.bf16.mxu0 %v8057_v9  ;;  %v8073_v26 = vld [vmem:[%s8445_s9 + $0x48] sm:$0xff]   ;;  %v8077_v31 = vld [vmem:[%s8445_s9 + $0x40] sm:$0xff]   ;;  %v8081_v40 = vld [vmem:[%s8445_s9 + $0x178] sm:$0xff]  }
  0x64   :  { %7188 = vmatprep.subr.bf16.mxu1 %v8058_v10  ;;  %v8074_v28 = vld [vmem:[%s8445_s9 + $0xc8] sm:$0xff]   ;;  %v8078_v33 = vld [vmem:[%s8445_s9 + $0xc0] sm:$0xff]   ;;  %v8082_v41 = vld [vmem:[%s8445_s9 + $0x138] sm:$0xff]  }
  0x65   :  { %v8075_v29 = vld [vmem:[%s8445_s9 + $0x8] sm:$0xff]   ;;  %v8079_v35 = vld [vmem:[%s8445_s9] sm:$0xff]   ;;  %v8083_v44 = vld [vmem:[%s8445_s9 + $0x1f8] sm:$0xff]  }
  0x66   :  { %7167 = vmatpush3.bf16.msra.mxu0 %v8059_v11  ;;  %v8076_v30 = vld [vmem:[%s8445_s9 + $0x88] sm:$0xff]   ;;  %v8080_v36 = vld [vmem:[%s8445_s9 + $0x80] sm:$0xff]   ;;  %v8084_v45 = vld [vmem:[%s8445_s9 + $0x1b8] sm:$0xff]  }
  0x67   :  { %7189 = vmatpush3.bf16.msra.mxu1 %v8060_v12  ;;  %7168 = vmatprep.subr.bf16.mxu0 %v8061_v13  ;;  %v196_v37 = vld [vmem:[%s8440_s5] sm:$0x3]  ;;  %v8085_v46 = vld [vmem:[%s8445_s9 + $0x170] sm:$0xff]   ;;  %v8089_v50 = vld [vmem:[%s8445_s9 + $0x168] sm:$0xff]  }
  0x68   :  { %7190 = vmatprep.subr.bf16.mxu1 %v8062_v14  ;;  %v205_v38 = vrot.slane %v196_v37, %v204_v34  ;;  %v201_v39 = vrot.slane %v196_v37, %v8706_v32  ;;  %v8086_v47 = vld [vmem:[%s8445_s9 + $0x130] sm:$0xff]   ;;  %v8090_v51 = vld [vmem:[%s8445_s9 + $0x128] sm:$0xff]   ;;  %v8093_v54 = vld [vmem:[%s8445_s9 + $0x160] sm:$0xff]  }
  0x69   :  { %v8087_v48 = vld [vmem:[%s8445_s9 + $0x1f0] sm:$0xff]   ;;  %v8091_v52 = vld [vmem:[%s8445_s9 + $0x1e8] sm:$0xff]   ;;  %v8094_v55 = vld [vmem:[%s8445_s9 + $0x120] sm:$0xff]  }
  0x6a   :  { %7169 = vmatpush3.bf16.msra.mxu0 %v8063_v15  ;;  %v8715_v42 = vpack.c.bf16 %v205_v38, %v205_v38  ;;  %v8717_v43 = vpack.c.bf16 %v201_v39, %v201_v39  ;;  %v8088_v49 = vld [vmem:[%s8445_s9 + $0x1b0] sm:$0xff]   ;;  %v8092_v53 = vld [vmem:[%s8445_s9 + $0x1a8] sm:$0xff]   ;;  %v8095_v56 = vld [vmem:[%s8445_s9 + $0x1e0] sm:$0xff]  }
  0x6b   :  { %7191 = vmatpush3.bf16.msra.mxu1 %v8064_v16  ;;  %7170 = vmatprep.subr.bf16.mxu0 %v8065_v17  ;;  %v8096_v57 = vld [vmem:[%s8445_s9 + $0x1a0] sm:$0xff]   ;;  %v8097_v58 = vld [vmem:[%s8445_s9 + $0x158] sm:$0xff]   ;;  %v8101_v62 = vld [vmem:[%s8445_s9 + $0x150] sm:$0xff]  }
  0x6c   :  { %7192 = vmatprep.subr.bf16.mxu1 %v8066_v18  ;;  %370 = vmatprep.mubr.bf16.mxu0 %v8715_v42  ;;  %v8098_v59 = vld [vmem:[%s8445_s9 + $0x118] sm:$0xff]   ;;  %v8102_v63 = vld [vmem:[%s8445_s9 + $0x110] sm:$0xff]   ;;  %v8105_v2 = vld [vmem:[%s8445_s9 + $0x148] sm:$0xff]  }
  0x6d   :  { %551 = vmatprep.mubr.bf16.mxu1 %v8715_v42  ;;  %v8099_v60 = vld [vmem:[%s8445_s9 + $0x1d8] sm:$0xff]   ;;  %v8103_v0 = vld [vmem:[%s8445_s9 + $0x1d0] sm:$0xff]   ;;  %v8106_v3 = vld [vmem:[%s8445_s9 + $0x108] sm:$0xff]  }
  0x6e   :  { %7171 = vmatpush3.bf16.msra.mxu0 %v8067_v19  ;;  %v8100_v61 = vld [vmem:[%s8445_s9 + $0x198] sm:$0xff]   ;;  %v8104_v1 = vld [vmem:[%s8445_s9 + $0x190] sm:$0xff]   ;;  %v8107_v4 = vld [vmem:[%s8445_s9 + $0x1c8] sm:$0xff]  }
  0x6f   :  { %7193 = vmatpush3.bf16.msra.mxu1 %v8068_v20  ;;  %7172 = vmatprep.subr.bf16.mxu0 %v8069_v21  ;;  %v8108_v5 = vld [vmem:[%s8445_s9 + $0x188] sm:$0xff]   ;;  %v8109_v6 = vld [vmem:[%s8445_s9 + $0x140] sm:$0xff]   ;;  %v8113_v10 = vld [vmem:[%s8445_s9 + $0x278] sm:$0xff]  }
  0x70   :  { %7194 = vmatprep.subr.bf16.mxu1 %v8070_v23  ;;  %v8110_v7 = vld [vmem:[%s8445_s9 + $0x100] sm:$0xff]   ;;  %v8114_v11 = vld [vmem:[%s8445_s9 + $0x238] sm:$0xff]   ;;  %v8117_v14 = vld [vmem:[%s8445_s9 + $0x270] sm:$0xff]  }
  0x71   :  { %v8111_v8 = vld [vmem:[%s8445_s9 + $0x1c0] sm:$0xff]   ;;  %v8115_v12 = vld [vmem:[%s8445_s9 + $0x2f8] sm:$0xff]   ;;  %v8118_v15 = vld [vmem:[%s8445_s9 + $0x230] sm:$0xff]  }
  0x72   :  { %7173 = vmatpush3.bf16.msra.mxu0 %v8071_v24  ;;  %v8112_v9 = vld [vmem:[%s8445_s9 + $0x180] sm:$0xff]   ;;  %v8116_v13 = vld [vmem:[%s8445_s9 + $0x2b8] sm:$0xff]   ;;  %v8119_v16 = vld [vmem:[%s8445_s9 + $0x2f0] sm:$0xff]  }
  0x73   :  { %7195 = vmatpush3.bf16.msra.mxu1 %v8072_v25  ;;  %7174 = vmatprep.subr.bf16.mxu0 %v8073_v26  ;;  %v8120_v17 = vld [vmem:[%s8445_s9 + $0x2b0] sm:$0xff]   ;;  %v8121_v18 = vld [vmem:[%s8445_s9 + $0x268] sm:$0xff]   ;;  %v8125_v22 = vld [vmem:[%s8445_s9 + $0x260] sm:$0xff]  }
  0x74   :  { %7196 = vmatprep.subr.bf16.mxu1 %v8074_v28  ;;  %v8122_v19 = vld [vmem:[%s8445_s9 + $0x228] sm:$0xff]   ;;  %v8126_v23 = vld [vmem:[%s8445_s9 + $0x220] sm:$0xff]   ;;  %v8129_v26 = vld [vmem:[%s8445_s9 + $0x258] sm:$0xff]  }
  0x75   :  { %v8123_v20 = vld [vmem:[%s8445_s9 + $0x2e8] sm:$0xff]   ;;  %v8127_v24 = vld [vmem:[%s8445_s9 + $0x2e0] sm:$0xff]   ;;  %v8130_v27 = vld [vmem:[%s8445_s9 + $0x218] sm:$0xff]  }
  0x76   :  { %7175 = vmatpush3.bf16.msra.mxu0 %v8075_v29  ;;  %v8124_v21 = vld [vmem:[%s8445_s9 + $0x2a8] sm:$0xff]   ;;  %v8128_v25 = vld [vmem:[%s8445_s9 + $0x2a0] sm:$0xff]   ;;  %v8131_v28 = vld [vmem:[%s8445_s9 + $0x2d8] sm:$0xff]  }
  0x77   :  { %7197 = vmatpush3.bf16.msra.mxu1 %v8076_v30  ;;  %7176 = vmatprep.subr.bf16.mxu0 %v8077_v31  ;;  %v8132_v29 = vld [vmem:[%s8445_s9 + $0x298] sm:$0xff]   ;;  %v8133_v30 = vld [vmem:[%s8445_s9 + $0x250] sm:$0xff]   ;;  %v8139_v37 = vld [vmem:[%s8445_s9 + $0x2c8] sm:$0xff]  }
  0x78   :  { %7198 = vmatprep.subr.bf16.mxu1 %v8078_v33  ;;  %v8134_v31 = vld [vmem:[%s8445_s9 + $0x210] sm:$0xff]   ;;  %v8140_v38 = vld [vmem:[%s8445_s9 + $0x288] sm:$0xff]   ;;  %v8141_v39 = vld [vmem:[%s8445_s9 + $0x240] sm:$0xff]  }
  0x79   :  { %v8135_v33 = vld [vmem:[%s8445_s9 + $0x2d0] sm:$0xff]  }
  0x7a   :  { %7177 = vmatpush3.bf16.msra.mxu0 %v8079_v35  ;;  %v8136_v34 = vld [vmem:[%s8445_s9 + $0x290] sm:$0xff]   ;;  %v8137_v35 = vld [vmem:[%s8445_s9 + $0x248] sm:$0xff]  }
  0x7b   :  { %7199 = vmatpush3.bf16.msra.mxu1 %v8080_v36  ;;  %7206 = vmatprep.subr.bf16.mxu0 %v8081_v40  ;;  %v8138_v36 = vld [vmem:[%s8445_s9 + $0x208] sm:$0xff]   ;;  %v8142_v40 = vld [vmem:[%s8445_s9 + $0x200] sm:$0xff]  }
  0x7c   :  { %7228 = vmatprep.subr.bf16.mxu1 %v8083_v44  ;;  %v8144_v44 = vld [vmem:[%s8445_s9 + $0x280] sm:$0xff]  }
  0x7d   :  { %371 = vmatmul.mubr.bf16.vlgmr.msra.gmra.mxu0 %v8717_v43 }
  0x7e   :  { %552 = vmatmul.mubr.bf16.vlgmr.msra.gmra.mxu1 %v8717_v43  ;;  %7207 = vmatpush3.bf16.msra.mxu0 %v8082_v41  ;;  %v8143_v41 = vld [vmem:[%s8445_s9 + $0x2c0] sm:$0xff]  }
  0x7f   :  { %7229 = vmatpush3.bf16.msra.mxu1 %v8084_v45  ;;  %7208 = vmatprep.subr.bf16.mxu0 %v8085_v46  ;;  %v8145_v45 = vld [vmem:[%s8445_s9 + $0x378] sm:$0xff]  }
  0x80   :  { %7230 = vmatprep.subr.bf16.mxu1 %v8087_v48  ;;  %734 = vmatprep.mubr.bf16.mxu0 %v8715_v42  ;;  %v8146_v46 = vld [vmem:[%s8445_s9 + $0x338] sm:$0xff]   ;;  %v378_v48 = vld [vmem:[%s8495_s24] sm:$0xff]  }
  0x81   :  { %917 = vmatprep.mubr.bf16.mxu1 %v8715_v42 }
  0x82   :  { %7209 = vmatpush3.bf16.msra.mxu0 %v8086_v47  ;;  %v8147_v47 = vld [vmem:[%s8445_s9 + $0x370] sm:$0xff]  }
  0x83   :  { %7231 = vmatpush3.bf16.msra.mxu1 %v8088_v49  ;;  %7210 = vmatprep.subr.bf16.mxu0 %v8089_v50  ;;  %v379_v49 = vunpack.c.l.bf16 %v378_v48  ;;  %v561_v50 = vunpack.c.h.bf16 %v378_v48 }
  0x84   :  { %7232 = vmatprep.subr.bf16.mxu1 %v8091_v52  ;;  %v8149_v52 = vld [vmem:[%s8445_s9 + $0x368] sm:$0xff]  }
  0x86   :  { %7211 = vmatpush3.bf16.msra.mxu0 %v8090_v51  ;;  %v8148_v51 = vld [vmem:[%s8445_s9 + $0x330] sm:$0xff]  }
  0x87   :  { %7233 = vmatpush3.bf16.msra.mxu1 %v8092_v53  ;;  %7212 = vmatprep.subr.bf16.mxu0 %v8093_v54  ;;  %v8043_v53 = vpack.i.bf16 %v561_v50, %v379_v49  ;;  %v8150_v54 = vld [vmem:[%s8445_s9 + $0x328] sm:$0xff]  }
  0x88   :  { %7234 = vmatprep.subr.bf16.mxu1 %v8095_v56  ;;  %v8152_v56 = vld [vmem:[%s8445_s9 + $0x320] sm:$0xff]  }
  0x89   :  { %8044 = vperm.xlu0 %8042, %v8043_v53  }
  0x8a   :  { %7213 = vmatpush3.bf16.msra.mxu0 %v8094_v55  ;;  %v8151_v55 = vld [vmem:[%s8445_s9 + $0x360] sm:$0xff]  }
  0x8b   :  { %7235 = vmatpush3.bf16.msra.mxu1 %v8096_v57  ;;  %7214 = vmatprep.subr.bf16.mxu0 %v8097_v58  ;;  %v8153_v57 = vld [vmem:[%s8445_s9 + $0x358] sm:$0xff]   ;;  %v6636_v58 = vld [vmem:[%s8495_s24 + $0x8] sm:$0xff]  }
  0x8c   :  { %7236 = vmatprep.subr.bf16.mxu1 %v8099_v60  ;;  %v744_v60 = vunpack.c.l.bf16 %v6636_v58 }
  0x8e   :  { %7215 = vmatpush3.bf16.msra.mxu0 %v8098_v59  ;;  %v8154_v59 = vld [vmem:[%s8445_s9 + $0x318] sm:$0xff]   ;;  %747 = vperm.xlu0 %8042, %v744_v60  }
  0x8f   :  { %7237 = vmatpush3.bf16.msra.mxu1 %v8100_v61  ;;  %7216 = vmatprep.subr.bf16.mxu0 %v8101_v62  ;;  %v927_v61 = vunpack.c.h.bf16 %v6636_v58  ;;  %v6734_v62 = vld [vmem:[%s8495_s24 + $0x10] sm:$0xff]  }
  0x90   :  { %7238 = vmatprep.subr.bf16.mxu1 %v8103_v0  ;;  %v6832_v0 = vld [vmem:[%s8495_s24 + $0x18] sm:$0xf] }
  0x91   :  { %930 = vperm.xlu1 %8048, %v927_v61  }
  0x92   :  { %7217 = vmatpush3.bf16.msra.mxu0 %v8102_v63  ;;  %v8155_v63 = vld [vmem:[%s8445_s9 + $0x350] sm:$0xff]  }
  0x93   :  { %7239 = vmatpush3.bf16.msra.mxu1 %v8104_v1  ;;  %7218 = vmatprep.subr.bf16.mxu0 %v8105_v2  ;;  %v1110_v1 = vunpack.c.l.bf16 %v6734_v62  ;;  %v8156_v2 = vld [vmem:[%s8445_s9 + $0x310] sm:$0xff]  }
  0x94   :  { %7240 = vmatprep.subr.bf16.mxu1 %v8107_v4  ;;  %v1476_v4 = vunpack.c.l.bf16 %v6832_v0 }
  0x95   :  { %1113 = vperm.xlu1 %8048, %v1110_v1  }
  0x96   :  { %7219 = vmatpush3.bf16.msra.mxu0 %v8106_v3  ;;  %v8157_v3 = vld [vmem:[%s8445_s9 + $0x348] sm:$0xff]  }
  0x97   :  { %7241 = vmatpush3.bf16.msra.mxu1 %v8108_v5  ;;  %7220 = vmatprep.subr.bf16.mxu0 %v8109_v6  ;;  %v8158_v5 = vld [vmem:[%s8445_s9 + $0x308] sm:$0xff]   ;;  %v8159_v6 = vld [vmem:[%s8445_s9 + $0x340] sm:$0xff]  }
  0x98   :  { %7242 = vmatprep.subr.bf16.mxu1 %v8111_v8 }
  0x99   :  { %1479 = vperm.xlu1 %8048, %v1476_v4  }
  0x9a   :  { %7221 = vmatpush3.bf16.msra.mxu0 %v8110_v7  ;;  %v8160_v7 = vld [vmem:[%s8445_s9 + $0x300] sm:$0xff]  }
  0x9b   :  { %7243 = vmatpush3.bf16.msra.mxu1 %v8112_v9  ;;  %7250 = vmatprep.subr.bf16.mxu0 %v8113_v10 }
  0x9c   :  { %7272 = vmatprep.subr.bf16.mxu1 %v8115_v12 }
  0x9d   :  { %735 = vmatmul.mubr.bf16.vlgmr.msra.gmra.mxu0 %v8717_v43 }
  0x9e   :  { %7251 = vmatpush3.bf16.msra.mxu0 %v8114_v11  ;;  %918 = vmatmul.mubr.bf16.vlgmr.msra.gmra.mxu1 %v8717_v43 }
  0x9f   :  { %7273 = vmatpush3.bf16.msra.mxu1 %v8116_v13  ;;  %7252 = vmatprep.subr.bf16.mxu0 %v8117_v14 }
  0xa0   :  { %7274 = vmatprep.subr.bf16.mxu1 %v8119_v16  ;;  %1100 = vmatprep.mubr.bf16.mxu0 %v8715_v42 }
  0xa1   :  { %1283 = vmatprep.mubr.bf16.mxu1 %v8715_v42 }
  0xa2   :  { %7253 = vmatpush3.bf16.msra.mxu0 %v8118_v15 }
  0xa3   :  { %7275 = vmatpush3.bf16.msra.mxu1 %v8120_v17  ;;  %7254 = vmatprep.subr.bf16.mxu0 %v8121_v18 }
  0xa4   :  { %7276 = vmatprep.subr.bf16.mxu1 %v8123_v20 }
  0xa6   :  { %7255 = vmatpush3.bf16.msra.mxu0 %v8122_v19 }
  0xa7   :  { %7277 = vmatpush3.bf16.msra.mxu1 %v8124_v21  ;;  %7256 = vmatprep.subr.bf16.mxu0 %v8125_v22 }
  0xa8   :  { %7278 = vmatprep.subr.bf16.mxu1 %v8127_v24 }
  0xaa   :  { %7257 = vmatpush3.bf16.msra.mxu0 %v8126_v23 }
  0xab   :  { %7279 = vmatpush3.bf16.msra.mxu1 %v8128_v25  ;;  %7258 = vmatprep.subr.bf16.mxu0 %v8129_v26 }
  0xac   :  { %7280 = vmatprep.subr.bf16.mxu1 %v8131_v28 }
  0xae   :  { %7259 = vmatpush3.bf16.msra.mxu0 %v8130_v27 }
  0xaf   :  { %7281 = vmatpush3.bf16.msra.mxu1 %v8132_v29  ;;  %7260 = vmatprep.subr.bf16.mxu0 %v8133_v30 }
  0xb0   :  { %7282 = vmatprep.subr.bf16.mxu1 %v8135_v33 }
  0xb2   :  { %7261 = vmatpush3.bf16.msra.mxu0 %v8134_v31 }
  0xb3   :  { %7283 = vmatpush3.bf16.msra.mxu1 %v8136_v34  ;;  %7262 = vmatprep.subr.bf16.mxu0 %v8137_v35 }
  0xb4   :  { %7284 = vmatprep.subr.bf16.mxu1 %v8139_v37 }
  0xb6   :  { %7263 = vmatpush3.bf16.msra.mxu0 %v8138_v36 }
  0xb7   :  { %7285 = vmatpush3.bf16.msra.mxu1 %v8140_v38  ;;  %7264 = vmatprep.subr.bf16.mxu0 %v8141_v39 }
  0xb8   :  { %7286 = vmatprep.subr.bf16.mxu1 %v8143_v41 }
  0xba   :  { %7265 = vmatpush3.bf16.msra.mxu0 %v8142_v40 }
  0xbb   :  { %7287 = vmatpush3.bf16.msra.mxu1 %v8144_v44  ;;  %7294 = vmatprep.subr.bf16.mxu0 %v8145_v45 }
  0xbd   :  { %1101 = vmatmul.mubr.bf16.vlgmr.msra.gmra.mxu0 %v8717_v43 }
  0xbe   :  { %7295 = vmatpush3.bf16.msra.mxu0 %v8146_v46  ;;  %1284 = vmatmul.mubr.bf16.vlgmr.msra.gmra.mxu1 %v8717_v43 }
  0xbf   :  { %7296 = vmatprep.subr.bf16.mxu0 %v8147_v47  ;;  %1466 = vmatprep.mubr.bf16.mxu0 %v8715_v42  ;;  %v1293_v42 = vunpack.c.h.bf16 %v6734_v62 }
  0xc1   :  { %1296 = vperm.xlu0 %8042, %v1293_v42  }
  0xc2   :  { %7297 = vmatpush3.bf16.msra.mxu0 %v8148_v51 }
  0xc3   :  { %7298 = vmatprep.subr.bf16.mxu0 %v8149_v52 }
  0xc6   :  { %7299 = vmatpush3.bf16.msra.mxu0 %v8150_v54 }
  0xc7   :  { %7300 = vmatprep.subr.bf16.mxu0 %v8151_v55 }
  0xca   :  { %7301 = vmatpush3.bf16.msra.mxu0 %v8152_v56 }
  0xcb   :  { %7302 = vmatprep.subr.bf16.mxu0 %v8153_v57 }
  0xce   :  { %7303 = vmatpush3.bf16.msra.mxu0 %v8154_v59 }
  0xcf   :  { %7304 = vmatprep.subr.bf16.mxu0 %v8155_v63 }
  0xd2   :  { %7305 = vmatpush3.bf16.msra.mxu0 %v8156_v2 }
  0xd3   :  { %7306 = vmatprep.subr.bf16.mxu0 %v8157_v3 }
  0xd6   :  { %7307 = vmatpush3.bf16.msra.mxu0 %v8158_v5 }
  0xd7   :  { %7308 = vmatprep.subr.bf16.mxu0 %v8159_v6 }
  0xda   :  { %7309 = vmatpush3.bf16.msra.mxu0 %v8160_v7 }
  0xdd   :  { %1467 = vmatmul.mubr.bf16.vlgmr.msra.gmra.mxu0 %v8717_v43 }
  0xde   :  { %100 = vsyncpa [#allocation3], 0  ;;  %vm8430_vm0 = vmmov 0   ;;  %vm1868_vm1 = vcmask 523264   ;;  %vm1920_vm2 = vcmask 1043456   ;;  %vm1916_vm3 = vcmask 64512  }
  0xdf   :  { %s9945_s0 = sld [smem:[#allocation11_spill]]  ;;  %vm2817_vm4 = vcmask 261120   ;;  %vm2954_vm5 = vcmask 130048   ;;  %vm6460_vm6 = vcmask 517120  }
  0xe0   :  { %s9946_s5 = sld [smem:[#allocation12_spill]] }
  0xe1   :  { %s9947_s9 = sld [smem:[#allocation13_spill]] }
  0xe2   :  { %s9953_s24 = sld [smem:[#allocation16_spill]] }
  0xe3   :  { %s9960_s22 = sld [smem:[#allocation23_spill]] }
  0xe4   :  { %s9961_s23 = sld [smem:[#allocation26_spill]] }
  0xe5   :  { %s9962_s26 = sld [smem:[#allocation27_spill]] }
  0xe6   :  { %s9963_s28 = sld [smem:[#allocation28_spill]] }
  0xe7   :  { %s9964_s1 = sld [smem:[#allocation24_spill]] }
  0xe8   :  { %s9965_s2 = sld [smem:[#allocation25_spill]] }
  0xe9   :  { %s9966_s7 = sld [smem:[#allocation8_spill]] }
  0xea   :  { %s9967_s10 = sld [smem:[#allocation29_spill]] }
  0xeb   :  { %s9968_s11 = sld [smem:[#allocation30_spill]] }
  0xec   :  { %s9969_s15 = sld [smem:[#allocation31_spill]] }
  0xed   :  { %s9970_s16 = sld [smem:[#allocation9_spill]] }
  0xee   :  { %s9971_s18 = sld [smem:[#allocation32_spill]] }
 0x104   :  { %v8045_v8 = vpop.permute.xlu0 %8044 }
 0x105   :  { %v8047_v15 = vunpack.i.h.bf16 %v8045_v8  ;;  %v8046_v16 = vunpack.i.l.bf16 %v8045_v8 }
 0x109   :  { %v748_v47 = vpop.permute.xlu0 %747 }
 0x10c   :  { %v931_v49 = vpop.permute.xlu1 %930 }
 0x110   :  { %v1114_v54 = vpop.permute.xlu1 %1113 }
 0x114   :  { %v1480_v3 = vpop.permute.xlu1 %1479 }
 0x13c   :  { %v1297_v59 = vpop.permute.xlu0 %1296 }
 0x13d   :  { %v7178_v9 = vpop.f32.mrf.mxu0 }
 0x13e   :  { %v7200_v10 = vpop.f32.mrf.mxu1 }
 0x13f   :  { %v7179_v11 = vpop.f32.mrf.mxu0 }
 0x140   :  { %v7201_v12 = vpop.f32.mrf.mxu1  ;;  %v7180_v13 = vadd.f32 %v7179_v11, %v7178_v9  ;;  %v8161_v9 = vld [vmem:[%s8450_s13 + $0x38] sm:$0xff]   ;;  %v8429_v11 = vmov 0.0  }
 0x141   :  { %v7202_v14 = vadd.f32 %v7201_v12, %v7200_v10  ;;  %v7181_v17 = vpop.f32.mrf.mxu0  ;;  %v8162_v10 = vld [vmem:[%s8450_s13 + $0x78] sm:$0xff]   ;;  %7521 = vmatprep.subr.bf16.mxu1 %v8429_v11  ;;  %7541 = vmatprep.subr.bf16.mxu0 %v8429_v11  ;;  %v8164_v12 = vld [vmem:[%s8450_s13 + $0x70] sm:$0xff]  }
 0x142   :  { %v7203_v18 = vpop.f32.mrf.mxu1  ;;  %v388_v19 = vrot.slane %v7180_v13, %v8706_v32  ;;  %7522 = vmatpush3.bf16.msra.mxu1 %v8161_v9  ;;  %7542 = vmatpush3.bf16.msra.mxu0 %v8162_v10  ;;  %v8165_v13 = vld [vmem:[%s8450_s13 + $0x28] sm:$0xff]   ;;  %v8169_v17 = vld [vmem:[%s8450_s13 + $0x18] sm:$0xff]  }
 0x143   :  { %v570_v20 = vrot.slane %v7202_v14, %v8706_v32  ;;  %v7182_v21 = vpop.f32.mrf.mxu0  ;;  %7523 = vmatprep.subr.bf16.mxu1 %v8429_v11  ;;  %7543 = vmatprep.subr.bf16.mxu0 %v8429_v11  ;;  %v8166_v14 = vld [vmem:[%s8450_s13 + $0x68] sm:$0xff]   ;;  %v8170_v18 = vld [vmem:[%s8450_s13 + $0x58] sm:$0xff]  }
 0x144   :  { %v7204_v22 = vpop.f32.mrf.mxu1  ;;  %v389_v23 = vmul.f32 %v8046_v16, %v388_v19  ;;  %v8168_v16 = vld [vmem:[%s8450_s13 + $0x60] sm:$0xff]   ;;  %v8171_v19 = vld [vmem:[%s8450_s13 + $0x10] sm:$0xff]   ;;  %7537 = vmatprep.mubr.msk.bf16.mxu1 %vm8430_vm0, %v8429_v11  ;;  %7557 = vmatprep.mubr.msk.bf16.mxu0 %vm8430_vm0, %v8429_v11 }
 0x145   :  { %v571_v43 = vmul.f32 %v8047_v15, %v570_v20  ;;  %v8167_v15 = vld [vmem:[%s8450_s13 + $0x20] sm:$0xff]   ;;  %v8172_v20 = vld [vmem:[%s8450_s13 + $0x50] sm:$0xff]  }
 0x146   :  { %7544 = vmatpush3.bf16.msra.mxu0 %v8164_v12  ;;  %v6894_v12 = vld [vmem:[%s8510_s12 + $0x4] sm:$0xf] }
 0x147   :  { %v572_v24 = vadd.f32 %v571_v43, %v389_v23  ;;  %7545 = vmatprep.subr.bf16.mxu0 %v8429_v11 }
 0x14a   :  { %7546 = vmatpush3.bf16.msra.mxu0 %v8166_v14  ;;  %v8938_v14 = vld [vmem:[%s8455_s17 + $0x20] sm:$0xff]  }
 0x14b   :  { %7547 = vmatprep.subr.bf16.mxu0 %v8429_v11 }
 0x14e   :  { %7548 = vmatpush3.bf16.msra.mxu0 %v8168_v16 }
 0x14f   :  { %7549 = vmatprep.subr.bf16.mxu0 %v8429_v11 }
 0x152   :  { %7550 = vmatpush3.bf16.msra.mxu0 %v8170_v18 }
 0x153   :  { %7551 = vmatprep.subr.bf16.mxu0 %v8429_v11 }
 0x156   :  { %7552 = vmatpush3.bf16.msra.mxu0 %v8172_v20  ;;  %v1912_v20 = vld [vmem:[%s8510_s12] sm:$0xf] }
 0x157   :  { %7553 = vmatprep.subr.bf16.mxu0 %v8429_v11 }
 0x15d   :  { %v7222_v25 = vpop.f32.mrf.mxu0 }
 0x15e   :  { %v7244_v26 = vpop.f32.mrf.mxu1 }
 0x15f   :  { %v7223_v27 = vpop.f32.mrf.mxu0 }
 0x160   :  { %v7245_v28 = vpop.f32.mrf.mxu1  ;;  %v7224_v44 = vadd.f32 %v7223_v27, %v7222_v25 }
 0x161   :  { %v7225_v29 = vpop.f32.mrf.mxu0  ;;  %v7246_v46 = vadd.f32 %v7245_v28, %v7244_v26  ;;  %v1498_v28 = vld [vmem:[%s8500_s30] sm:$0xff]  ;;  %s9954_s30 = sld [smem:[#allocation19_spill]] }
 0x162   :  { %v7247_v30 = vpop.f32.mrf.mxu1  ;;  %v753_v45 = vrot.slane %v7224_v44, %v8706_v32  ;;  %v8173_v29 = vld [vmem:[%s8450_s13 + $0x8] sm:$0xff]  }
 0x163   :  { %v7226_v31 = vpop.f32.mrf.mxu0  ;;  %v936_v50 = vrot.slane %v7246_v46, %v8706_v32  ;;  %v8174_v30 = vld [vmem:[%s8450_s13 + $0x48] sm:$0xff]   ;;  %v8177_v46 = vld [vmem:[%s8450_s13 + $0xb8] sm:$0xff]  }
 0x164   :  { %v7248_v33 = vpop.f32.mrf.mxu1  ;;  %v754_v51 = vmul.f32 %v753_v45, %v748_v47  ;;  %7554 = vmatpush3.bf16.msra.mxu0 %v8174_v30  ;;  %v6910_v30 = vld [vmem:[%s8510_s12 + $0x8] sm:$0xf]  ;;  %s9956_s12 = sld [smem:[#allocation20_spill]] }
 0x165   :  { %v937_v56 = vmul.f32 %v936_v50, %v931_v49  ;;  %7555 = vmatprep.subr.bf16.mxu0 %v8429_v11  ;;  %v8179_v49 = vld [vmem:[%s8450_s13 + $0xa8] sm:$0xff]   ;;  %v8180_v50 = vld [vmem:[%s8450_s13 + $0xa0] sm:$0xff]  }
 0x166   :  { %v755_v55 = vadd.f32 %v754_v51, %v572_v24  ;;  %v8181_v51 = vld [vmem:[%s8450_s13 + $0x98] sm:$0xff]  }
 0x168   :  { %v938_v61 = vadd.f32 %v937_v56, %v755_v55  ;;  %v8891_v55 = vld [vmem:[%s8455_s17 + $0x18] sm:$0xff]   ;;  %v8895_v56 = vld [vmem:[%s8455_s17 + $0x10] sm:$0xff]  }
 0x17d   :  { %v7266_v34 = vpop.f32.mrf.mxu0 }
 0x17e   :  { %v7288_v35 = vpop.f32.mrf.mxu1 }
 0x17f   :  { %v7267_v36 = vpop.f32.mrf.mxu0 }
 0x180   :  { %v7289_v37 = vpop.f32.mrf.mxu1  ;;  %v7268_v48 = vadd.f32 %v7267_v36, %v7266_v34  ;;  %v1502_v34 = vld [vmem:[%s8505_s6] sm:$0xff]  ;;  %s9955_s6 = sld [smem:[#allocation6_spill]] }
 0x181   :  { %v7269_v38 = vpop.f32.mrf.mxu0  ;;  %v7290_v53 = vadd.f32 %v7289_v37, %v7288_v35  ;;  %v8175_v36 = vld [vmem:[%s8450_s13] sm:$0xff]  }
 0x182   :  { %v7291_v39 = vpop.f32.mrf.mxu1  ;;  %v1119_v52 = vrot.slane %v7268_v48, %v8706_v32  ;;  %v8176_v37 = vld [vmem:[%s8450_s13 + $0x40] sm:$0xff]   ;;  %v8178_v48 = vld [vmem:[%s8450_s13 + $0xb0] sm:$0xff]  }
 0x183   :  { %v7270_v40 = vpop.f32.mrf.mxu0  ;;  %v1302_v57 = vrot.slane %v7290_v53, %v8706_v32  ;;  %7556 = vmatpush3.bf16.msra.mxu0 %v8176_v37  ;;  %v8183_v53 = vld [vmem:[%s8450_s13 + $0x88] sm:$0xff]  }
 0x184   :  { %v7292_v41 = vpop.f32.mrf.mxu1  ;;  %v1120_v58 = vmul.f32 %v1119_v52, %v1114_v54  ;;  %7581 = vmatprep.subr.bf16.mxu0 %v8429_v11  ;;  %v8182_v52 = vld [vmem:[%s8450_s13 + $0x90] sm:$0xff]   ;;  %v8184_v54 = vld [vmem:[%s8450_s13 + $0x80] sm:$0xff]  }
 0x185   :  { %v1303_v42 = vmul.f32 %v1302_v57, %v1297_v59  ;;  %v8900_v57 = vld [vmem:[%s8455_s17 + $0x8] sm:$0xff]  }
 0x186   :  { %v1121_v63 = vadd.f32 %v1120_v58, %v938_v61  ;;  %v8906_v58 = vld [vmem:[%s8455_s17] sm:$0xff]  }
 0x188   :  { %v1304_v5 = vadd.f32 %v1303_v42, %v1121_v63 }
 0x19d   :  { %v7310_v60 = vpop.f32.mrf.mxu0 }
 0x19f   :  { %v7311_v62 = vpop.f32.mrf.mxu0 }
 0x1a0   :  { %v7312_v0 = vadd.f32 %v7311_v62, %v7310_v60 }
 0x1a1   :  { %v7313_v1 = vpop.f32.mrf.mxu0 }
 0x1a2   :  { %v1485_v2 = vrot.slane %v7312_v0, %v8706_v32  ;;  %v8163_v32 = vld [vmem:[%s8450_s13 + $0x30] sm:$0xff]   ;;  %s9948_s13 = sld [smem:[#allocation5_spill]] }
 0x1a3   :  { %v7314_v4 = vpop.f32.mrf.mxu0  ;;  %7524 = vmatpush3.bf16.msra.mxu1 %v8163_v32  ;;  %v8921_v32 = vld [vmem:[%s8455_s17 + $0x30] sm:$0xff]  }
 0x1a4   :  { %v1486_v6 = vmul.f32 %v1485_v2, %v1480_v3  ;;  %7525 = vmatprep.subr.bf16.mxu1 %v8429_v11 }
 0x1a6   :  { %v8822_v7 = vadd.f32 %v1486_v6, %v1304_v5  ;;  %v8913_v6 = vld [vmem:[%s8455_s17 + $0x38] sm:$0xff]  }
 0x1a7   :  { %7526 = vmatpush3.bf16.msra.mxu1 %v8165_v13  ;;  %v8931_v13 = vld [vmem:[%s8455_s17 + $0x28] sm:$0xff]   ;;  %s9949_s17 = sld [smem:[#allocation14_spill]] }
 0x1a8   :  { %1488 = vadd.xlane.f32.xlu0 %v8822_v7  ;;  %v1490_v8 = vmul.f32 %v8822_v7, %v8822_v7  ;;  %7527 = vmatprep.subr.bf16.mxu1 %v8429_v11 }
 0x1aa   :  { %1491 = vadd.xlane.f32.xlu1 %v1490_v8 }
 0x1ab   :  { %7528 = vmatpush3.bf16.msra.mxu1 %v8167_v15 }
 0x1ac   :  { %7529 = vmatprep.subr.bf16.mxu1 %v8429_v11 }
 0x1af   :  { %7530 = vmatpush3.bf16.msra.mxu1 %v8169_v17 }
 0x1b0   :  { %7531 = vmatprep.subr.bf16.mxu1 %v8429_v11 }
 0x1b3   :  { %7532 = vmatpush3.bf16.msra.mxu1 %v8171_v19 }
 0x1b4   :  { %7533 = vmatprep.subr.bf16.mxu1 %v8429_v11 }
 0x1b7   :  { %7534 = vmatpush3.bf16.msra.mxu1 %v8173_v29 }
 0x1b8   :  { %7535 = vmatprep.subr.bf16.mxu1 %v8429_v11 }
 0x1bb   :  { %7536 = vmatpush3.bf16.msra.mxu1 %v8175_v36 }
 0x1bc   :  { %7561 = vmatprep.subr.bf16.mxu1 %v8429_v11 }
 0x231   :  { %v1489_v21 = vpop.xlane.xlu0 %1488 }
 0x232   :  { %v1493_v22 = vmul.f32 0.0078125, %v1489_v21 }
 0x233   :  { %v1492_v23 = vpop.xlane.xlu1 %1491 }
 0x234   :  { %v1495_v43 = vmul.f32 %v1493_v22, %v1493_v22  ;;  %v1494_v24 = vmul.f32 0.0078125, %v1492_v23 }
 0x236   :  { %v1496_v25 = vsub.f32 %v1494_v24, %v1495_v43 }
 0x238   :  { %v1497_v26 = vmax.f32 %v1496_v25, 0.0 }
 0x23a   :  { %v1499_v27 = vadd.f32 1e-05, %v1497_v26 }
 0x23c   :  { %8269 = vrsqrt.f32 %v1499_v27 }
 0x249   :  { %v8270_v31 = vpop.eup %8269 }
 0x24a   :  { %v1501_v33 = vmul.f32 %v8270_v31, %v1498_v28 }
 0x24c   :  { %1507 = vperm.xlu0 %8042, %v1501_v33   ;;  %v1503_v35 = vmul.f32 %v1501_v33, %v1493_v22 }
 0x24e   :  { %v1504_v38 = vsub.f32 %v1502_v34, %v1503_v35 }
 0x250   :  { %1513 = vperm.xlu1 %8048, %v1504_v38  }
 0x2c7   :  { %v1508_v39 = vpop.permute.xlu0 %1507 }
 0x2c8   :  { %v1510_v40 = vmul.f32 %v1508_v39, %v8822_v7 }
 0x2cb   :  { %v1514_v41 = vpop.permute.xlu1 %1513 }
 0x2cc   :  { %v1516_v44 = vadd.f32 %v1514_v41, %v1510_v40 }
 0x2ce   :  { %v1517_v45 = vmax.f32 %v1516_v44, 0.0 }
 0x2d0   :  { %v1518_v47 = vpack.c.bf16 %v1517_v45, %v1517_v45 }
 0x2d2   :  { %7538 = vmatmul.mubr.bf16.vlgmr.msra.gmra.mxu1 %v1518_v47  ;;  %7558 = vmatmul.mubr.bf16.vlgmr.msra.gmra.mxu0 %v1518_v47 }
 0x2d3   :  { %7562 = vmatpush3.bf16.msra.mxu1 %v8177_v46  ;;  %7577 = vmatprep.mubr.msk.bf16.mxu1 %vm8430_vm0, %v8429_v11 }
 0x2d4   :  { %7563 = vmatprep.subr.bf16.mxu1 %v8429_v11  ;;  %7589 = vmatprep.mubr.msk.bf16.mxu0 %vm8430_vm0, %v8429_v11 }
 0x2d5   :  { %7582 = vmatpush3.bf16.msra.mxu0 %v8891_v55 }
 0x2d6   :  { %7583 = vmatprep.subr.bf16.mxu0 %v8429_v11 }
 0x2d7   :  { %7564 = vmatpush3.bf16.msra.mxu1 %v8178_v48 }
 0x2d8   :  { %7565 = vmatprep.subr.bf16.mxu1 %v8429_v11 }
 0x2d9   :  { %7584 = vmatpush3.bf16.msra.mxu0 %v8895_v56 }
 0x2da   :  { %7585 = vmatprep.subr.bf16.mxu0 %v8429_v11 }
 0x2db   :  { %7566 = vmatpush3.bf16.msra.mxu1 %v8179_v49 }
 0x2dc   :  { %7567 = vmatprep.subr.bf16.mxu1 %v8429_v11 }
 0x2dd   :  { %7586 = vmatpush3.bf16.msra.mxu0 %v8900_v57 }
 0x2de   :  { %7587 = vmatprep.subr.bf16.mxu0 %v8429_v11 }
 0x2df   :  { %7568 = vmatpush3.bf16.msra.mxu1 %v8180_v50 }
 0x2e0   :  { %7569 = vmatprep.subr.bf16.mxu1 %v8429_v11 }
 0x2e1   :  { %7588 = vmatpush3.bf16.msra.mxu0 %v8906_v58 }
 0x2e2   :  { %7605 = vmatprep.subr.bf16.mxu0 %v8429_v11 }
 0x2e3   :  { %7570 = vmatpush3.bf16.msra.mxu1 %v8181_v51 }
 0x2e4   :  { %7571 = vmatprep.subr.bf16.mxu1 %v8429_v11 }
 0x2e7   :  { %7572 = vmatpush3.bf16.msra.mxu1 %v8182_v52 }
 0x2e8   :  { %7573 = vmatprep.subr.bf16.mxu1 %v8429_v11 }
 0x2eb   :  { %7574 = vmatpush3.bf16.msra.mxu1 %v8183_v53 }
 0x2ec   :  { %7575 = vmatprep.subr.bf16.mxu1 %v8429_v11 }
 0x2ef   :  { %7576 = vmatpush3.bf16.msra.mxu1 %v8184_v54 }
 0x2f0   :  { %7593 = vmatprep.subr.bf16.mxu1 %v8429_v11 }
 0x2f2   :  { %7578 = vmatmul.mubr.bf16.vlgmr.msra.gmra.mxu1 %v1518_v47 }
 0x2f3   :  { %7595 = vmatprep.mubr.msk.bf16.mxu1 %vm8430_vm0, %v8429_v11 }
 0x392   :  { %v1617_v59 = vpop.f32.mrf.mxu1  ;;  %v1722_v60 = vpop.f32.mrf.mxu0 }
 0x393   :  { %v1728_v2 = vmax.f32 %v1617_v59, %v1722_v60  ;;  %v2148_v59 = vld [vmem:[%s8520_s27] sm:$0xff]  ;;  %s9958_s27 = sld [smem:[#allocation22_spill]] }
 0x394   :  { %v7539_v61 = vpop.f32.mrf.mxu1  ;;  %v7559_v62 = vpop.f32.mrf.mxu0 }
 0x396   :  { %v1620_v63 = vpop.f32.mrf.mxu1  ;;  %v1725_v42 = vpop.f32.mrf.mxu0 }
 0x398   :  { %v7540_v0 = vpop.f32.mrf.mxu1  ;;  %v7560_v1 = vpop.f32.mrf.mxu0 }
 0x3b2   :  { %v1828_v3 = vpop.f32.mrf.mxu1 }
 0x3b3   :  { %v8910_v4 = vmax.f32 %v1728_v2, %v1828_v3 }
 0x3b4   :  { %v7579_v5 = vpop.f32.mrf.mxu1 }
 0x3b5   :  { %v1835_v7 = vpack.c.bf16 %v8910_v4, %v8910_v4  ;;  %v6913_v5 = vld [vmem:[%s8525_s4 + $0x4] sm:$0xf] }
 0x3b6   :  { %v1831_v8 = vpop.f32.mrf.mxu1 }
 0x3b7   :  { %7590 = vmatmul.mubr.msk.bf16.vlgmr.msra.gmra.mxu0 %vm1868_vm1, %v1835_v7  ;;  %v1921_v9 = vsel %vm1920_vm2, %v1835_v7, 0 }
 0x3b8   :  { %7606 = vmatpush3.bf16.msra.mxu0 %v8913_v6  ;;  %v7580_v10 = vpop.f32.mrf.mxu1  ;;  %7594 = vmatpush3.bf16.msra.mxu1 %v1921_v9 }
 0x3b9   :  { %7607 = vmatprep.subr.bf16.mxu0 %v8429_v11  ;;  %7613 = vmatprep.mubr.msk.bf16.mxu0 %vm8430_vm0, %v8429_v11 }
 0x3ba   :  { %7599 = vmatprep.subr.bf16.mxu1 %v8429_v11 }
 0x3bb   :  { %7596 = vmatmul.mubr.msk.bf16.vlgmr.msra.gmra.mxu1 %vm1916_vm3, %v6894_v12 }
 0x3bc   :  { %7608 = vmatpush3.bf16.msra.mxu0 %v8921_v32  ;;  %7601 = vmatprep.mubr.msk.bf16.mxu1 %vm8430_vm0, %v8429_v11 }
 0x3bd   :  { %7609 = vmatprep.subr.bf16.mxu0 %v8429_v11 }
 0x3c0   :  { %7610 = vmatpush3.bf16.msra.mxu0 %v8931_v13 }
 0x3c1   :  { %7611 = vmatprep.subr.bf16.mxu0 %v8429_v11 }
 0x3c4   :  { %7612 = vmatpush3.bf16.msra.mxu0 %v8938_v14 }
 0x3c5   :  { %7635 = vmatprep.subr.bf16.mxu0 %v8429_v11 }
 0x3c7   :  { %7614 = vmatmul.mubr.msk.bf16.vlgmr.msra.gmra.mxu0 %vm1868_vm1, %v1835_v7 }
 0x3c8   :  { %7637 = vmatprep.mubr.msk.bf16.mxu0 %vm8430_vm0, %v8429_v11 }
 0x477   :  { %v1906_v15 = vpop.f32.mrf.mxu0 }
 0x478   :  { %v1913_v16 = vpack.c.bf16 %v1906_v15, %v1906_v15 }
 0x479   :  { %v7591_v17 = vpop.f32.mrf.mxu0 }
 0x47a   :  { %v1967_v18 = vsel %vm1920_vm2, %v1913_v16, 0 }
 0x47b   :  { %v1909_v19 = vpop.f32.mrf.mxu0  ;;  %7600 = vmatpush3.bf16.msra.mxu1 %v1967_v18  ;;  %v1957_v21 = vpop.f32.mrf.mxu1 }
 0x47c   :  { %7617 = vmatprep.subr.bf16.mxu1 %v8429_v11 }
 0x47d   :  { %v7592_v22 = vpop.f32.mrf.mxu0  ;;  %v7597_v23 = vpop.f32.mrf.mxu1 }
 0x47e   :  { %7602 = vmatmul.mubr.msk.bf16.vlgmr.msra.gmra.mxu1 %vm1916_vm3, %v1912_v20  ;;  %v6917_v22 = vld [vmem:[%s8525_s4 + $0x8] sm:$0xf] }
 0x47f   :  { %7619 = vmatprep.mubr.msk.bf16.mxu1 %vm8430_vm0, %v8429_v11  ;;  %v1960_v43 = vpop.f32.mrf.mxu1 }
 0x481   :  { %v7598_v24 = vpop.f32.mrf.mxu1 }
 0x487   :  { %v2076_v25 = vpop.f32.mrf.mxu0 }
 0x488   :  { %v2084_v26 = vpack.c.bf16 %v2076_v25, %v2076_v25 }
 0x489   :  { %v7615_v27 = vpop.f32.mrf.mxu0 }
 0x48a   :  { %v2089_v28 = vsel %vm1920_vm2, %v2084_v26, 0 }
 0x48b   :  { %v2079_v29 = vpop.f32.mrf.mxu0  ;;  %7618 = vmatpush3.bf16.msra.mxu1 %v2089_v28 }
 0x48c   :  { %7623 = vmatprep.subr.bf16.mxu1 %v8429_v11 }
 0x48d   :  { %v7616_v31 = vpop.f32.mrf.mxu0 }
 0x48e   :  { %7620 = vmatmul.mubr.msk.bf16.vlgmr.msra.gmra.mxu1 %vm1916_vm3, %v6910_v30 }
 0x48f   :  { %7624 = vmatpush3.bf16.msra.mxu1 %v8891_v55  ;;  %7631 = vmatprep.mubr.msk.bf16.mxu1 %vm8430_vm0, %v8429_v11 }
 0x490   :  { %7625 = vmatprep.subr.bf16.mxu1 %v8429_v11 }
 0x493   :  { %7626 = vmatpush3.bf16.msra.mxu1 %v8895_v56  ;;  %v2144_v56 = vld [vmem:[%s8515_s20] sm:$0xff]  ;;  %s9957_s20 = sld [smem:[#allocation21_spill]] }
 0x494   :  { %7627 = vmatprep.subr.bf16.mxu1 %v8429_v11 }
 0x497   :  { %7628 = vmatpush3.bf16.msra.mxu1 %v8900_v57 }
 0x498   :  { %7629 = vmatprep.subr.bf16.mxu1 %v8429_v11 }
 0x49b   :  { %7630 = vmatpush3.bf16.msra.mxu1 %v8906_v58 }
 0x49c   :  { %7647 = vmatprep.subr.bf16.mxu1 %v8429_v11 }
 0x53e   :  { %v2003_v33 = vpop.f32.mrf.mxu1 }
 0x53f   :  { %v2004_v37 = vadd.f32 %v2003_v33, %v1957_v21 }
 0x540   :  { %v7603_v34 = vpop.f32.mrf.mxu1 }
 0x542   :  { %v2006_v35 = vpop.f32.mrf.mxu1 }
 0x544   :  { %v7604_v36 = vpop.f32.mrf.mxu1 }
 0x54e   :  { %v2125_v38 = vpop.f32.mrf.mxu1 }
 0x54f   :  { %v2131_v39 = vadd.f32 %v2125_v38, %v2004_v37  ;;  %v8193_v37 = vld [vmem:[%s8460_s21 + $0x18] sm:$0xff]  }
 0x550   :  { %v7621_v40 = vpop.f32.mrf.mxu1  ;;  %v8194_v38 = vld [vmem:[%s8460_s21 + $0x38] sm:$0xff]  }
 0x551   :  { %v2132_v41 = vsel %vm1868_vm1, %v2131_v39, 0.0  ;;  %v2135_v44 = vmul.f32 %v2131_v39, %v2131_v39 }
 0x552   :  { %2133 = vadd.xlane.f32.xlu0 %v2132_v41  ;;  %v2128_v45 = vpop.f32.mrf.mxu1 }
 0x553   :  { %v2136_v46 = vsel %vm1868_vm1, %v2135_v44, 0.0 }
 0x554   :  { %2137 = vadd.xlane.f32.xlu1 %v2136_v46  ;;  %v7622_v47 = vpop.f32.mrf.mxu1 }
 0x5db   :  { %v2134_v48 = vpop.xlane.xlu0 %2133 }
 0x5dc   :  { %v2139_v49 = vmul.f32 0.015625, %v2134_v48 }
 0x5dd   :  { %v2138_v50 = vpop.xlane.xlu1 %2137 }
 0x5de   :  { %v2141_v51 = vmul.f32 %v2139_v49, %v2139_v49  ;;  %v2140_v52 = vmul.f32 0.015625, %v2138_v50  ;;  %v8195_v50 = vld [vmem:[%s8460_s21 + $0x10] sm:$0xff]  }
 0x5e0   :  { %v2142_v53 = vsub.f32 %v2140_v52, %v2141_v51  ;;  %v8196_v51 = vld [vmem:[%s8460_s21 + $0x30] sm:$0xff]  }
 0x5e2   :  { %v2143_v54 = vmax.f32 %v2142_v53, 0.0 }
 0x5e4   :  { %v2145_v55 = vadd.f32 1e-05, %v2143_v54  ;;  %v2409_v54 = vld [vmem:[%s8535_s14] sm:$0xff]  ;;  %s9951_s14 = sld [smem:[#allocation15_spill]] }
 0x5e6   :  { %8271 = vrsqrt.f32 %v2145_v55  ;;  %v8197_v55 = vld [vmem:[%s8460_s21 + $0x8] sm:$0xff]  }
 0x5f3   :  { %v8272_v57 = vpop.eup %8271 }
 0x5f4   :  { %v2147_v58 = vmul.f32 %v8272_v57, %v2144_v56  ;;  %v8198_v56 = vld [vmem:[%s8460_s21 + $0x28] sm:$0xff]  }
 0x5f6   :  { %2153 = vperm.xlu0 %8042, %v2147_v58   ;;  %v2149_v60 = vmul.f32 %v2147_v58, %v2139_v49  ;;  %v2405_v49 = vld [vmem:[%s8530_s19] sm:$0xff]  ;;  %s9952_s19 = sld [smem:[#allocation18_spill]] }
 0x5f8   :  { %v2150_v61 = vsub.f32 %v2148_v59, %v2149_v60  ;;  %v8199_v59 = vld [vmem:[%s8460_s21] sm:$0xff]  }
 0x5f9   :  { %v8200_v60 = vld [vmem:[%s8460_s21 + $0x20] sm:$0xff]  }
 0x5fa   :  { %2159 = vperm.xlu1 %8048, %v2150_v61  }
 0x671   :  { %v2154_v62 = vpop.permute.xlu0 %2153 }
 0x672   :  { %v2156_v63 = vmul.f32 %v2154_v62, %v2131_v39 }
 0x675   :  { %v2160_v42 = vpop.permute.xlu1 %2159 }
 0x676   :  { %v2162_v0 = vadd.f32 %v2160_v42, %v2156_v63 }
 0x678   :  { %v2163_v1 = vmax.f32 %v2162_v0, 0.0 }
 0x67a   :  { %v2164_v2 = vpack.c.bf16 %v2163_v1, %v2163_v1 }
 0x67c   :  { %7632 = vmatmul.mubr.msk.bf16.vlgmr.msra.gmra.mxu1 %vm1868_vm1, %v2164_v2  ;;  %v2215_v3 = vsel %vm1920_vm2, %v2164_v2, 0 }
 0x67d   :  { %7648 = vmatpush3.bf16.msra.mxu1 %v8913_v6  ;;  %7636 = vmatpush3.bf16.msra.mxu0 %v2215_v3 }
 0x67e   :  { %7649 = vmatprep.subr.bf16.mxu1 %v8429_v11  ;;  %7655 = vmatprep.mubr.msk.bf16.mxu1 %vm8430_vm0, %v8429_v11 }
 0x67f   :  { %7641 = vmatprep.subr.bf16.mxu0 %v8429_v11 }
 0x680   :  { %7638 = vmatmul.mubr.msk.bf16.vlgmr.msra.gmra.mxu0 %vm1916_vm3, %v6913_v5 }
 0x681   :  { %7650 = vmatpush3.bf16.msra.mxu1 %v8921_v32  ;;  %7643 = vmatprep.mubr.msk.bf16.mxu0 %vm8430_vm0, %v8429_v11  ;;  %v2208_v32 = vld [vmem:[%s8525_s4] sm:$0xf]  ;;  %s9959_s4 = sld [smem:[#allocation7_spill]] }
 0x682   :  { %7651 = vmatprep.subr.bf16.mxu1 %v8429_v11 }
 0x685   :  { %7652 = vmatpush3.bf16.msra.mxu1 %v8931_v13 }
 0x686   :  { %7653 = vmatprep.subr.bf16.mxu1 %v8429_v11 }
 0x689   :  { %7654 = vmatpush3.bf16.msra.mxu1 %v8938_v14 }
 0x68a   :  { %7677 = vmatprep.subr.bf16.mxu1 %v8429_v11 }
 0x68c   :  { %7656 = vmatmul.mubr.msk.bf16.vlgmr.msra.gmra.mxu1 %vm1868_vm1, %v2164_v2 }
 0x68d   :  { %7685 = vmatprep.mubr.msk.bf16.mxu1 %vm8430_vm0, %v8429_v11  ;;  %7678 = vmatpush3.bf16.msra.mxu1 %v8194_v38 }
 0x68e   :  { %7679 = vmatprep.subr.bf16.mxu1 %v8429_v11 }
 0x691   :  { %7680 = vmatpush3.bf16.msra.mxu1 %v8196_v51 }
 0x692   :  { %7681 = vmatprep.subr.bf16.mxu1 %v8429_v11 }
 0x695   :  { %7682 = vmatpush3.bf16.msra.mxu1 %v8198_v56 }
 0x696   :  { %7683 = vmatprep.subr.bf16.mxu1 %v8429_v11 }
 0x699   :  { %7684 = vmatpush3.bf16.msra.mxu1 %v8200_v60 }
 0x69a   :  { %7695 = vmatprep.subr.bf16.mxu1 %v8429_v11 }
 0x73c   :  { %v2202_v6 = vpop.f32.mrf.mxu1 }
 0x73d   :  { %v2209_v7 = vpack.c.bf16 %v2202_v6, %v2202_v6 }
 0x73e   :  { %v7633_v8 = vpop.f32.mrf.mxu1 }
 0x73f   :  { %v2261_v9 = vsel %vm1920_vm2, %v2209_v7, 0 }
 0x740   :  { %v2205_v10 = vpop.f32.mrf.mxu1  ;;  %7642 = vmatpush3.bf16.msra.mxu0 %v2261_v9  ;;  %v2251_v12 = vpop.f32.mrf.mxu0 }
 0x741   :  { %7659 = vmatprep.subr.bf16.mxu0 %v8429_v11 }
 0x742   :  { %v7634_v13 = vpop.f32.mrf.mxu1  ;;  %v7639_v14 = vpop.f32.mrf.mxu0 }
 0x743   :  { %7644 = vmatmul.mubr.msk.bf16.vlgmr.msra.gmra.mxu0 %vm1916_vm3, %v2208_v32  ;;  %v8201_v32 = vld [vmem:[%s9945_s0 + $0x8] sm:$0xff]  }
 0x744   :  { %7661 = vmatprep.mubr.msk.bf16.mxu0 %vm8430_vm0, %v8429_v11  ;;  %v2254_v15 = vpop.f32.mrf.mxu0 }
 0x745   :  { %v8203_v15 = vld [vmem:[%s8460_s21 + $0x58] sm:$0xff]  }
 0x746   :  { %v7640_v16 = vpop.f32.mrf.mxu0 }
 0x74c   :  { %v2337_v17 = vpop.f32.mrf.mxu1 }
 0x74d   :  { %v2345_v18 = vpack.c.bf16 %v2337_v17, %v2337_v17 }
 0x74e   :  { %v7657_v19 = vpop.f32.mrf.mxu1 }
 0x74f   :  { %v2350_v20 = vsel %vm1920_vm2, %v2345_v18, 0  ;;  %v8204_v18 = vld [vmem:[%s8460_s21 + $0x50] sm:$0xff]   ;;  %v8205_v19 = vld [vmem:[%s8460_s21 + $0x48] sm:$0xff]  }
 0x750   :  { %v2340_v21 = vpop.f32.mrf.mxu1  ;;  %7660 = vmatpush3.bf16.msra.mxu0 %v2350_v20  ;;  %v8206_v20 = vld [vmem:[%s8460_s21 + $0x40] sm:$0xff]   ;;  %s9950_s21 = sld [smem:[#allocation17_spill]] }
 0x751   :  { %7665 = vmatprep.subr.bf16.mxu0 %v8429_v11 }
 0x752   :  { %v7658_v23 = vpop.f32.mrf.mxu1 }
 0x753   :  { %7662 = vmatmul.mubr.msk.bf16.vlgmr.msra.gmra.mxu0 %vm1916_vm3, %v6917_v22 }
 0x754   :  { %7673 = vmatprep.mubr.msk.bf16.mxu0 %vm8430_vm0, %v8429_v11  ;;  %7666 = vmatpush3.bf16.msra.mxu0 %v8193_v37 }
 0x755   :  { %7667 = vmatprep.subr.bf16.mxu0 %v8429_v11 }
 0x758   :  { %7668 = vmatpush3.bf16.msra.mxu0 %v8195_v50 }
 0x759   :  { %7669 = vmatprep.subr.bf16.mxu0 %v8429_v11 }
 0x75c   :  { %7670 = vmatpush3.bf16.msra.mxu0 %v8197_v55 }
 0x75d   :  { %7671 = vmatprep.subr.bf16.mxu0 %v8429_v11 }
 0x760   :  { %7672 = vmatpush3.bf16.msra.mxu0 %v8199_v59 }
 0x761   :  { %7689 = vmatprep.subr.bf16.mxu0 %v8429_v11 }
 0x803   :  { %v2297_v43 = vpop.f32.mrf.mxu0 }
 0x804   :  { %v2298_v27 = vadd.f32 %v2297_v43, %v2251_v12  ;;  %v8202_v12 = vld [vmem:[%s9945_s0] sm:$0xff]  }
 0x805   :  { %v7645_v24 = vpop.f32.mrf.mxu0 }
 0x807   :  { %v2300_v25 = vpop.f32.mrf.mxu0 }
 0x809   :  { %v7646_v26 = vpop.f32.mrf.mxu0 }
 0x813   :  { %v2386_v28 = vpop.f32.mrf.mxu0 }
 0x814   :  { %v2392_v29 = vadd.f32 %v2386_v28, %v2298_v27 }
 0x815   :  { %v7663_v30 = vpop.f32.mrf.mxu0 }
 0x816   :  { %v2393_v31 = vsel %vm1868_vm1, %v2392_v29, 0.0  ;;  %v2396_v33 = vmul.f32 %v2392_v29, %v2392_v29 }
 0x817   :  { %2394 = vadd.xlane.f32.xlu0 %v2393_v31  ;;  %v2389_v34 = vpop.f32.mrf.mxu0 }
 0x818   :  { %v2397_v35 = vsel %vm1868_vm1, %v2396_v33, 0.0 }
 0x819   :  { %2398 = vadd.xlane.f32.xlu1 %v2397_v35  ;;  %v7664_v36 = vpop.f32.mrf.mxu0  ;;  %v8207_v35 = vld [vmem:[%s9945_s0 + $0x10] sm:$0xff]   ;;  %s9973_s0 = sld [smem:[#allocation34_spill]] }
 0x8a0   :  { %v2395_v39 = vpop.xlane.xlu0 %2394 }
 0x8a1   :  { %v2400_v40 = vmul.f32 0.015625, %v2395_v39 }
 0x8a2   :  { %v2399_v41 = vpop.xlane.xlu1 %2398 }
 0x8a3   :  { %v2402_v44 = vmul.f32 %v2400_v40, %v2400_v40  ;;  %v2401_v45 = vmul.f32 0.015625, %v2399_v41 }
 0x8a5   :  { %v2403_v46 = vsub.f32 %v2401_v45, %v2402_v44 }
 0x8a7   :  { %v2404_v47 = vmax.f32 %v2403_v46, 0.0 }
 0x8a9   :  { %v2406_v48 = vadd.f32 1e-05, %v2404_v47 }
 0x8ab   :  { %8273 = vrsqrt.f32 %v2406_v48 }
 0x8b8   :  { %v8274_v52 = vpop.eup %8273 }
 0x8b9   :  { %v2408_v53 = vmul.f32 %v8274_v52, %v2405_v49 }
 0x8bb   :  { %2414 = vperm.xlu0 %8042, %v2408_v53   ;;  %v2410_v57 = vmul.f32 %v2408_v53, %v2400_v40 }
 0x8bd   :  { %v2411_v58 = vsub.f32 %v2409_v54, %v2410_v57 }
 0x8bf   :  { %2420 = vperm.xlu1 %8048, %v2411_v58  }
 0x936   :  { %v2415_v61 = vpop.permute.xlu0 %2414 }
 0x937   :  { %v2417_v62 = vmul.f32 %v2415_v61, %v2392_v29 }
 0x93a   :  { %v2421_v63 = vpop.permute.xlu1 %2420 }
 0x93b   :  { %v2423_v42 = vadd.f32 %v2421_v63, %v2417_v62 }
 0x93d   :  { %v2424_v0 = vadd.f32 %v2423_v42, %v8910_v4 }
 0x93f   :  { %v2425_v1 = vmax.f32 %v2424_v0, 0.0 }
 0x941   :  { %v2426_v2 = vpack.c.bf16 %v2425_v1, %v2425_v1 }
 0x943   :  { %7674 = vmatmul.mubr.msk.bf16.vlgmr.msra.gmra.mxu0 %vm1868_vm1, %v2426_v2  ;;  %7686 = vmatmul.mubr.msk.bf16.vlgmr.msra.gmra.mxu1 %vm1868_vm1, %v2426_v2 }
 0x944   :  { %7691 = vmatprep.mubr.msk.bf16.mxu0 %vm8430_vm0, %v8429_v11  ;;  %7697 = vmatprep.mubr.msk.bf16.mxu1 %vm8430_vm0, %v8429_v11 }
 0xa03   :  { %v2496_v3 = vpop.f32.mrf.mxu0  ;;  %v2572_v5 = vpop.f32.mrf.mxu1 }
 0xa04   :  { %v2504_v6 = vpack.c.bf16 %v2496_v3, %v2496_v3  ;;  %v2581_v7 = vpack.c.bf16 %v2572_v5, %v2572_v5  ;;  %v2842_v3 = vld [vmem:[%s9946_s5] sm:$0xff] }
 0xa05   :  { %v7675_v8 = vpop.f32.mrf.mxu0  ;;  %v7687_v4 = vpop.f32.mrf.mxu1 }
 0xa06   :  { %v2643_v9 = vsel %vm1920_vm2, %v2504_v6, 0  ;;  %v9031_v10 = vsel %vm1920_vm2, %v2581_v7, 0  ;;  %v2850_v7 = vld [vmem:[%s9947_s9] sm:$0xff]  ;;  %v2843_v8 = vld [vmem:[%s9946_s5 + $0x8] sm:$0xff] }
 0xa07   :  { %v2499_v13 = vpop.f32.mrf.mxu0  ;;  %v2575_v14 = vpop.f32.mrf.mxu1  ;;  %7690 = vmatpush3.bf16.msra.mxu0 %v9031_v10  ;;  %7696 = vmatpush3.bf16.msra.mxu1 %v2643_v9 }
 0xa08   :  { %7701 = vmatprep.subr.bf16.mxu0 %v8429_v11  ;;  %7713 = vmatprep.subr.bf16.mxu1 %v8429_v11  ;;  %v2851_v14 = vld [vmem:[%s9947_s9 + $0x8] sm:$0xff] }
 0xa09   :  { %v7676_v16 = vpop.f32.mrf.mxu0  ;;  %v7688_v17 = vpop.f32.mrf.mxu1 }
 0xa0a   :  { %7692 = vmatmul.mubr.msk.bf16.vlgmr.msra.gmra.mxu0 %vm1916_vm3, %v8201_v32  ;;  %7698 = vmatmul.mubr.msk.bf16.vlgmr.msra.gmra.mxu1 %vm1916_vm3, %v8202_v12  ;;  %v8208_v32 = vld [vmem:[%s9948_s13 + $0x8] sm:$0xff]   ;;  %v8209_v16 = vld [vmem:[%s9948_s13] sm:$0xff]  }
 0xa0b   :  { %7702 = vmatpush3.bf16.msra.mxu0 %v8203_v15  ;;  %7709 = vmatprep.mubr.msk.bf16.mxu0 %vm8430_vm0, %v8429_v11 }
 0xa0c   :  { %7703 = vmatprep.subr.bf16.mxu0 %v8429_v11  ;;  %7715 = vmatprep.mubr.msk.bf16.mxu1 %vm8430_vm0, %v8429_v11 }
 0xa0f   :  { %7704 = vmatpush3.bf16.msra.mxu0 %v8204_v18 }
 0xa10   :  { %7705 = vmatprep.subr.bf16.mxu0 %v8429_v11 }
 0xa13   :  { %7706 = vmatpush3.bf16.msra.mxu0 %v8205_v19 }
 0xa14   :  { %7707 = vmatprep.subr.bf16.mxu0 %v8429_v11 }
 0xa17   :  { %7708 = vmatpush3.bf16.msra.mxu0 %v8206_v20 }
 0xa18   :  { %7727 = vmatprep.subr.bf16.mxu0 %v8429_v11 }
 0xa1a   :  { %7710 = vmatmul.mubr.msk.bf16.vlgmr.msra.gmra.mxu0 %vm1868_vm1, %v2426_v2 }
 0xa1b   :  { %7729 = vmatprep.mubr.msk.bf16.mxu0 %vm8430_vm0, %v8429_v11 }
 0xaca   :  { %v2627_v21 = vpop.f32.mrf.mxu0  ;;  %v2679_v22 = vpop.f32.mrf.mxu1 }
 0xacb   :  { %v2680_v23 = vadd.f32 %v2679_v22, %v2627_v21 }
 0xacc   :  { %v7693_v43 = vpop.f32.mrf.mxu0  ;;  %v7699_v24 = vpop.f32.mrf.mxu1 }
 0xace   :  { %v2630_v25 = vpop.f32.mrf.mxu0  ;;  %v2682_v26 = vpop.f32.mrf.mxu1 }
 0xacf   :  { %v2683_v27 = vadd.f32 %v2682_v26, %v2630_v25 }
 0xad0   :  { %v7694_v28 = vpop.f32.mrf.mxu0  ;;  %v7700_v29 = vpop.f32.mrf.mxu1 }
 0xad1   :  { %v8210_v28 = vld [vmem:[%s9949_s17 + $0x8] sm:$0xff]   ;;  %v8211_v29 = vld [vmem:[%s9948_s13 + $0x18] sm:$0xff]  }
 0xada   :  { %v2753_v30 = vpop.f32.mrf.mxu0 }
 0xadb   :  { %v2762_v31 = vpack.c.bf16 %v2753_v30, %v2753_v30  ;;  %v8212_v30 = vld [vmem:[%s9948_s13 + $0x10] sm:$0xff]  }
 0xadc   :  { %v7711_v33 = vpop.f32.mrf.mxu0 }
 0xadd   :  { %v2772_v34 = vsel %vm1920_vm2, %v2762_v31, 0  ;;  %v8214_v31 = vld [vmem:[%s9950_s21] sm:$0xff]  }
 0xade   :  { %v2756_v36 = vpop.f32.mrf.mxu0  ;;  %7714 = vmatpush3.bf16.msra.mxu1 %v2772_v34 }
 0xadf   :  { %7719 = vmatprep.subr.bf16.mxu1 %v8429_v11 }
 0xae0   :  { %v7712_v37 = vpop.f32.mrf.mxu0 }
 0xae1   :  { %7716 = vmatmul.mubr.msk.bf16.vlgmr.msra.gmra.mxu1 %vm1916_vm3, %v8207_v35 }
 0xae2   :  { %7723 = vmatprep.mubr.msk.bf16.mxu1 %vm8430_vm0, %v8429_v11  ;;  %7720 = vmatpush3.bf16.msra.mxu1 %v8208_v32 }
 0xae3   :  { %7721 = vmatprep.subr.bf16.mxu1 %v8429_v11 }
 0xae6   :  { %7722 = vmatpush3.bf16.msra.mxu1 %v8209_v16 }
 0xae7   :  { %7733 = vmatprep.subr.bf16.mxu1 %v8429_v11 }
 0xba1   :  { %v2808_v38 = vpop.f32.mrf.mxu1 }
 0xba2   :  { %v2815_v39 = vadd.f32 %v2808_v38, %v2680_v23 }
 0xba3   :  { %v7717_v40 = vpop.f32.mrf.mxu1 }
 0xba4   :  { %v2818_v41 = vsel %vm2817_vm4, %v2815_v39, 0.0  ;;  %v2824_v44 = vmul.f32 %v2815_v39, %v2815_v39 }
 0xba5   :  { %2819 = vadd.xlane.f32.xlu0 %v2818_v41  ;;  %v2811_v45 = vpop.f32.mrf.mxu1 }
 0xba6   :  { %v2816_v46 = vadd.f32 %v2811_v45, %v2683_v27  ;;  %v2826_v48 = vsel %vm2817_vm4, %v2824_v44, 0.0 }
 0xba7   :  { %v7718_v47 = vpop.f32.mrf.mxu1 }
 0xba8   :  { %v2821_v49 = vsel %vm2817_vm4, %v2816_v46, 0.0  ;;  %v2825_v50 = vmul.f32 %v2816_v46, %v2816_v46 }
 0xba9   :  { %2827 = vadd.xlane.f32.xlu0 %v2826_v48  ;;  %2822 = vadd.xlane.f32.xlu1 %v2821_v49  ;;  %v8215_v49 = vld [vmem:[%s9949_s17 + $0x10] sm:$0xff]  }
 0xbaa   :  { %v2829_v51 = vsel %vm2817_vm4, %v2825_v50, 0.0 }
 0xbad   :  { %2830 = vadd.xlane.f32.xlu0 %v2829_v51 }
 0xc2e   :  { %v2820_v52 = vpop.xlane.xlu0 %2819 }
 0xc2f   :  { %v2832_v53 = vmul.f32 0.03125, %v2820_v52 }
 0xc31   :  { %v2836_v56 = vmul.f32 %v2832_v53, %v2832_v53 }
 0xc32   :  { %v2828_v54 = vpop.xlane.xlu0 %2827  ;;  %v2823_v55 = vpop.xlane.xlu1 %2822 }
 0xc33   :  { %v2834_v57 = vmul.f32 0.03125, %v2828_v54  ;;  %v2833_v58 = vmul.f32 0.03125, %v2823_v55 }
 0xc35   :  { %v2838_v59 = vsub.f32 %v2834_v57, %v2836_v56  ;;  %v2837_v62 = vmul.f32 %v2833_v58, %v2833_v58 }
 0xc36   :  { %v2831_v60 = vpop.xlane.xlu0 %2830 }
 0xc37   :  { %v2840_v61 = vmax.f32 %v2838_v59, 0.0  ;;  %v2835_v63 = vmul.f32 0.03125, %v2831_v60 }
 0xc39   :  { %v2844_v42 = vadd.f32 1e-05, %v2840_v61  ;;  %v2839_v0 = vsub.f32 %v2835_v63, %v2837_v62 }
 0xc3b   :  { %8275 = vrsqrt.f32 %v2844_v42  ;;  %v2841_v1 = vmax.f32 %v2839_v0, 0.0 }
 0xc3d   :  { %v2845_v2 = vadd.f32 1e-05, %v2841_v1 }
 0xc3f   :  { %8277 = vrsqrt.f32 %v2845_v2 }
 0xc48   :  { %v8276_v5 = vpop.eup %8275 }
 0xc49   :  { %v2848_v6 = vmul.f32 %v8276_v5, %v2842_v3 }
 0xc4b   :  { %2858 = vperm.xlu1 %8048, %v2848_v6   ;;  %v2852_v4 = vmul.f32 %v2848_v6, %v2832_v53 }
 0xc4c   :  { %v8278_v9 = vpop.eup %8277 }
 0xc4d   :  { %v2854_v12 = vsub.f32 %v2850_v7, %v2852_v4  ;;  %v2849_v13 = vmul.f32 %v8278_v9, %v2843_v8 }
 0xc4f   :  { %2870 = vperm.xlu1 %8048, %v2854_v12   ;;  %2863 = vperm.xlu0 %8042, %v2849_v13   ;;  %v2853_v15 = vmul.f32 %v2849_v13, %v2833_v58 }
 0xc51   :  { %v2855_v17 = vsub.f32 %v2851_v14, %v2853_v15 }
 0xc53   :  { %2875 = vperm.xlu1 %8048, %v2855_v17  }
 0xcc6   :  { %v2859_v18 = vpop.permute.xlu1 %2858 }
 0xcc7   :  { %v2866_v21 = vmul.f32 %v2859_v18, %v2815_v39 }
 0xcca   :  { %v2864_v19 = vpop.permute.xlu0 %2863  ;;  %v2871_v20 = vpop.permute.xlu1 %2870 }
 0xccb   :  { %v2867_v22 = vmul.f32 %v2864_v19, %v2816_v46  ;;  %v2878_v23 = vadd.f32 %v2871_v20, %v2866_v21 }
 0xccd   :  { %v2880_v25 = vmax.f32 %v2878_v23, 0.0 }
 0xcce   :  { %v2876_v43 = vpop.permute.xlu1 %2875 }
 0xccf   :  { %v2879_v24 = vadd.f32 %v2876_v43, %v2867_v22 }
 0xcd1   :  { %v2881_v26 = vmax.f32 %v2879_v24, 0.0 }
 0xcd3   :  { %v2882_v27 = vpack.c.bf16 %v2881_v26, %v2880_v25 }
 0xcd5   :  { %7724 = vmatmul.mubr.msk.bf16.vlgmr.msra.gmra.mxu1 %vm2817_vm4, %v2882_v27  ;;  %7728 = vmatpush3.bf16.msra.mxu0 %v2882_v27 }
 0xcd6   :  { %7739 = vmatprep.subr.bf16.mxu0 %v8429_v11  ;;  %7735 = vmatprep.mubr.msk.bf16.mxu1 %vm8430_vm0, %v8429_v11 }
 0xcd8   :  { %7730 = vmatmul.mubr.msk.bf16.vlgmr.msra.gmra.mxu0 %vm2954_vm5, %v8210_v28 }
 0xcd9   :  { %7740 = vmatpush3.bf16.msra.mxu0 %v8211_v29  ;;  %7743 = vmatprep.mubr.msk.bf16.mxu0 %vm8430_vm0, %v8429_v11 }
 0xcda   :  { %7741 = vmatprep.subr.bf16.mxu0 %v8429_v11 }
 0xcdd   :  { %7742 = vmatpush3.bf16.msra.mxu0 %v8212_v30 }
 0xcde   :  { %7753 = vmatprep.subr.bf16.mxu0 %v8429_v11 }
 0xce0   :  { %7744 = vmatmul.mubr.msk.bf16.vlgmr.msra.gmra.mxu0 %vm2817_vm4, %v2882_v27 }
 0xce1   :  { %7754 = vmatpush3.bf16.msra.mxu0 %v9031_v10  ;;  %7755 = vmatprep.mubr.msk.bf16.mxu0 %vm8430_vm0, %v8429_v11  ;;  %v8213_v10 = vld [vmem:[%s9949_s17] sm:$0xff]  }
 0xce2   :  { %7767 = vmatprep.subr.bf16.mxu0 %v8429_v11 }
 0xce8   :  { %7756 = vmatmul.mubr.msk.bf16.vlgmr.msra.gmra.mxu0 %vm1916_vm3, %v8214_v31 }
 0xce9   :  { %7771 = vmatprep.mubr.msk.bf16.mxu0 %vm8430_vm0, %v8429_v11 }
 0xd95   :  { %v2936_v33 = vpop.f32.mrf.mxu1 }
 0xd97   :  { %v7725_v34 = vpop.f32.mrf.mxu1 }
 0xd98   :  { %v2992_v35 = vpop.f32.mrf.mxu0 }
 0xd99   :  { %v2939_v36 = vpop.f32.mrf.mxu1 }
 0xd9a   :  { %v2945_v37 = vpack.c.bf16 %v2939_v36, %v2936_v33  ;;  %v7731_v38 = vpop.f32.mrf.mxu0 }
 0xd9b   :  { %v7726_v39 = vpop.f32.mrf.mxu1 }
 0xd9c   :  { %v2995_v40 = vpop.f32.mrf.mxu0  ;;  %7734 = vmatpush3.bf16.msra.mxu1 %v2945_v37 }
 0xd9d   :  { %7747 = vmatprep.subr.bf16.mxu1 %v8429_v11 }
 0xd9e   :  { %v7732_v41 = vpop.f32.mrf.mxu0 }
 0xd9f   :  { %7736 = vmatmul.mubr.msk.bf16.vlgmr.msra.gmra.mxu1 %vm2954_vm5, %v8213_v10 }
 0xda0   :  { %v3099_v44 = vpop.f32.mrf.mxu0  ;;  %7749 = vmatprep.mubr.msk.bf16.mxu1 %vm8430_vm0, %v8429_v11 }
 0xda2   :  { %v7745_v45 = vpop.f32.mrf.mxu0 }
 0xda4   :  { %v3102_v46 = vpop.f32.mrf.mxu0 }
 0xda5   :  { %v3109_v47 = vpack.c.bf16 %v3102_v46, %v3099_v44 }
 0xda6   :  { %v7746_v48 = vpop.f32.mrf.mxu0 }
 0xda7   :  { %7748 = vmatpush3.bf16.msra.mxu1 %v3109_v47  ;;  %v3185_v48 = vld [vmem:[%s9951_s14] sm:$0xff] }
 0xda8   :  { %7759 = vmatprep.subr.bf16.mxu1 %v8429_v11  ;;  %v9104_v50 = vpop.f32.mrf.mxu0 }
 0xda9   :  { %v3274_v51 = vsel %vm2817_vm4, %v9104_v50, 0.0  ;;  %v3280_v32 = vmul.f32 %v9104_v50, %v9104_v50 }
 0xdaa   :  { %7750 = vmatmul.mubr.msk.bf16.vlgmr.msra.gmra.mxu1 %vm2954_vm5, %v8215_v49  ;;  %3275 = vadd.xlane.f32.xlu0 %v3274_v51  ;;  %v7757_v52 = vpop.f32.mrf.mxu0  ;;  %v3186_v51 = vld [vmem:[%s9951_s14 + $0x8] sm:$0xff] }
 0xdab   :  { %7763 = vmatprep.mubr.msk.bf16.mxu1 %vm8430_vm0, %v8429_v11  ;;  %v3282_v13 = vsel %vm2817_vm4, %v3280_v32, 0.0  ;;  %v8217_v32 = vld [vmem:[%s9955_s6 + $0x18] sm:$0xff]  }
 0xdac   :  { %v9108_v53 = vpop.f32.mrf.mxu0  ;;  %7768 = vmatpush3.bf16.msra.mxu0 %v8217_v32 }
 0xdad   :  { %v3277_v54 = vsel %vm2817_vm4, %v9108_v53, 0.0  ;;  %v3281_v9 = vmul.f32 %v9108_v53, %v9108_v53  ;;  %7769 = vmatprep.subr.bf16.mxu0 %v8429_v11 }
 0xdae   :  { %3278 = vadd.xlane.f32.xlu0 %v3277_v54  ;;  %v7758_v55 = vpop.f32.mrf.mxu0 }
 0xdaf   :  { %v3285_v12 = vsel %vm2817_vm4, %v3281_v9, 0.0  ;;  %v3298_v55 = vld [vmem:[%s9952_s19] sm:$0xff]  ;;  %v8216_v9 = vld [vmem:[%s9955_s6 + $0x8] sm:$0xff]  }
 0xdb0   :  { %7760 = vmatpush3.bf16.msra.mxu1 %v8216_v9 }
 0xdb1   :  { %7761 = vmatprep.subr.bf16.mxu1 %v8429_v11 }
 0xe33   :  { %v3276_v14 = vpop.xlane.xlu0 %3275 }
 0xe34   :  { %v3288_v22 = vmul.f32 0.03125, %v3276_v14  ;;  %v8219_v14 = vld [vmem:[%s9955_s6 + $0x10] sm:$0xff]  }
 0xe35   :  { %7770 = vmatpush3.bf16.msra.mxu0 %v8219_v14 }
 0xe36   :  { %v3292_v30 = vmul.f32 %v3288_v22, %v3288_v22 }
 0xe37   :  { %v3279_v15 = vpop.xlane.xlu0 %3278 }
 0xe38   :  { %v3289_v23 = vmul.f32 0.03125, %v3279_v15 }
 0xe3a   :  { %v3293_v31 = vmul.f32 %v3289_v23, %v3289_v23 }
 0xe5f   :  { %v3041_v56 = vpop.f32.mrf.mxu1 }
 0xe60   :  { %v3042_v60 = vadd.f32 %v3041_v56, %v2992_v35 }
 0xe61   :  { %v7737_v57 = vpop.f32.mrf.mxu1 }
 0xe62   :  { %v3193_v57 = vld [vmem:[%s9953_s24] sm:$0xff] }
 0xe63   :  { %v3044_v58 = vpop.f32.mrf.mxu1 }
 0xe64   :  { %v3045_v42 = vadd.f32 %v3044_v58, %v2995_v40 }
 0xe65   :  { %v7738_v59 = vpop.f32.mrf.mxu1 }
 0xe6a   :  { %v3152_v61 = vpop.f32.mrf.mxu1 }
 0xe6b   :  { %v9112_v62 = vadd.f32 %v3152_v61, %v3042_v60 }
 0xe6c   :  { %v7751_v63 = vpop.f32.mrf.mxu1 }
 0xe6d   :  { %v3161_v0 = vsel %vm2817_vm4, %v9112_v62, 0.0  ;;  %v3167_v1 = vmul.f32 %v9112_v62, %v9112_v62  ;;  %v3299_v63 = vld [vmem:[%s9952_s19 + $0x8] sm:$0xff] }
 0xe6e   :  { %3162 = vadd.xlane.f32.xlu0 %v3161_v0  ;;  %v3155_v2 = vpop.f32.mrf.mxu1 }
 0xe6f   :  { %v9118_v3 = vadd.f32 %v3155_v2, %v3045_v42  ;;  %v3169_v5 = vsel %vm2817_vm4, %v3167_v1, 0.0  ;;  %v3306_v42 = vld [vmem:[%s9954_s30] sm:$0xff] }
 0xe70   :  { %3170 = vadd.xlane.f32.xlu1 %v3169_v5  ;;  %v7752_v6 = vpop.f32.mrf.mxu1 }
 0xe71   :  { %v3168_v7 = vmul.f32 %v9118_v3, %v9118_v3  ;;  %v3164_v4 = vsel %vm2817_vm4, %v9118_v3, 0.0  ;;  %v3194_v6 = vld [vmem:[%s9953_s24 + $0x8] sm:$0xff] }
 0xe73   :  { %v3172_v8 = vsel %vm2817_vm4, %v3168_v7, 0.0 }
 0xe74   :  { %3173 = vadd.xlane.f32.xlu0 %v3172_v8  ;;  %3165 = vadd.xlane.f32.xlu1 %v3164_v4  ;;  %v3307_v4 = vld [vmem:[%s9954_s30 + $0x8] sm:$0xff] }
 0xe78   :  { %3286 = vadd.xlane.f32.xlu0 %v3285_v12  ;;  %3283 = vadd.xlane.f32.xlu1 %v3282_v13  ;;  %v8218_v13 = vld [vmem:[%s9955_s6] sm:$0xff]  }
 0xe79   :  { %7762 = vmatpush3.bf16.msra.mxu1 %v8218_v13 }
 0xef7   :  { %v3163_v16 = vpop.xlane.xlu0 %3162 }
 0xef8   :  { %v3175_v17 = vmul.f32 0.03125, %v3163_v16 }
 0xef9   :  { %v3171_v18 = vpop.xlane.xlu1 %3170 }
 0xefa   :  { %v3179_v19 = vmul.f32 %v3175_v17, %v3175_v17  ;;  %v3177_v20 = vmul.f32 0.03125, %v3171_v18 }
 0xefc   :  { %v3181_v21 = vsub.f32 %v3177_v20, %v3179_v19 }
 0xefd   :  { %v3174_v43 = vpop.xlane.xlu0 %3173  ;;  %v3166_v24 = vpop.xlane.xlu1 %3165 }
 0xefe   :  { %v3183_v25 = vmax.f32 %v3181_v21, 0.0  ;;  %v3176_v26 = vmul.f32 0.03125, %v3166_v24  ;;  %v3178_v28 = vmul.f32 0.03125, %v3174_v43 }
 0xf00   :  { %v3187_v27 = vadd.f32 1e-05, %v3183_v25  ;;  %v3180_v29 = vmul.f32 %v3176_v26, %v3176_v26 }
 0xf01   :  { %v3287_v33 = vpop.xlane.xlu0 %3286  ;;  %v3284_v34 = vpop.xlane.xlu1 %3283 }
 0xf02   :  { %8279 = vrsqrt.f32 %v3187_v27  ;;  %v3182_v35 = vsub.f32 %v3178_v28, %v3180_v29  ;;  %v3291_v36 = vmul.f32 0.03125, %v3287_v33  ;;  %v3290_v37 = vmul.f32 0.03125, %v3284_v34 }
 0xf04   :  { %v3184_v38 = vmax.f32 %v3182_v35, 0.0  ;;  %v3295_v39 = vsub.f32 %v3291_v36, %v3293_v31  ;;  %v3294_v10 = vsub.f32 %v3290_v37, %v3292_v30  ;;  %v8221_v35 = vld [vmem:[%s9956_s12] sm:$0xff]  }
 0xf06   :  { %v3188_v40 = vadd.f32 1e-05, %v3184_v38  ;;  %v3297_v41 = vmax.f32 %v3295_v39, 0.0  ;;  %v3296_v44 = vmax.f32 %v3294_v10, 0.0 }
 0xf08   :  { %8281 = vrsqrt.f32 %v3188_v40  ;;  %v3300_v45 = vadd.f32 1e-05, %v3296_v44  ;;  %v3301_v46 = vadd.f32 1e-05, %v3297_v41 }
 0xf0a   :  { %8283 = vrsqrt.f32 %v3300_v45  ;;  %v8222_v45 = vld [vmem:[%s9956_s12 + $0x18] sm:$0xff]  }
 0xf0b   :  { %8285 = vrsqrt.f32 %v3301_v46  ;;  %v8223_v46 = vld [vmem:[%s9956_s12 + $0x8] sm:$0xff]  }
 0xf0f   :  { %v8280_v47 = vpop.eup %8279 }
 0xf10   :  { %v3191_v49 = vmul.f32 %v8280_v47, %v3185_v48  ;;  %v8224_v47 = vld [vmem:[%s9955_s6 + $0x28] sm:$0xff]   ;;  %v8225_v48 = vld [vmem:[%s9955_s6 + $0x20] sm:$0xff]  }
 0xf12   :  { %v3195_v56 = vmul.f32 %v3191_v49, %v3175_v17 }
 0xf14   :  { %v3197_v61 = vsub.f32 %v3193_v57, %v3195_v56 }
 0xf15   :  { %v8282_v52 = vpop.eup %8281 }
 0xf16   :  { %v3192_v54 = vmul.f32 %v8282_v52, %v3186_v51 }
 0xf17   :  { %v8284_v58 = vpop.eup %8283 }
 0xf18   :  { %3206 = vperm.xlu0 %8042, %v3192_v54   ;;  %v3304_v59 = vmul.f32 %v8284_v58, %v3298_v55  ;;  %v8286_v60 = vpop.eup %8285  ;;  %v3196_v5 = vmul.f32 %v3192_v54, %v3176_v26 }
 0xf19   :  { %v3305_v1 = vmul.f32 %v8286_v60, %v3299_v63 }
 0xf1a   :  { %3314 = vperm.xlu1 %8048, %v3304_v59   ;;  %v3308_v0 = vmul.f32 %v3304_v59, %v3288_v22  ;;  %v3198_v7 = vsub.f32 %v3194_v6, %v3196_v5 }
 0xf1b   :  { %v3309_v8 = vmul.f32 %v3305_v1, %v3289_v23 }
 0xf1c   :  { %3213 = vperm.xlu0 %8042, %v3197_v61   ;;  %v3310_v2 = vsub.f32 %v3306_v42, %v3308_v0  ;;  %v8227_v61 = vld [vmem:[%s9956_s12 + $0x28] sm:$0xff]  }
 0xf1d   :  { %v3311_v12 = vsub.f32 %v3307_v4, %v3309_v8 }
 0xf1e   :  { %3319 = vperm.xlu1 %8048, %v3305_v1  }
 0xf20   :  { %3326 = vperm.xlu0 %8042, %v3310_v2  }
 0xf22   :  { %3201 = vperm.xlu1 %8048, %v3191_v49   ;;  %v8226_v49 = vld [vmem:[%s9956_s12 + $0x20] sm:$0xff]  }
 0xf26   :  { %3218 = vperm.xlu1 %8048, %v3198_v7  }
 0xf2a   :  { %3331 = vperm.xlu1 %8048, %v3311_v12  }
 0xf93   :  { %v3207_v15 = vpop.permute.xlu0 %3206 }
 0xf94   :  { %v3210_v24 = vmul.f32 %v3207_v15, %v9118_v3 }
 0xf95   :  { %v3315_v16 = vpop.permute.xlu1 %3314 }
 0xf96   :  { %v3322_v23 = vmul.f32 %v3315_v16, %v9104_v50  ;;  %v8220_v50 = vld [vmem:[%s9956_s12 + $0x10] sm:$0xff]  }
 0xf97   :  { %v3214_v18 = vpop.permute.xlu0 %3213 }
 0xf99   :  { %v3320_v17 = vpop.permute.xlu1 %3319 }
 0xf9a   :  { %v3323_v25 = vmul.f32 %v3320_v17, %v9108_v53 }
 0xf9b   :  { %v3327_v21 = vpop.permute.xlu0 %3326 }
 0xf9c   :  { %v3334_v26 = vadd.f32 %v3327_v21, %v3322_v23 }
 0xf9d   :  { %v3202_v19 = vpop.permute.xlu1 %3201 }
 0xf9e   :  { %v3209_v20 = vmul.f32 %v3202_v19, %v9112_v62 }
 0xfa0   :  { %v3221_v43 = vadd.f32 %v3214_v18, %v3209_v20 }
 0xfa1   :  { %v3219_v22 = vpop.permute.xlu1 %3218 }
 0xfa2   :  { %v3336_v28 = vadd.f32 %v3334_v26, %v3221_v43  ;;  %v3222_v29 = vadd.f32 %v3219_v22, %v3210_v24 }
 0xfa4   :  { %v3338_v33 = vmax.f32 %v3336_v28, 0.0 }
 0xfa5   :  { %v3332_v27 = vpop.permute.xlu1 %3331 }
 0xfa6   :  { %v3335_v30 = vadd.f32 %v3332_v27, %v3323_v25 }
 0xfa8   :  { %v3337_v31 = vadd.f32 %v3335_v30, %v3222_v29 }
 0xfaa   :  { %v3339_v34 = vmax.f32 %v3337_v31, 0.0 }
 0xfac   :  { %v3340_v62 = vpack.c.bf16 %v3339_v34, %v3338_v33 }
 0xfae   :  { %7764 = vmatmul.mubr.msk.bf16.vlgmr.msra.gmra.mxu1 %vm2817_vm4, %v3340_v62  ;;  %7772 = vmatmul.mubr.msk.bf16.vlgmr.msra.gmra.mxu0 %vm2817_vm4, %v3340_v62 }
 0xfaf   :  { %7777 = vmatprep.mubr.msk.bf16.mxu1 %vm2954_vm5, %v8220_v50  ;;  %7783 = vmatprep.mubr.msk.bf16.mxu0 %vm2954_vm5, %v8221_v35 }
0x106e   :  { %v3394_v53 = vpop.f32.mrf.mxu1  ;;  %v3457_v3 = vpop.f32.mrf.mxu0 }
0x1070   :  { %v7765_v36 = vpop.f32.mrf.mxu1  ;;  %v7773_v37 = vpop.f32.mrf.mxu0 }
0x1072   :  { %v3397_v38 = vpop.f32.mrf.mxu1  ;;  %v3460_v39 = vpop.f32.mrf.mxu0 }
0x1073   :  { %v3405_v10 = vpack.c.bf16 %v3397_v38, %v3394_v53  ;;  %v9156_v40 = vpack.c.bf16 %v3460_v39, %v3457_v3 }
0x1074   :  { %v7766_v41 = vpop.f32.mrf.mxu1  ;;  %v7774_v44 = vpop.f32.mrf.mxu0 }
0x1075   :  { %7775 = vmatprep.subr.bf16.mxu1 %v9156_v40  ;;  %7781 = vmatprep.subr.bf16.mxu0 %v3405_v10 }
0x1076   :  { %7776 = vmatpush3.bf16.msra.mxu1 %v9156_v40  ;;  %7782 = vmatpush3.bf16.msra.mxu0 %v3405_v10 }
0x1077   :  { %7787 = vmatprep.subr.bf16.mxu1 %v8429_v11 }
0x1079   :  { %7778 = vmatmul.mubr.msk.bf16.vlgmr.msra.gmra.mxu1 %vm2954_vm5, %v8222_v45  ;;  %7784 = vmatmul.mubr.msk.bf16.vlgmr.msra.gmra.mxu0 %vm2954_vm5, %v8223_v46 }
0x107a   :  { %7788 = vmatpush3.bf16.msra.mxu1 %v8224_v47  ;;  %7791 = vmatprep.mubr.msk.bf16.mxu1 %vm8430_vm0, %v8429_v11 }
0x107b   :  { %7789 = vmatprep.subr.bf16.mxu1 %v8429_v11  ;;  %7797 = vmatprep.mubr.msk.bf16.mxu0 %vm2954_vm5, %v8226_v49 }
0x107e   :  { %7790 = vmatpush3.bf16.msra.mxu1 %v8225_v48 }
0x1081   :  { %7792 = vmatmul.mubr.msk.bf16.vlgmr.msra.gmra.mxu1 %vm2817_vm4, %v3340_v62 }
0x1139   :  { %v7779_v51 = vpop.f32.mrf.mxu1  ;;  %v7785_v63 = vpop.f32.mrf.mxu0 }
0x113a   :  { %v3594_v2 = vadd.f32 %v7785_v63, %v7779_v51 }
0x113b   :  { %v3520_v52 = vpop.f32.mrf.mxu1  ;;  %v3585_v42 = vpop.f32.mrf.mxu0 }
0x113c   :  { %v3586_v12 = vadd.f32 %v3585_v42, %v3520_v52  ;;  %v3799_v42 = vld [vmem:[%s9958_s27 + $0x10] sm:$0xff] }
0x113d   :  { %v7780_v54 = vpop.f32.mrf.mxu1  ;;  %v7786_v0 = vpop.f32.mrf.mxu0 }
0x113e   :  { %v3597_v8 = vadd.f32 %v7786_v0, %v7780_v54  ;;  %v3784_v0 = vld [vmem:[%s9957_s20 + $0x18] sm:$0xff] }
0x113f   :  { %v3523_v55 = vpop.f32.mrf.mxu1  ;;  %v3588_v1 = vpop.f32.mrf.mxu0 }
0x1140   :  { %v3589_v19 = vadd.f32 %v3588_v1, %v3523_v55 }
0x1141   :  { %v3651_v56 = vpop.f32.mrf.mxu1 }
0x1143   :  { %v7793_v57 = vpop.f32.mrf.mxu1 }
0x1145   :  { %v3654_v58 = vpop.f32.mrf.mxu1 }
0x1146   :  { %v3663_v59 = vpack.c.bf16 %v3654_v58, %v3651_v56 }
0x1147   :  { %v7794_v60 = vpop.f32.mrf.mxu1 }
0x1148   :  { %7795 = vmatprep.subr.bf16.mxu0 %v3663_v59  ;;  %v3783_v60 = vld [vmem:[%s9957_s20 + $0x10] sm:$0xff] }
0x1149   :  { %7796 = vmatpush3.bf16.msra.mxu0 %v3663_v59 }
0x114c   :  { %7798 = vmatmul.mubr.msk.bf16.vlgmr.msra.gmra.mxu0 %vm2954_vm5, %v8227_v61 }
0x120c   :  { %v7799_v5 = vpop.f32.mrf.mxu0 }
0x120d   :  { %v9175_v6 = vadd.f32 %v7799_v5, %v3594_v2 }
0x120e   :  { %v3714_v7 = vpop.f32.mrf.mxu0 }
0x120f   :  { %v3739_v4 = vsel %vm2954_vm5, %v9175_v6, 0.0  ;;  %v3747_v9 = vmul.f32 %v9175_v6, %v9175_v6  ;;  %v9183_v14 = vadd.f32 %v3714_v7, %v3586_v12  ;;  %v3782_v12 = vld [vmem:[%s9957_s20 + $0x8] sm:$0xff] }
0x1210   :  { %3740 = vadd.xlane.f32.xlu0 %v3739_v4  ;;  %v7800_v32 = vpop.f32.mrf.mxu0 }
0x1211   :  { %v9181_v13 = vadd.f32 %v7800_v32, %v3597_v8  ;;  %v3755_v15 = vsel %vm2954_vm5, %v3747_v9, 0.0  ;;  %v3733_v22 = vsel %vm2954_vm5, %v9183_v14, 0.0  ;;  %v3745_v23 = vmul.f32 %v9183_v14, %v9183_v14  ;;  %v3781_v8 = vld [vmem:[%s9957_s20] sm:$0xff] }
0x1212   :  { %v3717_v18 = vpop.f32.mrf.mxu0  ;;  %v3797_v32 = vld [vmem:[%s9958_s27] sm:$0xff] }
0x1213   :  { %v3742_v16 = vsel %vm2954_vm5, %v9181_v13, 0.0  ;;  %v3748_v17 = vmul.f32 %v9181_v13, %v9181_v13  ;;  %v9190_v20 = vadd.f32 %v3717_v18, %v3589_v19  ;;  %v3749_v43 = vsel %vm2954_vm5, %v3745_v23, 0.0 }
0x1214   :  { %3756 = vadd.xlane.f32.xlu0 %v3755_v15  ;;  %3743 = vadd.xlane.f32.xlu1 %v3742_v16 }
0x1215   :  { %v3758_v21 = vsel %vm2954_vm5, %v3748_v17, 0.0  ;;  %v3736_v24 = vsel %vm2954_vm5, %v9190_v20, 0.0  ;;  %v3746_v25 = vmul.f32 %v9190_v20, %v9190_v20 }
0x1217   :  { %v3752_v26 = vsel %vm2954_vm5, %v3746_v25, 0.0 }
0x1218   :  { %3759 = vadd.xlane.f32.xlu0 %v3758_v21  ;;  %3734 = vadd.xlane.f32.xlu1 %v3733_v22  ;;  %v3800_v21 = vld [vmem:[%s9958_s27 + $0x18] sm:$0xff] }
0x121c   :  { %3750 = vadd.xlane.f32.xlu1 %v3749_v43  ;;  %3737 = vadd.xlane.f32.xlu0 %v3736_v24  ;;  %v3798_v43 = vld [vmem:[%s9958_s27 + $0x8] sm:$0xff]  ;;  %v8228_v24 = vld [vmem:[%s9959_s4] sm:$0xff]  }
0x121d   :  { %7801 = vmatprep.subr.bf16.mxu1 %v8228_v24 }
0x121e   :  { %7802 = vmatpush3.bf16.msra.mxu1 %v8228_v24 }
0x1220   :  { %3753 = vadd.xlane.f32.xlu0 %v3752_v26  ;;  %v8229_v26 = vld [vmem:[%s9960_s22 + $0x10] sm:$0xff]  }
0x1221   :  { %7811 = vmatprep.mubr.msk.bf16.mxu0 %vm2817_vm4, %v8229_v26 }
0x1299   :  { %v3741_v27 = vpop.xlane.xlu0 %3740 }
0x129a   :  { %v3763_v28 = vmul.f32 0.0625, %v3741_v27 }
0x129c   :  { %v3771_v31 = vmul.f32 %v3763_v28, %v3763_v28 }
0x129d   :  { %v3757_v29 = vpop.xlane.xlu0 %3756  ;;  %v3744_v30 = vpop.xlane.xlu1 %3743 }
0x129e   :  { %v3767_v33 = vmul.f32 0.0625, %v3757_v29  ;;  %v3764_v34 = vmul.f32 0.0625, %v3744_v30 }
0x12a0   :  { %v3775_v62 = vsub.f32 %v3767_v33, %v3771_v31  ;;  %v3772_v3 = vmul.f32 %v3764_v34, %v3764_v34 }
0x12a1   :  { %v3760_v50 = vpop.xlane.xlu0 %3759  ;;  %v3735_v35 = vpop.xlane.xlu1 %3734 }
0x12a2   :  { %v3779_v53 = vmax.f32 %v3775_v62, 0.0  ;;  %v3768_v36 = vmul.f32 0.0625, %v3760_v50  ;;  %v3761_v37 = vmul.f32 0.0625, %v3735_v35 }
0x12a4   :  { %v3787_v38 = vadd.f32 1e-05, %v3779_v53  ;;  %v3776_v39 = vsub.f32 %v3768_v36, %v3772_v3  ;;  %v3769_v10 = vmul.f32 %v3761_v37, %v3761_v37 }
0x12a5   :  { %v3751_v41 = vpop.xlane.xlu1 %3750  ;;  %v3738_v44 = vpop.xlane.xlu0 %3737 }
0x12a6   :  { %8287 = vrsqrt.f32 %v3787_v38  ;;  %v3780_v45 = vmax.f32 %v3776_v39, 0.0  ;;  %v3765_v46 = vmul.f32 0.0625, %v3751_v41  ;;  %v3762_v47 = vmul.f32 0.0625, %v3738_v44 }
0x12a8   :  { %v3788_v48 = vadd.f32 1e-05, %v3780_v45  ;;  %v3773_v49 = vsub.f32 %v3765_v46, %v3769_v10  ;;  %v3770_v54 = vmul.f32 %v3762_v47, %v3762_v47  ;;  %v8231_v46 = vld [vmem:[%s9959_s4 + $0x8] sm:$0xff]  }
0x12a9   :  { %v3754_v51 = vpop.xlane.xlu0 %3753 }
0x12aa   :  { %8289 = vrsqrt.f32 %v3788_v48  ;;  %v3777_v52 = vmax.f32 %v3773_v49, 0.0  ;;  %v3766_v55 = vmul.f32 0.0625, %v3754_v51  ;;  %v8234_v48 = vld [vmem:[%s9960_s22] sm:$0xff]  }
0x12ac   :  { %v3785_v56 = vadd.f32 1e-05, %v3777_v52  ;;  %v3774_v57 = vsub.f32 %v3766_v55, %v3770_v54 }
0x12ae   :  { %8291 = vrsqrt.f32 %v3785_v56  ;;  %v3778_v58 = vmax.f32 %v3774_v57, 0.0 }
0x12b0   :  { %v3786_v59 = vadd.f32 1e-05, %v3778_v58 }
0x12b2   :  { %8293 = vrsqrt.f32 %v3786_v59 }
0x12b3   :  { %v8288_v61 = vpop.eup %8287 }
0x12b4   :  { %v3795_v63 = vmul.f32 %v8288_v61, %v3783_v60  ;;  %v8235_v61 = vld [vmem:[%s9960_s22 + $0x8] sm:$0xff]  }
0x12b6   :  { %3821 = vperm.xlu1 %8048, %v3795_v63   ;;  %v3803_v1 = vmul.f32 %v3795_v63, %v3763_v28  ;;  %v8236_v63 = vld [vmem:[%s9960_s22 + $0x20] sm:$0xff]  }
0x12b7   :  { %v8290_v2 = vpop.eup %8289 }
0x12b8   :  { %v3807_v5 = vsub.f32 %v3799_v42, %v3803_v1  ;;  %v3796_v7 = vmul.f32 %v8290_v2, %v3784_v0 }
0x12ba   :  { %3845 = vperm.xlu1 %8048, %v3807_v5   ;;  %3826 = vperm.xlu0 %8042, %v3796_v7   ;;  %v3804_v19 = vmul.f32 %v3796_v7, %v3764_v34 }
0x12bb   :  { %v8292_v4 = vpop.eup %8291 }
0x12bc   :  { %v3793_v9 = vmul.f32 %v8292_v4, %v3781_v8  ;;  %v3808_v22 = vsub.f32 %v3800_v21, %v3804_v19 }
0x12be   :  { %3811 = vperm.xlu0 %8042, %v3793_v9   ;;  %v3801_v15 = vmul.f32 %v3793_v9, %v3761_v37  ;;  %v8237_v9 = vld [vmem:[%s9960_s22 + $0x28] sm:$0xff]  }
0x12bf   :  { %v8294_v16 = vpop.eup %8293 }
0x12c0   :  { %v3805_v17 = vsub.f32 %v3797_v32, %v3801_v15  ;;  %v3794_v18 = vmul.f32 %v8294_v16, %v3782_v12 }
0x12c2   :  { %3835 = vperm.xlu0 %8042, %v3805_v17   ;;  %3816 = vperm.xlu1 %8048, %v3794_v18   ;;  %v3802_v23 = vmul.f32 %v3794_v18, %v3762_v47  ;;  %v8233_v47 = vld [vmem:[%s9961_s23 + $0x8] sm:$0xff]  }
0x12c4   :  { %v3806_v25 = vsub.f32 %v3798_v43, %v3802_v23 }
0x12c6   :  { %3850 = vperm.xlu1 %8048, %v3808_v22  }
0x12ca   :  { %3840 = vperm.xlu1 %8048, %v3806_v25  }
0x1331   :  { %v3822_v27 = vpop.permute.xlu1 %3821 }
0x1332   :  { %v3831_v33 = vmul.f32 %v3822_v27, %v9175_v6 }
0x1335   :  { %v3827_v28 = vpop.permute.xlu0 %3826  ;;  %v3846_v29 = vpop.permute.xlu1 %3845 }
0x1336   :  { %v3855_v34 = vadd.f32 %v3846_v29, %v3831_v33  ;;  %v3832_v62 = vmul.f32 %v3827_v28, %v9181_v13 }
0x1338   :  { %v3859_v36 = vmax.f32 %v3855_v34, 0.0 }
0x1339   :  { %v3812_v30 = vpop.permute.xlu0 %3811 }
0x133a   :  { %v3829_v53 = vmul.f32 %v3812_v30, %v9183_v14  ;;  %v8230_v14 = vld [vmem:[%s9960_s22 + $0x18] sm:$0xff]  }
0x133d   :  { %v3817_v31 = vpop.permute.xlu1 %3816  ;;  %v3836_v50 = vpop.permute.xlu0 %3835 }
0x133e   :  { %v3830_v37 = vmul.f32 %v3817_v31, %v9190_v20  ;;  %v3853_v38 = vadd.f32 %v3836_v50, %v3829_v53  ;;  %v8232_v20 = vld [vmem:[%s9961_s23] sm:$0xff]  }
0x1340   :  { %v3857_v45 = vmax.f32 %v3853_v38, 0.0 }
0x1341   :  { %v3851_v35 = vpop.permute.xlu1 %3850 }
0x1342   :  { %v3856_v3 = vadd.f32 %v3851_v35, %v3832_v62 }
0x1344   :  { %v3860_v39 = vmax.f32 %v3856_v3, 0.0 }
0x1345   :  { %v3841_v10 = vpop.permute.xlu1 %3840 }
0x1346   :  { %v3862_v41 = vpack.c.bf16 %v3860_v39, %v3859_v36  ;;  %v3854_v44 = vadd.f32 %v3841_v10, %v3830_v37 }
0x1348   :  { %v3858_v6 = vmax.f32 %v3854_v44, 0.0  ;;  %7807 = vmatprep.subr.bf16.mxu0 %v3862_v41  ;;  %v4442_v44 = vld [vmem:[%s9962_s26] sm:$0xff] }
0x1349   :  { %7808 = vmatpush3.bf16.msra.mxu0 %v3862_v41 }
0x134a   :  { %v3861_v13 = vpack.c.bf16 %v3858_v6, %v3857_v45  ;;  %v4443_v45 = vld [vmem:[%s9962_s26 + $0x8] sm:$0xff] }
0x134c   :  { %7803 = vmatprep.mubr.msk.bf16.mxu1 %vm2954_vm5, %v3861_v13  ;;  %7809 = vmatprep.subr.bf16.mxu0 %v3861_v13 }
0x134d   :  { %7804 = vmatmul.mubr.msk.bf16.vlgmr.msra.gmra.mxu1 %vm2954_vm5, %v3862_v41  ;;  %7810 = vmatpush3.bf16.msra.mxu0 %v3861_v13 }
0x134e   :  { %7823 = vmatprep.subr.bf16.mxu0 %v8231_v46  ;;  %7819 = vmatprep.mubr.msk.bf16.mxu1 %vm2817_vm4, %v8234_v48 }
0x1350   :  { %7812 = vmatmul.mubr.msk.bf16.vlgmr.msra.gmra.mxu0 %vm2817_vm4, %v8230_v14 }
0x1351   :  { %7824 = vmatpush3.bf16.msra.mxu0 %v8231_v46  ;;  %7825 = vmatprep.mubr.msk.bf16.mxu0 %vm2954_vm5, %v3861_v13 }
0x1352   :  { %7837 = vmatprep.subr.bf16.mxu0 %v9156_v40 }
0x1358   :  { %7826 = vmatmul.mubr.msk.bf16.vlgmr.msra.gmra.mxu0 %vm2954_vm5, %v3862_v41 }
0x1359   :  { %7838 = vmatpush3.bf16.msra.mxu0 %v9156_v40  ;;  %7839 = vmatprep.mubr.msk.bf16.mxu0 %vm2954_vm5, %v8232_v20 }
0x1360   :  { %7840 = vmatmul.mubr.msk.bf16.vlgmr.msra.gmra.mxu0 %vm2954_vm5, %v8233_v47 }
0x140d   :  { %v7805_v49 = vpop.f32.mrf.mxu1 }
0x140f   :  { %v3911_v51 = vpop.f32.mrf.mxu1 }
0x1410   :  { %v9233_v52 = vpop.f32.mrf.mxu0 }
0x1411   :  { %v7806_v54 = vpop.f32.mrf.mxu1 }
0x1412   :  { %v3931_v55 = vpack.c.bf16 %v7806_v54, %v7805_v49  ;;  %v9235_v56 = vpop.f32.mrf.mxu0 }
0x1413   :  { %v3914_v57 = vpop.f32.mrf.mxu1 }
0x1414   :  { %v3930_v40 = vpack.c.bf16 %v3914_v57, %v3911_v51  ;;  %v9237_v58 = vpop.f32.mrf.mxu0  ;;  %7815 = vmatprep.subr.bf16.mxu1 %v3931_v55 }
0x1415   :  { %7816 = vmatpush3.bf16.msra.mxu1 %v3931_v55 }
0x1416   :  { %v9239_v59 = vpop.f32.mrf.mxu0  ;;  %7817 = vmatprep.subr.bf16.mxu1 %v3930_v40 }
0x1418   :  { %v7827_v60 = vpop.f32.mrf.mxu0 }
0x1419   :  { %7818 = vmatpush3.bf16.msra.mxu1 %v3930_v40 }
0x141a   :  { %v4110_v42 = vpop.f32.mrf.mxu0 }
0x141c   :  { %7820 = vmatmul.mubr.msk.bf16.vlgmr.msra.gmra.mxu1 %vm2817_vm4, %v8235_v61  ;;  %v7828_v0 = vpop.f32.mrf.mxu0 }
0x141d   :  { %v4131_v1 = vpack.c.bf16 %v7828_v0, %v7827_v60  ;;  %7833 = vmatprep.mubr.msk.bf16.mxu1 %vm2817_vm4, %v8236_v63 }
0x141e   :  { %v4113_v2 = vpop.f32.mrf.mxu0 }
0x141f   :  { %v4130_v5 = vpack.c.bf16 %v4113_v2, %v4110_v42  ;;  %7829 = vmatprep.subr.bf16.mxu1 %v4131_v1 }
0x1420   :  { %7830 = vmatpush3.bf16.msra.mxu1 %v4131_v1  ;;  %v9245_v7 = vpop.f32.mrf.mxu0 }
0x1421   :  { %7831 = vmatprep.subr.bf16.mxu1 %v4130_v5  ;;  %v4400_v8 = vsel %vm2954_vm5, %v9245_v7, 0.0 }
0x1422   :  { %v9249_v4 = vpop.f32.mrf.mxu0  ;;  %4401 = vadd.xlane.f32.xlu1 %v4400_v8 }
0x1423   :  { %v4394_v32 = vsel %vm2954_vm5, %v9249_v4, 0.0  ;;  %v4406_v12 = vmul.f32 %v9249_v4, %v9249_v4 }
0x1424   :  { %7832 = vmatpush3.bf16.msra.mxu1 %v4130_v5  ;;  %4395 = vadd.xlane.f32.xlu0 %v4394_v32  ;;  %v9256_v15 = vpop.f32.mrf.mxu0 }
0x1425   :  { %v4403_v16 = vsel %vm2954_vm5, %v9256_v15, 0.0  ;;  %v4410_v17 = vsel %vm2954_vm5, %v4406_v12, 0.0  ;;  %v4408_v12 = vmul.f32 %v9245_v7, %v9245_v7 }
0x1426   :  { %v9261_v18 = vpop.f32.mrf.mxu0  ;;  %4411 = vadd.xlane.f32.xlu1 %v4410_v17  ;;  %v4409_v17 = vmul.f32 %v9256_v15, %v9256_v15 }
0x1427   :  { %7834 = vmatmul.mubr.msk.bf16.vlgmr.msra.gmra.mxu1 %vm2817_vm4, %v8237_v9  ;;  %v4397_v19 = vsel %vm2954_vm5, %v9261_v18, 0.0  ;;  %v4407_v21 = vmul.f32 %v9261_v18, %v9261_v18 }
0x1428   :  { %4404 = vadd.xlane.f32.xlu0 %v4403_v16 }
0x1429   :  { %v4413_v22 = vsel %vm2954_vm5, %v4407_v21, 0.0  ;;  %v4419_v21 = vsel %vm2954_vm5, %v4409_v17, 0.0 }
0x142c   :  { %4398 = vadd.xlane.f32.xlu0 %v4397_v19  ;;  %v4416_v19 = vsel %vm2954_vm5, %v4408_v12, 0.0  ;;  %v4445_v12 = vld [vmem:[%s9962_s26 + $0x18] sm:$0xff] }
0x1430   :  { %4414 = vadd.xlane.f32.xlu0 %v4413_v22 }
0x14ab   :  { %v9271_v24 = vpop.xlane.xlu1 %4401 }
0x14ad   :  { %v4396_v23 = vpop.xlane.xlu0 %4395 }
0x14ae   :  { %v4422_v26 = vmul.f32 0.0625, %v4396_v23 }
0x14af   :  { %v4412_v27 = vpop.xlane.xlu1 %4411 }
0x14b0   :  { %v4430_v30 = vmul.f32 %v4422_v26, %v4422_v26  ;;  %v4426_v31 = vmul.f32 0.0625, %v4412_v27 }
0x14b1   :  { %v9269_v43 = vpop.xlane.xlu0 %4404 }
0x14b2   :  { %v4434_v62 = vsub.f32 %v4426_v31, %v4430_v30 }
0x14b4   :  { %v4438_v35 = vmax.f32 %v4434_v62, 0.0 }
0x14b5   :  { %v4399_v25 = vpop.xlane.xlu0 %4398 }
0x14b6   :  { %v4423_v28 = vmul.f32 0.0625, %v4399_v25  ;;  %v4446_v3 = vadd.f32 1e-05, %v4438_v35 }
0x14b8   :  { %v4431_v33 = vmul.f32 %v4423_v28, %v4423_v28  ;;  %8295 = vrsqrt.f32 %v4446_v3  ;;  %v9329_v3 = vmul.f32 0.0625, %v9269_v43 }
0x14b9   :  { %v4415_v29 = vpop.xlane.xlu0 %4414 }
0x14ba   :  { %v4427_v34 = vmul.f32 0.0625, %v4415_v29  ;;  %v4433_v43 = vmul.f32 %v9329_v3, %v9329_v3 }
0x14bc   :  { %v4435_v50 = vsub.f32 %v4427_v34, %v4431_v33  ;;  %v9322_v34 = vmul.f32 0.0625, %v9271_v24 }
0x14be   :  { %v4439_v53 = vmax.f32 %v4435_v50, 0.0 }
0x14c0   :  { %v4447_v36 = vadd.f32 1e-05, %v4439_v53 }
0x14c2   :  { %8297 = vrsqrt.f32 %v4447_v36 }
0x14c5   :  { %v8296_v10 = vpop.eup %8295 }
0x14c6   :  { %v4454_v46 = vmul.f32 %v8296_v10, %v4442_v44 }
0x14c8   :  { %v9279_v49 = vmul.f32 %v4454_v46, %v4422_v26 }
0x14cf   :  { %v8298_v41 = vpop.eup %8297 }
0x14d0   :  { %v4455_v14 = vmul.f32 %v8298_v41, %v4443_v45 }
0x14d2   :  { %v9281_v51 = vmul.f32 %v4455_v14, %v4423_v28 }
0x14dc   :  { %v7821_v37 = vpop.f32.mrf.mxu1 }
0x14dd   :  { %v4061_v13 = vadd.f32 %v7821_v37, %v9233_v52 }
0x14de   :  { %v4052_v38 = vpop.f32.mrf.mxu1 }
0x14df   :  { %v4053_v47 = vadd.f32 %v4052_v38, %v9235_v56 }
0x14e0   :  { %v7822_v39 = vpop.f32.mrf.mxu1 }
0x14e1   :  { %v4064_v55 = vadd.f32 %v7822_v39, %v9237_v58  ;;  %v4432_v39 = vmul.f32 %v9322_v34, %v9322_v34 }
0x14e2   :  { %v4055_v6 = vpop.f32.mrf.mxu1 }
0x14e3   :  { %v4056_v42 = vadd.f32 %v4055_v6, %v9239_v59 }
0x14e7   :  { %v7835_v20 = vpop.f32.mrf.mxu1 }
0x14e8   :  { %v9277_v48 = vadd.f32 %v7835_v20, %v4061_v13 }
0x14e9   :  { %v4182_v54 = vpop.f32.mrf.mxu1 }
0x14ea   :  { %v9284_v57 = vadd.f32 %v4182_v54, %v4053_v47  ;;  %v4207_v40 = vsel %vm2954_vm5, %v9277_v48, 0.0  ;;  %v4215_v52 = vmul.f32 %v9277_v48, %v9277_v48 }
0x14eb   :  { %4208 = vadd.xlane.f32.xlu1 %v4207_v40  ;;  %v7836_v60 = vpop.f32.mrf.mxu1 }
0x14ec   :  { %v9290_v56 = vadd.f32 %v7836_v60, %v4064_v55  ;;  %v4201_v61 = vsel %vm2954_vm5, %v9284_v57, 0.0  ;;  %v4223_v58 = vsel %vm2954_vm5, %v4215_v52, 0.0  ;;  %v4213_v0 = vmul.f32 %v9284_v57, %v9284_v57 }
0x14ed   :  { %v4185_v63 = vpop.f32.mrf.mxu1  ;;  %4202 = vadd.xlane.f32.xlu0 %v4201_v61 }
0x14ee   :  { %v9298_v1 = vadd.f32 %v4185_v63, %v4056_v42  ;;  %v4210_v2 = vsel %vm2954_vm5, %v9290_v56, 0.0  ;;  %v4216_v5 = vmul.f32 %v9290_v56, %v9290_v56  ;;  %v4217_v8 = vsel %vm2954_vm5, %v4213_v0, 0.0 }
0x14ef   :  { %4224 = vadd.xlane.f32.xlu1 %v4223_v58 }
0x14f0   :  { %v4226_v59 = vsel %vm2954_vm5, %v4216_v5, 0.0  ;;  %v4214_v9 = vmul.f32 %v9298_v1, %v9298_v1  ;;  %v4204_v32 = vsel %vm2954_vm5, %v9298_v1, 0.0 }
0x14f1   :  { %4211 = vadd.xlane.f32.xlu0 %v4210_v2 }
0x14f2   :  { %v4220_v16 = vsel %vm2954_vm5, %v4214_v9, 0.0  ;;  %v4444_v9 = vld [vmem:[%s9962_s26 + $0x10] sm:$0xff] }
0x14f3   :  { %4218 = vadd.xlane.f32.xlu1 %v4217_v8 }
0x14f5   :  { %4227 = vadd.xlane.f32.xlu0 %v4226_v59 }
0x14f7   :  { %4205 = vadd.xlane.f32.xlu1 %v4204_v32 }
0x14f9   :  { %4221 = vadd.xlane.f32.xlu0 %v4220_v16 }
0x14fb   :  { %4417 = vadd.xlane.f32.xlu1 %v4416_v19 }
0x14fd   :  { %4420 = vadd.xlane.f32.xlu0 %v4419_v21  ;;  %v4458_v21 = vld [vmem:[%s9963_s28] sm:$0xff] }
0x150c   :  { %4472 = vperm.xlu1 %8048, %v4454_v46  }
0x1510   :  { %4477 = vperm.xlu1 %8048, %v4455_v14  }
0x1574   :  { %v4209_v22 = vpop.xlane.xlu1 %4208 }
0x1575   :  { %v9317_v27 = vmul.f32 0.0625, %v4209_v22  ;;  %v4251_v22 = vld [vmem:[%s9964_s1 + $0x10] sm:$0xff] }
0x1576   :  { %v4203_v23 = vpop.xlane.xlu0 %4202 }
0x1577   :  { %v4239_v31 = vmul.f32 %v9317_v27, %v9317_v27  ;;  %v9324_v62 = vmul.f32 0.0625, %v4203_v23 }
0x1578   :  { %v4225_v25 = vpop.xlane.xlu1 %4224 }
0x1579   :  { %v4235_v29 = vmul.f32 0.0625, %v4225_v25  ;;  %v4237_v24 = vmul.f32 %v9324_v62, %v9324_v62  ;;  %v4459_v25 = vld [vmem:[%s9963_s28 + $0x8] sm:$0xff] }
0x157a   :  { %v4212_v26 = vpop.xlane.xlu0 %4211 }
0x157b   :  { %v4243_v50 = vsub.f32 %v4235_v29, %v4239_v31  ;;  %v9326_v35 = vmul.f32 0.0625, %v4212_v26  ;;  %v4466_v26 = vsub.f32 %v4458_v21, %v9279_v49  ;;  %v4250_v49 = vld [vmem:[%s9964_s1 + $0x8] sm:$0xff] }
0x157c   :  { %v4219_v28 = vpop.xlane.xlu1 %4218 }
0x157d   :  { %v4233_v36 = vmul.f32 0.0625, %v4219_v28  ;;  %v4247_v44 = vmax.f32 %v4243_v50, 0.0  ;;  %v4240_v45 = vmul.f32 %v9326_v35, %v9326_v35  ;;  %v4252_v50 = vld [vmem:[%s9964_s1 + $0x18] sm:$0xff] }
0x157e   :  { %v4228_v30 = vpop.xlane.xlu0 %4227 }
0x157f   :  { %v4236_v37 = vmul.f32 0.0625, %v4228_v30  ;;  %v4241_v14 = vsub.f32 %v4233_v36, %v4237_v24  ;;  %v4255_v52 = vadd.f32 1e-05, %v4247_v44  ;;  %v4467_v30 = vsub.f32 %v4459_v25, %v9281_v51  ;;  %v4267_v36 = vld [vmem:[%s9965_s2 + $0x10] sm:$0xff]  ;;  %v4268_v44 = vld [vmem:[%s9965_s2 + $0x18] sm:$0xff] }
0x1580   :  { %v4206_v33 = vpop.xlane.xlu1 %4205 }
0x1581   :  { %v9333_v10 = vmul.f32 0.0625, %v4206_v33  ;;  %v4244_v20 = vsub.f32 %v4236_v37, %v4240_v45  ;;  %v4245_v63 = vmax.f32 %v4241_v14, 0.0  ;;  %v4249_v33 = vld [vmem:[%s9964_s1] sm:$0xff] }
0x1582   :  { %v4222_v53 = vpop.xlane.xlu0 %4221 }
0x1583   :  { %v4238_v47 = vmul.f32 %v9333_v10, %v9333_v10  ;;  %v4234_v54 = vmul.f32 0.0625, %v4222_v53  ;;  %v4248_v42 = vmax.f32 %v4244_v20, 0.0  ;;  %v4253_v2 = vadd.f32 1e-05, %v4245_v63  ;;  %v4460_v20 = vld [vmem:[%s9963_s28 + $0x10] sm:$0xff] }
0x1584   :  { %v4418_v38 = vpop.xlane.xlu1 %4417 }
0x1585   :  { %v4428_v41 = vmul.f32 0.0625, %v4418_v38  ;;  %v4242_v58 = vsub.f32 %v4234_v54, %v4238_v47  ;;  %v4256_v5 = vadd.f32 1e-05, %v4248_v42  ;;  %v4461_v54 = vld [vmem:[%s9963_s28 + $0x18] sm:$0xff] }
0x1586   :  { %v4421_v6 = vpop.xlane.xlu0 %4420 }
0x1587   :  { %v4436_v13 = vsub.f32 %v4428_v41, %v4432_v39  ;;  %v4429_v46 = vmul.f32 0.0625, %v4421_v6  ;;  %v4246_v8 = vmax.f32 %v4242_v58, 0.0 }
0x1589   :  { %v4440_v55 = vmax.f32 %v4436_v13, 0.0  ;;  %v4437_v40 = vsub.f32 %v4429_v46, %v4433_v43  ;;  %v4254_v59 = vadd.f32 1e-05, %v4246_v8  ;;  %v4266_v13 = vld [vmem:[%s9965_s2 + $0x8] sm:$0xff] }
0x158b   :  { %v4448_v60 = vadd.f32 1e-05, %v4440_v55  ;;  %v4441_v61 = vmax.f32 %v4437_v40, 0.0  ;;  %v8238_v40 = vld [vmem:[%s9966_s7] sm:$0xff]  }
0x158c   :  { %7843 = vmatprep.subr.bf16.mxu1 %v8238_v40 }
0x158d   :  { %8299 = vrsqrt.f32 %v4448_v60  ;;  %v4449_v0 = vadd.f32 1e-05, %v4441_v61  ;;  %7844 = vmatpush3.bf16.msra.mxu1 %v8238_v40  ;;  %v8246_v40 = vld [vmem:[%s9967_s10 + $0x38] sm:$0xff]  }
0x158e   :  { %8301 = vrsqrt.f32 %v4255_v52  ;;  %v8239_v52 = vld [vmem:[%s9966_s7 + $0x8] sm:$0xff]  }
0x158f   :  { %8303 = vrsqrt.f32 %v4449_v0  ;;  %7849 = vmatprep.subr.bf16.mxu0 %v8239_v52 }
0x1590   :  { %8305 = vrsqrt.f32 %v4253_v2  ;;  %7850 = vmatpush3.bf16.msra.mxu0 %v8239_v52  ;;  %v8247_v52 = vld [vmem:[%s9967_s10 + $0x18] sm:$0xff]  }
0x1591   :  { %8307 = vrsqrt.f32 %v4256_v5 }
0x1592   :  { %8309 = vrsqrt.f32 %v4254_v59 }
0x159a   :  { %v8300_v32 = vpop.eup %8299 }
0x159b   :  { %v8302_v16 = vpop.eup %8301  ;;  %v4456_v17 = vmul.f32 %v8300_v32, %v4444_v9 }
0x159c   :  { %v8304_v19 = vpop.eup %8303  ;;  %v4263_v28 = vmul.f32 %v8302_v16, %v4251_v22 }
0x159d   :  { %4482 = vperm.xlu0 %8042, %v4456_v17   ;;  %v4457_v23 = vmul.f32 %v8304_v19, %v4445_v12  ;;  %v8306_v29 = vpop.eup %8305  ;;  %v4464_v14 = vmul.f32 %v4456_v17, %v9322_v34 }
0x159e   :  { %v8308_v31 = vpop.eup %8307  ;;  %v4271_v53 = vmul.f32 %v4263_v28, %v9317_v27  ;;  %v4261_v37 = vmul.f32 %v8306_v29, %v4249_v33  ;;  %v4265_v27 = vld [vmem:[%s9965_s2] sm:$0xff] }
0x159f   :  { %4487 = vperm.xlu1 %8048, %v4457_v23   ;;  %v4264_v38 = vmul.f32 %v8308_v31, %v4252_v50  ;;  %v8310_v39 = vpop.eup %8309  ;;  %v4465_v47 = vmul.f32 %v4457_v23, %v9329_v3 }
0x15a0   :  { %v4275_v41 = vsub.f32 %v4267_v36, %v4271_v53  ;;  %v4262_v51 = vmul.f32 %v8310_v39, %v4250_v49  ;;  %v4269_v45 = vmul.f32 %v4261_v37, %v9324_v62  ;;  %v4468_v62 = vsub.f32 %v4460_v20, %v4464_v14  ;;  %v8241_v49 = vld [vmem:[%s9967_s10] sm:$0xff]  }
0x15a1   :  { %4496 = vperm.xlu0 %8042, %v4466_v26   ;;  %v4272_v24 = vmul.f32 %v4264_v38, %v9326_v35  ;;  %v4469_v55 = vsub.f32 %v4461_v54, %v4465_v47  ;;  %v8242_v47 = vld [vmem:[%s9967_s10 + $0x28] sm:$0xff]  }
0x15a2   :  { %v4270_v43 = vmul.f32 %v4262_v51, %v9333_v10  ;;  %v4273_v46 = vsub.f32 %v4265_v27, %v4269_v45  ;;  %v4473_v10 = vpop.permute.xlu1 %4472  ;;  %v8243_v54 = vld [vmem:[%s9967_s10 + $0x8] sm:$0xff]  }
0x15a3   :  { %4501 = vperm.xlu1 %8048, %v4467_v30   ;;  %v4276_v6 = vsub.f32 %v4268_v44, %v4272_v24  ;;  %v4490_v59 = vmul.f32 %v4473_v10, %v9249_v4  ;;  %v8249_v10 = vld [vmem:[%s9967_s10 + $0x40] sm:$0xff]  }
0x15a4   :  { %v4274_v35 = vsub.f32 %v4266_v13, %v4270_v43 }
0x15a5   :  { %4289 = vperm.xlu0 %8042, %v4263_v28  }
0x15a6   :  { %v4478_v60 = vpop.permute.xlu1 %4477 }
0x15a7   :  { %4279 = vperm.xlu1 %8048, %v4261_v37   ;;  %v4491_v12 = vmul.f32 %v4478_v60, %v9261_v18 }
0x15a9   :  { %4313 = vperm.xlu0 %8042, %v4275_v41  }
0x15ab   :  { %4294 = vperm.xlu1 %8048, %v4264_v38  }
0x15ad   :  { %4284 = vperm.xlu0 %8042, %v4262_v51  }
0x15af   :  { %4318 = vperm.xlu1 %8048, %v4276_v6  }
0x15b1   :  { %4303 = vperm.xlu0 %8042, %v4273_v46  }
0x15b3   :  { %4308 = vperm.xlu1 %8048, %v4274_v35   ;;  %v8248_v35 = vld [vmem:[%s9966_s7 + $0x10] sm:$0xff]  }
0x15b5   :  { %4506 = vperm.xlu0 %8042, %v4468_v62   ;;  %v8244_v62 = vld [vmem:[%s9967_s10 + $0x30] sm:$0xff]  }
0x15b7   :  { %4511 = vperm.xlu1 %8048, %v4469_v55   ;;  %v8245_v55 = vld [vmem:[%s9967_s10 + $0x10] sm:$0xff]  }
0x1618   :  { %v4483_v34 = vpop.permute.xlu0 %4482 }
0x1619   :  { %v4492_v21 = vmul.f32 %v9245_v7, %v4483_v34 }
0x161a   :  { %v4488_v61 = vpop.permute.xlu1 %4487 }
0x161c   :  { %v4497_v63 = vpop.permute.xlu0 %4496 }
0x161d   :  { %v4514_v16 = vadd.f32 %v4497_v63, %v4490_v59 }
0x161e   :  { %v4502_v42 = vpop.permute.xlu1 %4501 }
0x161f   :  { %v4515_v23 = vadd.f32 %v4502_v42, %v4491_v12  ;;  %v8250_v12 = vld [vmem:[%s9967_s10 + $0x48] sm:$0xff]  }
0x1620   :  { %v4290_v58 = vpop.permute.xlu0 %4289 }
0x1621   :  { %v4299_v25 = vmul.f32 %v4290_v58, %v9277_v48 }
0x1622   :  { %v4280_v3 = vpop.permute.xlu1 %4279 }
0x1623   :  { %v4297_v9 = vmul.f32 %v4280_v3, %v9284_v57  ;;  %v4493_v57 = vmul.f32 %v9256_v15, %v4488_v61 }
0x1624   :  { %v4314_v0 = vpop.permute.xlu0 %4313 }
0x1625   :  { %v4323_v30 = vadd.f32 %v4314_v0, %v4299_v25 }
0x1626   :  { %v4295_v2 = vpop.permute.xlu1 %4294 }
0x1627   :  { %v4300_v29 = vmul.f32 %v4295_v2, %v9290_v56  ;;  %v8240_v56 = vld [vmem:[%s9967_s10 + $0x20] sm:$0xff]  }
0x1628   :  { %v4285_v5 = vpop.permute.xlu0 %4284 }
0x1629   :  { %v4298_v17 = vmul.f32 %v4285_v5, %v9298_v1 }
0x162a   :  { %v4319_v8 = vpop.permute.xlu1 %4318 }
0x162b   :  { %v4324_v33 = vadd.f32 %v4319_v8, %v4300_v29 }
0x162c   :  { %v4304_v32 = vpop.permute.xlu0 %4303 }
0x162d   :  { %v4321_v19 = vadd.f32 %v4304_v32, %v4297_v9 }
0x162e   :  { %v4309_v22 = vpop.permute.xlu1 %4308 }
0x162f   :  { %v4518_v26 = vadd.f32 %v4514_v16, %v4321_v19  ;;  %v4322_v28 = vadd.f32 %v4309_v22, %v4298_v17  ;;  %v8251_v16 = vld [vmem:[%s9967_s10 + $0x50] sm:$0xff]   ;;  %v8252_v17 = vld [vmem:[%s9967_s10 + $0x58] sm:$0xff]  }
0x1630   :  { %v4507_v4 = vpop.permute.xlu0 %4506 }
0x1631   :  { %v4519_v31 = vadd.f32 %v4515_v23, %v4322_v28  ;;  %v4516_v18 = vadd.f32 %v4507_v4, %v4492_v21  ;;  %v4522_v50 = vmax.f32 %v4518_v26, 0.0 }
0x1632   :  { %v4512_v1 = vpop.permute.xlu1 %4511 }
0x1633   :  { %v4523_v7 = vmax.f32 %v4519_v31, 0.0  ;;  %v4520_v53 = vadd.f32 %v4516_v18, %v4323_v30  ;;  %v4517_v36 = vadd.f32 %v4512_v1, %v4493_v57 }
0x1635   :  { %v4526_v37 = vpack.c.bf16 %v4523_v7, %v4522_v50  ;;  %v4521_v48 = vadd.f32 %v4517_v36, %v4324_v33  ;;  %v4524_v38 = vmax.f32 %v4520_v53, 0.0 }
0x1637   :  { %v4525_v39 = vmax.f32 %v4521_v48, 0.0  ;;  %7845 = vmatprep.mubr.msk.bf16.mxu1 %vm2954_vm5, %v4526_v37  ;;  %7851 = vmatprep.mubr.msk.bf16.mxu0 %vm2954_vm5, %v4526_v37 }
0x1639   :  { %v4527_v15 = vpack.c.bf16 %v4525_v39, %v4524_v38 }
0x163b   :  { %7846 = vmatmul.mubr.msk.bf16.vlgmr.msra.gmra.mxu1 %vm2954_vm5, %v4527_v15  ;;  %7852 = vmatmul.mubr.msk.bf16.vlgmr.msra.gmra.mxu0 %vm2954_vm5, %v4527_v15 }
0x163c   :  { %7859 = vmatprep.mubr.msk.bf16.mxu1 %vm2817_vm4, %v8240_v56  ;;  %7871 = vmatprep.mubr.msk.bf16.mxu0 %vm2817_vm4, %v8241_v49 }
0x16fb   :  { %v7847_v41 = vpop.f32.mrf.mxu1  ;;  %v7853_v51 = vpop.f32.mrf.mxu0 }
0x16fd   :  { %v4576_v24 = vpop.f32.mrf.mxu1  ;;  %v4644_v44 = vpop.f32.mrf.mxu0 }
0x16ff   :  { %v7848_v45 = vpop.f32.mrf.mxu1  ;;  %v7854_v27 = vpop.f32.mrf.mxu0 }
0x1700   :  { %v4600_v6 = vpack.c.bf16 %v7848_v45, %v7847_v41  ;;  %v9383_v43 = vpack.c.bf16 %v7854_v27, %v7853_v51 }
0x1701   :  { %v4579_v13 = vpop.f32.mrf.mxu1  ;;  %v4647_v46 = vpop.f32.mrf.mxu0 }
0x1702   :  { %v4599_v14 = vpack.c.bf16 %v4579_v13, %v4576_v24  ;;  %v9385_v20 = vpack.c.bf16 %v4647_v46, %v4644_v44  ;;  %7855 = vmatprep.subr.bf16.mxu1 %v9383_v43  ;;  %7867 = vmatprep.subr.bf16.mxu0 %v4600_v6 }
0x1703   :  { %7856 = vmatpush3.bf16.msra.mxu1 %v9383_v43  ;;  %7868 = vmatpush3.bf16.msra.mxu0 %v4600_v6 }
0x1704   :  { %7857 = vmatprep.subr.bf16.mxu1 %v9385_v20  ;;  %7869 = vmatprep.subr.bf16.mxu0 %v4599_v14 }
0x1707   :  { %7858 = vmatpush3.bf16.msra.mxu1 %v9385_v20  ;;  %7870 = vmatpush3.bf16.msra.mxu0 %v4599_v14 }
0x1708   :  { %7879 = vmatprep.subr.bf16.mxu1 %v8248_v35 }
0x170a   :  { %7860 = vmatmul.mubr.msk.bf16.vlgmr.msra.gmra.mxu1 %vm2817_vm4, %v8242_v47  ;;  %7872 = vmatmul.mubr.msk.bf16.vlgmr.msra.gmra.mxu0 %vm2817_vm4, %v8243_v54 }
0x170b   :  { %7863 = vmatprep.mubr.msk.bf16.mxu1 %vm2817_vm4, %v8244_v62  ;;  %7875 = vmatprep.mubr.msk.bf16.mxu0 %vm2817_vm4, %v8245_v55 }
0x170c   :  { %7880 = vmatpush3.bf16.msra.mxu1 %v8248_v35 }
0x1712   :  { %7864 = vmatmul.mubr.msk.bf16.gmra.mxu1 %vm2817_vm4, %v8246_v40  ;;  %7876 = vmatmul.mubr.msk.bf16.gmra.mxu0 %vm2817_vm4, %v8247_v52 }
0x1713   :  { %7881 = vmatprep.mubr.msk.bf16.mxu1 %vm2954_vm5, %v4526_v37  ;;  %7889 = vmatprep.mubr.msk.bf16.mxu0 %vm2817_vm4, %v8249_v10 }
0x171a   :  { %7882 = vmatmul.mubr.msk.bf16.vlgmr.msra.gmra.mxu1 %vm2954_vm5, %v4527_v15 }
0x17ca   :  { %v7861_v60 = vpop.f32.mrf.mxu1  ;;  %v7873_v19 = vpop.f32.mrf.mxu0 }
0x17cb   :  { %v4842_v4 = vadd.f32 %v7873_v19, %v7861_v60 }
0x17cc   :  { %v9408_v34 = vpop.f32.mrf.mxu1  ;;  %v4833_v21 = vpop.f32.mrf.mxu0 }
0x17cd   :  { %v4834_v55 = vadd.f32 %v4833_v21, %v9408_v34 }
0x17ce   :  { %v7862_v61 = vpop.f32.mrf.mxu1  ;;  %v7874_v22 = vpop.f32.mrf.mxu0 }
0x17cf   :  { %v4845_v18 = vadd.f32 %v7874_v22, %v7862_v61 }
0x17d0   :  { %v9410_v63 = vpop.f32.mrf.mxu1  ;;  %v4836_v23 = vpop.f32.mrf.mxu0 }
0x17d2   :  { %v7865_v42 = vpop.f32.mrf.mxu1  ;;  %v7877_v25 = vpop.f32.mrf.mxu0 }
0x17d3   :  { %v4858_v53 = vadd.f32 %v7877_v25, %v7865_v42 }
0x17d4   :  { %v4752_v58 = vpop.f32.mrf.mxu1  ;;  %v4849_v26 = vpop.f32.mrf.mxu0 }
0x17d5   :  { %v4850_v48 = vadd.f32 %v4849_v26, %v4752_v58  ;;  %v4837_v58 = vadd.f32 %v4836_v23, %v9410_v63 }
0x17d6   :  { %v7866_v3 = vpop.f32.mrf.mxu1  ;;  %v7878_v28 = vpop.f32.mrf.mxu0 }
0x17d7   :  { %v4861_v15 = vadd.f32 %v7878_v28, %v7866_v3 }
0x17d8   :  { %v4755_v0 = vpop.f32.mrf.mxu1  ;;  %v4852_v29 = vpop.f32.mrf.mxu0 }
0x17d9   :  { %v4853_v47 = vadd.f32 %v4852_v29, %v4755_v0 }
0x17da   :  { %v7883_v2 = vpop.f32.mrf.mxu1 }
0x17dc   :  { %v4907_v5 = vpop.f32.mrf.mxu1 }
0x17de   :  { %v7884_v8 = vpop.f32.mrf.mxu1 }
0x17df   :  { %v4932_v59 = vpack.c.bf16 %v7884_v8, %v7883_v2 }
0x17e0   :  { %v4910_v9 = vpop.f32.mrf.mxu1 }
0x17e1   :  { %v4931_v32 = vpack.c.bf16 %v4910_v9, %v4907_v5  ;;  %7885 = vmatprep.subr.bf16.mxu0 %v4932_v59 }
0x17e2   :  { %7886 = vmatpush3.bf16.msra.mxu0 %v4932_v59 }
0x17e3   :  { %7887 = vmatprep.subr.bf16.mxu0 %v4931_v32 }
0x17e6   :  { %7888 = vmatpush3.bf16.msra.mxu0 %v4931_v32 }
0x17e9   :  { %7890 = vmatmul.mubr.msk.bf16.vlgmr.msra.gmra.mxu0 %vm2817_vm4, %v8250_v12 }
0x17ea   :  { %7893 = vmatprep.mubr.msk.bf16.mxu0 %vm2817_vm4, %v8251_v16 }
0x17f1   :  { %7894 = vmatmul.mubr.msk.bf16.gmra.mxu0 %vm2817_vm4, %v8252_v17 }
0x18a9   :  { %v7891_v57 = vpop.f32.mrf.mxu0 }
0x18aa   :  { %v9418_v30 = vadd.f32 %v7891_v57, %v4842_v4 }
0x18ab   :  { %v4999_v31 = vpop.f32.mrf.mxu0 }
0x18ac   :  { %v5044_v33 = vsel %vm1916_vm3, %v9418_v30, 0.0  ;;  %v5064_v13 = vmul.f32 %v9418_v30, %v9418_v30  ;;  %v9455_v10 = vadd.f32 %v4999_v31, %v4834_v55 }
0x18ad   :  { %5045 = vadd.xlane.f32.xlu1 %v5044_v33  ;;  %v7892_v1 = vpop.f32.mrf.mxu0 }
0x18ae   :  { %v9422_v50 = vadd.f32 %v7892_v1, %v4845_v18  ;;  %v5076_v54 = vsel %vm1916_vm3, %v5064_v13, 0.0  ;;  %v5038_v34 = vsel %vm1916_vm3, %v9455_v10, 0.0  ;;  %v5062_v3 = vmul.f32 %v9455_v10, %v9455_v10 }
0x18af   :  { %v5002_v7 = vpop.f32.mrf.mxu0 }
0x18b0   :  { %v5047_v36 = vsel %vm1916_vm3, %v9422_v50, 0.0  ;;  %v5065_v27 = vmul.f32 %v9422_v50, %v9422_v50  ;;  %v9467_v0 = vadd.f32 %v5002_v7, %v4837_v58  ;;  %v5070_v5 = vsel %vm1916_vm3, %v5062_v3, 0.0 }
0x18b1   :  { %5048 = vadd.xlane.f32.xlu0 %v5047_v36  ;;  %v7895_v37 = vpop.f32.mrf.mxu0 }
0x18b2   :  { %v9426_v38 = vadd.f32 %v7895_v37, %v4858_v53  ;;  %v5079_v46 = vsel %vm1916_vm3, %v5065_v27, 0.0  ;;  %v5041_v8 = vsel %vm1916_vm3, %v9467_v0, 0.0  ;;  %v5063_v63 = vmul.f32 %v9467_v0, %v9467_v0 }
0x18b3   :  { %v5015_v39 = vpop.f32.mrf.mxu0 }
0x18b4   :  { %v9428_v56 = vadd.f32 %v5015_v39, %v4850_v48  ;;  %v5056_v49 = vsel %vm1916_vm3, %v9426_v38, 0.0  ;;  %v5068_v41 = vmul.f32 %v9426_v38, %v9426_v38  ;;  %v5073_v59 = vsel %vm1916_vm3, %v5063_v63, 0.0 }
0x18b5   :  { %5057 = vadd.xlane.f32.xlu0 %v5056_v49  ;;  %v7896_v51 = vpop.f32.mrf.mxu0 }
0x18b6   :  { %v9434_v24 = vadd.f32 %v7896_v51, %v4861_v15  ;;  %v5050_v44 = vsel %vm1916_vm3, %v9428_v56, 0.0  ;;  %v5088_v45 = vsel %vm1916_vm3, %v5068_v41, 0.0  ;;  %v5066_v62 = vmul.f32 %v9428_v56, %v9428_v56 }
0x18b7   :  { %5051 = vadd.xlane.f32.xlu1 %v5050_v44  ;;  %v5018_v35 = vpop.f32.mrf.mxu0 }
0x18b8   :  { %v5059_v6 = vsel %vm1916_vm3, %v9434_v24, 0.0  ;;  %v5069_v14 = vmul.f32 %v9434_v24, %v9434_v24  ;;  %v9452_v40 = vadd.f32 %v5018_v35, %v4853_v47  ;;  %v5082_v60 = vsel %vm1916_vm3, %v5066_v62, 0.0 }
0x18b9   :  { %5089 = vadd.xlane.f32.xlu0 %v5088_v45 }
0x18ba   :  { %v5091_v52 = vsel %vm1916_vm3, %v5069_v14, 0.0  ;;  %v5053_v61 = vsel %vm1916_vm3, %v9452_v40, 0.0  ;;  %v5067_v42 = vmul.f32 %v9452_v40, %v9452_v40 }
0x18bb   :  { %5060 = vadd.xlane.f32.xlu1 %v5059_v6 }
0x18bc   :  { %v5085_v2 = vsel %vm1916_vm3, %v5067_v42, 0.0 }
0x18bd   :  { %5080 = vadd.xlane.f32.xlu0 %v5079_v46 }
0x18bf   :  { %5077 = vadd.xlane.f32.xlu1 %v5076_v54 }
0x18c1   :  { %5092 = vadd.xlane.f32.xlu0 %v5091_v52 }
0x18c3   :  { %5083 = vadd.xlane.f32.xlu1 %v5082_v60 }
0x18c5   :  { %5054 = vadd.xlane.f32.xlu0 %v5053_v61 }
0x18c7   :  { %5039 = vadd.xlane.f32.xlu1 %v5038_v34 }
0x18c9   :  { %5086 = vadd.xlane.f32.xlu0 %v5085_v2 }
0x18cb   :  { %5071 = vadd.xlane.f32.xlu1 %v5070_v5 }
0x18cd   :  { %5042 = vadd.xlane.f32.xlu0 %v5041_v8 }
0x18d1   :  { %5074 = vadd.xlane.f32.xlu0 %v5073_v59 }
0x1936   :  { %v5046_v32 = vpop.xlane.xlu1 %5045 }
0x1937   :  { %v9482_v26 = vmul.f32 0.125, %v5046_v32 }
0x1939   :  { %v5112_v7 = vmul.f32 %v9482_v26, %v9482_v26 }
0x193a   :  { %v5049_v9 = vpop.xlane.xlu0 %5048 }
0x193b   :  { %v9478_v21 = vmul.f32 0.125, %v5049_v9 }
0x193d   :  { %v5113_v4 = vmul.f32 %v9478_v21, %v9478_v21 }
0x193e   :  { %v5058_v12 = vpop.xlane.xlu0 %5057 }
0x193f   :  { %v9476_v16 = vmul.f32 0.125, %v5058_v12 }
0x1940   :  { %v5052_v17 = vpop.xlane.xlu1 %5051 }
0x1941   :  { %v5116_v22 = vmul.f32 %v9476_v16, %v9476_v16  ;;  %v9488_v18 = vmul.f32 0.125, %v5052_v17 }
0x1942   :  { %v5090_v19 = vpop.xlane.xlu0 %5089 }
0x1943   :  { %v5108_v23 = vmul.f32 0.125, %v5090_v19  ;;  %v5114_v41 = vmul.f32 %v9488_v18, %v9488_v18 }
0x1944   :  { %v5061_v25 = vpop.xlane.xlu1 %5060 }
0x1945   :  { %v5124_v28 = vsub.f32 %v5108_v23, %v5116_v22  ;;  %v9486_v57 = vmul.f32 0.125, %v5061_v25  ;;  %v5137_v22 = vld [vmem:[%s9968_s11 + $0x18] sm:$0xff] }
0x1946   :  { %v5081_v29 = vpop.xlane.xlu0 %5080 }
0x1947   :  { %v5105_v31 = vmul.f32 0.125, %v5081_v29  ;;  %v5132_v33 = vmax.f32 %v5124_v28, 0.0  ;;  %v5117_v48 = vmul.f32 %v9486_v57, %v9486_v57 }
0x1948   :  { %v5078_v1 = vpop.xlane.xlu1 %5077 }
0x1949   :  { %v5121_v53 = vsub.f32 %v5105_v31, %v5113_v4  ;;  %v5104_v36 = vmul.f32 0.125, %v5078_v1  ;;  %v5148_v51 = vadd.f32 1e-05, %v5132_v33  ;;  %v5136_v4 = vld [vmem:[%s9968_s11 + $0x10] sm:$0xff] }
0x194a   :  { %v5093_v37 = vpop.xlane.xlu0 %5092 }
0x194b   :  { %v5129_v39 = vmax.f32 %v5121_v53, 0.0  ;;  %v5120_v15 = vsub.f32 %v5104_v36, %v5112_v7  ;;  %v5109_v49 = vmul.f32 0.125, %v5093_v37  ;;  %v5140_v53 = vld [vmem:[%s9968_s11 + $0x30] sm:$0xff] }
0x194c   :  { %v5084_v44 = vpop.xlane.xlu1 %5083 }
0x194d   :  { %v5145_v45 = vadd.f32 1e-05, %v5129_v39  ;;  %v5128_v27 = vmax.f32 %v5120_v15, 0.0  ;;  %v5125_v6 = vsub.f32 %v5109_v49, %v5117_v48  ;;  %v5106_v13 = vmul.f32 0.125, %v5084_v44  ;;  %v5138_v48 = vld [vmem:[%s9968_s11 + $0x20] sm:$0xff] }
0x194e   :  { %v5055_v46 = vpop.xlane.xlu0 %5054 }
0x194f   :  { %8311 = vrsqrt.f32 %v5145_v45  ;;  %v5144_v14 = vadd.f32 1e-05, %v5128_v27  ;;  %v5133_v35 = vmax.f32 %v5125_v6, 0.0  ;;  %v5122_v47 = vsub.f32 %v5106_v13, %v5114_v41  ;;  %v5141_v27 = vld [vmem:[%s9968_s11 + $0x38] sm:$0xff] }
0x1950   :  { %8313 = vrsqrt.f32 %v5148_v51  ;;  %v9496_v54 = vmul.f32 0.125, %v5055_v46  ;;  %v5040_v62 = vpop.xlane.xlu1 %5039  ;;  %v5169_v51 = vld [vmem:[%s9969_s15 + $0x18] sm:$0xff]  ;;  %v5172_v46 = vld [vmem:[%s9969_s15 + $0x30] sm:$0xff] }
0x1951   :  { %8315 = vrsqrt.f32 %v5144_v14  ;;  %v5130_v55 = vmax.f32 %v5122_v47, 0.0  ;;  %v9498_v52 = vmul.f32 0.125, %v5040_v62  ;;  %v5149_v61 = vadd.f32 1e-05, %v5133_v35  ;;  %v5168_v35 = vld [vmem:[%s9969_s15 + $0x10] sm:$0xff] }
0x1952   :  { %v5087_v60 = vpop.xlane.xlu0 %5086  ;;  %v5115_v58 = vmul.f32 %v9496_v54, %v9496_v54 }
0x1953   :  { %v5146_v42 = vadd.f32 1e-05, %v5130_v55  ;;  %v5107_v34 = vmul.f32 0.125, %v5087_v60  ;;  %v5110_v2 = vmul.f32 %v9498_v52, %v9498_v52  ;;  %v5139_v55 = vld [vmem:[%s9968_s11 + $0x28] sm:$0xff] }
0x1954   :  { %v5072_v3 = vpop.xlane.xlu1 %5071 }
0x1955   :  { %8317 = vrsqrt.f32 %v5146_v42  ;;  %v5123_v5 = vsub.f32 %v5107_v34, %v5115_v58  ;;  %v5102_v8 = vmul.f32 0.125, %v5072_v3  ;;  %v5170_v58 = vld [vmem:[%s9969_s15 + $0x20] sm:$0xff] }
0x1956   :  { %v5043_v63 = vpop.xlane.xlu0 %5042  ;;  %8319 = vrsqrt.f32 %v5149_v61 }
0x1957   :  { %v5131_v59 = vmax.f32 %v5123_v5, 0.0  ;;  %v5118_v9 = vsub.f32 %v5102_v8, %v5110_v2  ;;  %v9504_v32 = vmul.f32 0.125, %v5043_v63 }
0x1959   :  { %v5147_v12 = vadd.f32 1e-05, %v5131_v59  ;;  %v5126_v17 = vmax.f32 %v5118_v9, 0.0  ;;  %v5111_v25 = vmul.f32 %v9504_v32, %v9504_v32  ;;  %v5135_v9 = vld [vmem:[%s9968_s11 + $0x8] sm:$0xff] }
0x195a   :  { %v5075_v19 = vpop.xlane.xlu0 %5074 }
0x195b   :  { %v5142_v23 = vadd.f32 1e-05, %v5126_v17  ;;  %v5103_v28 = vmul.f32 0.125, %v5075_v19  ;;  %8321 = vrsqrt.f32 %v5147_v12  ;;  %v5166_v17 = vld [vmem:[%s9969_s15] sm:$0xff] }
0x195c   :  { %v8312_v29 = vpop.eup %8311 }
0x195d   :  { %v8314_v31 = vpop.eup %8313  ;;  %v5119_v33 = vsub.f32 %v5103_v28, %v5111_v25  ;;  %v5161_v1 = vmul.f32 %v8312_v29, %v5137_v22  ;;  %8323 = vrsqrt.f32 %v5142_v23  ;;  %v5167_v25 = vld [vmem:[%s9969_s15 + $0x8] sm:$0xff]  ;;  %v5298_v28 = vld [vmem:[%s9970_s16] sm:$0xf] }
0x195e   :  { %v8316_v7 = vpop.eup %8315  ;;  %v5164_v15 = vmul.f32 %v8314_v31, %v5140_v53  ;;  %7989 = vmatprep.subr.msk.bf16.mxu1 %vm1920_vm2, %v5298_v28  ;;  %v5312_v29 = vsel %vm1920_vm2, %v5298_v28, 0 }
0x195f   :  { %v5127_v36 = vmax.f32 %v5119_v33, 0.0  ;;  %5207 = vperm.xlu1 %8048, %v5161_v1   ;;  %v5160_v37 = vmul.f32 %v8316_v7, %v5136_v4  ;;  %v5177_v49 = vmul.f32 %v5161_v1, %v9478_v21  ;;  %7898 = vmatpush3.bf16.msra.mxu1 %v5312_v29 }
0x1960   :  { %v5180_v13 = vmul.f32 %v5164_v15, %v9476_v16  ;;  %v5134_v16 = vld [vmem:[%s9968_s11] sm:$0xff] }
0x1961   :  { %v5143_v39 = vadd.f32 1e-05, %v5127_v36  ;;  %5202 = vperm.xlu0 %8042, %v5160_v37   ;;  %v5185_v6 = vsub.f32 %v5169_v51, %v5177_v49  ;;  %v5176_v21 = vmul.f32 %v5160_v37, %v9482_v26  ;;  %v5173_v26 = vld [vmem:[%s9969_s15 + $0x38] sm:$0xff] }
0x1962   :  { %v8318_v41 = vpop.eup %8317  ;;  %v5188_v47 = vsub.f32 %v5172_v46, %v5180_v13 }
0x1963   :  { %5222 = vperm.xlu1 %8048, %v5164_v15   ;;  %v5162_v44 = vmul.f32 %v8318_v41, %v5138_v48  ;;  %v8320_v45 = vpop.eup %8319  ;;  %8325 = vrsqrt.f32 %v5143_v39  ;;  %v5184_v60 = vsub.f32 %v5168_v35, %v5176_v21 }
0x1964   :  { %v5165_v14 = vmul.f32 %v8320_v45, %v5141_v27 }
0x1965   :  { %5212 = vperm.xlu0 %8042, %v5162_v44   ;;  %v5178_v61 = vmul.f32 %v5162_v44, %v9488_v18  ;;  %v5171_v18 = vld [vmem:[%s9969_s15 + $0x28] sm:$0xff] }
0x1966   :  { %v5181_v3 = vmul.f32 %v5165_v14, %v9486_v57 }
0x1967   :  { %5255 = vperm.xlu1 %8048, %v5185_v6   ;;  %v5186_v2 = vsub.f32 %v5170_v58, %v5178_v61 }
0x1968   :  { %v8322_v62 = vpop.eup %8321  ;;  %v5189_v8 = vsub.f32 %v5173_v26, %v5181_v3 }
0x1969   :  { %5227 = vperm.xlu0 %8042, %v5165_v14   ;;  %v5163_v34 = vmul.f32 %v8322_v62, %v5139_v55 }
0x196a   :  { %v8324_v42 = vpop.eup %8323 }
0x196b   :  { %5270 = vperm.xlu1 %8048, %v5188_v47   ;;  %v5158_v5 = vmul.f32 %v8324_v42, %v5134_v16  ;;  %v5179_v63 = vmul.f32 %v5163_v34, %v9496_v54 }
0x196d   :  { %5250 = vperm.xlu0 %8042, %v5184_v60   ;;  %v5174_v12 = vmul.f32 %v5158_v5, %v9498_v52  ;;  %v5187_v57 = vsub.f32 %v5171_v18, %v5179_v63  ;;  %v8253_v52 = vld [vmem:[%s9971_s18 + $0x20] sm:$0xff]   ;;  %v8256_v18 = vld [vmem:[%s9971_s18 + $0x38] sm:$0xff]  }
0x196e   :  { %7915 = vmatprep.mubr.msk.bf16.mxu0 %vm1868_vm1, %v8253_v52  ;;  %v7132_v63 = vld [vmem:[%s9970_s16 + $0x4] sm:$0xf] }
0x196f   :  { %5217 = vperm.xlu1 %8048, %v5163_v34   ;;  %v5182_v22 = vsub.f32 %v5166_v17, %v5174_v12  ;;  %v8258_v12 = vld [vmem:[%s8660_s8 + $0x8] sm:$0xff]   ;;  %v8259_v17 = vld [vmem:[%s8660_s8 + $0x10] sm:$0xff]  }
0x1970   :  { %v8326_v59 = vpop.eup %8325 }
0x1971   :  { %5260 = vperm.xlu0 %8042, %v5186_v2   ;;  %v5159_v19 = vmul.f32 %v8326_v59, %v5135_v9  ;;  %v5597_v59 = vsel %vm1920_vm2, %v7132_v63, 0  ;;  %v8257_v9 = vld [vmem:[%s8660_s8] sm:$0xff]  }
0x1973   :  { %5275 = vperm.xlu1 %8048, %v5189_v8   ;;  %v5175_v23 = vmul.f32 %v5159_v19, %v9504_v32 }
0x1975   :  { %5192 = vperm.xlu0 %8042, %v5158_v5   ;;  %v5183_v54 = vsub.f32 %v5167_v25, %v5175_v23 }
0x1977   :  { %5265 = vperm.xlu1 %8048, %v5187_v57   ;;  %v8260_v57 = vld [vmem:[%s8660_s8 + $0x18] sm:$0xff]   ;;  %s9972_s8 = sld [smem:[#allocation33_spill]] }
0x1979   :  { %5240 = vperm.xlu0 %8042, %v5182_v22  }
0x197b   :  { %5197 = vperm.xlu1 %8048, %v5159_v19  }
0x197f   :  { %5245 = vperm.xlu1 %8048, %v5183_v54  }
0x19da   :  { %v5208_v4 = vpop.permute.xlu1 %5207 }
0x19db   :  { %v5233_v27 = vmul.f32 %v5208_v4, %v9422_v50 }
0x19dc   :  { %v5203_v31 = vpop.permute.xlu0 %5202 }
0x19dd   :  { %v5232_v51 = vmul.f32 %v5203_v31, %v9418_v30 }
0x19de   :  { %v5223_v33 = vpop.permute.xlu1 %5222 }
0x19df   :  { %v5236_v37 = vmul.f32 %v5223_v33, %v9426_v38 }
0x19e0   :  { %v5213_v1 = vpop.permute.xlu0 %5212 }
0x19e1   :  { %v5234_v44 = vmul.f32 %v5213_v1, %v9428_v56 }
0x19e2   :  { %v5256_v7 = vpop.permute.xlu1 %5255 }
0x19e3   :  { %v5281_v47 = vadd.f32 %v5256_v7, %v5233_v27  ;;  %v8263_v27 = vld [vmem:[%s9971_s18 + $0x10] sm:$0xff]  }
0x19e4   :  { %v5228_v53 = vpop.permute.xlu0 %5227 }
0x19e5   :  { %v5237_v49 = vmul.f32 %v5228_v53, %v9434_v24  ;;  %v5289_v50 = vmax.f32 %v5281_v47, 0.0  ;;  %v8265_v47 = vld [vmem:[%s9971_s18 + $0x40] sm:$0xff]  }
0x19e6   :  { %v5271_v32 = vpop.permute.xlu1 %5270 }
0x19e7   :  { %v5284_v39 = vadd.f32 %v5271_v32, %v5236_v37 }
0x19e8   :  { %v5251_v36 = vpop.permute.xlu0 %5250 }
0x19e9   :  { %v5292_v6 = vmax.f32 %v5284_v39, 0.0  ;;  %v5280_v46 = vadd.f32 %v5251_v36, %v5232_v51 }
0x19ea   :  { %v5218_v48 = vpop.permute.xlu1 %5217 }
0x19eb   :  { %v5235_v14 = vmul.f32 %v5218_v48, %v9452_v40  ;;  %v5288_v24 = vmax.f32 %v5280_v46, 0.0 }
0x19ec   :  { %v5261_v15 = vpop.permute.xlu0 %5260 }
0x19ed   :  { %v5282_v21 = vadd.f32 %v5261_v15, %v5234_v44  ;;  %v5295_v40 = vpack.c.bf16 %v5289_v50, %v5288_v24 }
0x19ee   :  { %v5276_v41 = vpop.permute.xlu1 %5275 }
0x19ef   :  { %v5285_v45 = vadd.f32 %v5276_v41, %v5237_v49  ;;  %v5290_v60 = vmax.f32 %v5282_v21, 0.0 }
0x19f0   :  { %v5193_v13 = vpop.permute.xlu0 %5192 }
0x19f1   :  { %v5293_v38 = vmax.f32 %v5285_v45, 0.0  ;;  %v5230_v42 = vmul.f32 %v5193_v13, %v9455_v10  ;;  %v8254_v10 = vld [vmem:[%s9971_s18 + $0x28] sm:$0xff]  }
0x19f2   :  { %v5266_v35 = vpop.permute.xlu1 %5265  ;;  %v8262_v45 = vld [vmem:[%s9971_s18 + $0x8] sm:$0xff]  }
0x19f3   :  { %v5297_v62 = vpack.c.bf16 %v5293_v38, %v5292_v6  ;;  %v5283_v55 = vadd.f32 %v5266_v35, %v5235_v14  ;;  %v8264_v38 = vld [vmem:[%s9971_s18 + $0x18] sm:$0xff]  }
0x19f4   :  { %v5241_v30 = vpop.permute.xlu0 %5240 }
0x19f5   :  { %v5291_v61 = vmax.f32 %v5283_v55, 0.0  ;;  %7907 = vmatprep.subr.bf16.mxu0 %v5297_v62  ;;  %v5278_v16 = vadd.f32 %v5241_v30, %v5230_v42 }
0x19f6   :  { %7908 = vmatpush3.bf16.msra.mxu0 %v5297_v62  ;;  %v5198_v56 = vpop.permute.xlu1 %5197 }
0x19f7   :  { %v5296_v58 = vpack.c.bf16 %v5291_v61, %v5290_v60  ;;  %v5231_v34 = vmul.f32 %v5198_v56, %v9467_v0  ;;  %v5286_v2 = vmax.f32 %v5278_v16, 0.0  ;;  %v8255_v0 = vld [vmem:[%s9971_s18 + $0x30] sm:$0xff]  }
0x19f9   :  { %7909 = vmatprep.subr.bf16.mxu0 %v5296_v58 }
0x19fa   :  { %7910 = vmatpush3.bf16.msra.mxu0 %v5296_v58  ;;  %v5246_v3 = vpop.permute.xlu1 %5245 }
0x19fb   :  { %v5279_v26 = vadd.f32 %v5246_v3, %v5231_v34  ;;  %7911 = vmatprep.subr.bf16.mxu0 %v5295_v40  ;;  %v8266_v34 = vld [vmem:[%s9971_s18 + $0x48] sm:$0xff]  }
0x19fd   :  { %v5287_v5 = vmax.f32 %v5279_v26, 0.0  ;;  %v8267_v26 = vld [vmem:[%s9971_s18 + $0x50] sm:$0xff]  }
0x19fe   :  { %7912 = vmatpush3.bf16.msra.mxu0 %v5295_v40 }
0x19ff   :  { %v5294_v8 = vpack.c.bf16 %v5287_v5, %v5286_v2 }
0x1a01   :  { %7899 = vmatprep.mubr.msk.bf16.mxu1 %vm1916_vm3, %v5294_v8  ;;  %7913 = vmatprep.subr.bf16.mxu0 %v5294_v8 }
0x1a02   :  { %7900 = vmatmul.mubr.msk.bf16.vlgmr.msra.gmra.mxu1 %vm1916_vm3, %v5295_v40  ;;  %7914 = vmatpush3.bf16.msra.mxu0 %v5294_v8 }
0x1a03   :  { %7903 = vmatprep.mubr.msk.bf16.mxu1 %vm1916_vm3, %v5296_v58  ;;  %7990 = vmatprep.subr.msk.bf16.mxu0 %vm1920_vm2, %v7132_v63 }
0x1a05   :  { %7916 = vmatmul.mubr.msk.bf16.vlgmr.msra.gmra.mxu0 %vm1868_vm1, %v8254_v10 }
0x1a06   :  { %7940 = vmatpush3.bf16.msra.mxu0 %v5597_v59  ;;  %7919 = vmatprep.mubr.msk.bf16.mxu0 %vm1868_vm1, %v8255_v0 }
0x1a07   :  { %7965 = vmatprep.subr.bf16.mxu0 %v9383_v43 }
0x1a0a   :  { %7904 = vmatmul.mubr.msk.bf16.gmra.mxu1 %vm1916_vm3, %v5297_v62 }
0x1a0d   :  { %7920 = vmatmul.mubr.msk.bf16.gmra.mxu0 %vm1868_vm1, %v8256_v18 }
0x1a0e   :  { %7941 = vmatprep.mubr.msk.bf16.mxu0 %vm1916_vm3, %v5294_v8 }
0x1a15   :  { %7942 = vmatmul.mubr.msk.bf16.vlgmr.msra.gmra.mxu0 %vm1916_vm3, %v5295_v40 }
0x1a16   :  { %7966 = vmatpush3.bf16.msra.mxu0 %v9383_v43  ;;  %7945 = vmatprep.mubr.msk.bf16.mxu0 %vm1916_vm3, %v5296_v58  ;;  %v8261_v43 = vld [vmem:[%s9971_s18] sm:$0xff]  }
0x1a17   :  { %7967 = vmatprep.subr.bf16.mxu0 %v9385_v20  ;;  %7931 = vmatprep.mubr.msk.bf16.mxu1 %vm1868_vm1, %v8261_v43 }
0x1a1a   :  { %7968 = vmatpush3.bf16.msra.mxu0 %v9385_v20 }
0x1a1d   :  { %7946 = vmatmul.mubr.msk.bf16.gmra.mxu0 %vm1916_vm3, %v5297_v62 }
0x1a1e   :  { %7969 = vmatprep.mubr.msk.bf16.mxu0 %vm2817_vm4, %v8257_v9 }
0x1a25   :  { %7970 = vmatmul.mubr.msk.bf16.vlgmr.msra.gmra.mxu0 %vm2817_vm4, %v8258_v12  ;;  %v8268_v12 = vld [vmem:[%s9971_s18 + $0x58] sm:$0xff]  }
0x1a26   :  { %7973 = vmatprep.mubr.msk.bf16.mxu0 %vm2817_vm4, %v8259_v17 }
0x1a2d   :  { %7974 = vmatmul.mubr.msk.bf16.gmra.mxu0 %vm2817_vm4, %v8260_v57 }
0x1ac2   :  { %v7901_v19 = vpop.f32.mrf.mxu1 }
0x1ac4   :  { %v5348_v22 = vpop.f32.mrf.mxu1 }
0x1ac5   :  { %v9576_v20 = vpop.f32.mrf.mxu0 }
0x1ac6   :  { %v7902_v23 = vpop.f32.mrf.mxu1 }
0x1ac7   :  { %v9578_v25 = vpop.f32.mrf.mxu0  ;;  %v5388_v48 = vpack.c.bf16 %v7902_v23, %v7901_v19 }
0x1ac8   :  { %v5351_v54 = vpop.f32.mrf.mxu1 }
0x1ac9   :  { %v9580_v28 = vpop.f32.mrf.mxu0  ;;  %v5387_v49 = vpack.c.bf16 %v5351_v54, %v5348_v22 }
0x1aca   :  { %v7905_v29 = vpop.f32.mrf.mxu1 }
0x1acb   :  { %v9582_v52 = vpop.f32.mrf.mxu0 }
0x1acc   :  { %v5364_v4 = vpop.f32.mrf.mxu1 }
0x1acd   :  { %v9584_v31 = vpop.f32.mrf.mxu0 }
0x1ace   :  { %v7906_v33 = vpop.f32.mrf.mxu1 }
0x1acf   :  { %v5390_v1 = vpack.c.bf16 %v7906_v33, %v7905_v29  ;;  %v9586_v7 = vpop.f32.mrf.mxu0 }
0x1ad0   :  { %v5367_v53 = vpop.f32.mrf.mxu1 }
0x1ad1   :  { %v5389_v32 = vpack.c.bf16 %v5367_v53, %v5364_v4  ;;  %v9588_v36 = vpop.f32.mrf.mxu0  ;;  %7923 = vmatprep.subr.bf16.mxu1 %v5390_v1 }
0x1ad2   :  { %7924 = vmatpush3.bf16.msra.mxu1 %v5390_v1 }
0x1ad3   :  { %v9590_v37 = vpop.f32.mrf.mxu0  ;;  %7925 = vmatprep.subr.bf16.mxu1 %v5389_v32 }
0x1ad5   :  { %v7943_v39 = vpop.f32.mrf.mxu0 }
0x1ad6   :  { %7926 = vmatpush3.bf16.msra.mxu1 %v5389_v32 }
0x1ad7   :  { %7927 = vmatprep.subr.bf16.mxu1 %v5388_v48  ;;  %v5633_v15 = vpop.f32.mrf.mxu0 }
0x1ad9   :  { %v7944_v41 = vpop.f32.mrf.mxu0 }
0x1ada   :  { %7928 = vmatpush3.bf16.msra.mxu1 %v5388_v48  ;;  %v5674_v24 = vpack.c.bf16 %v7944_v41, %v7943_v39 }
0x1adb   :  { %7929 = vmatprep.subr.bf16.mxu1 %v5387_v49  ;;  %v5636_v51 = vpop.f32.mrf.mxu0 }
0x1adc   :  { %v5673_v56 = vpack.c.bf16 %v5636_v51, %v5633_v15 }
0x1add   :  { %v7947_v44 = vpop.f32.mrf.mxu0 }
0x1ade   :  { %7930 = vmatpush3.bf16.msra.mxu1 %v5387_v49 }
0x1adf   :  { %v5649_v6 = vpop.f32.mrf.mxu0 }
0x1ae1   :  { %7932 = vmatmul.mubr.msk.bf16.vlgmr.msra.gmra.mxu1 %vm1868_vm1, %v8262_v45  ;;  %v7948_v13 = vpop.f32.mrf.mxu0 }
0x1ae2   :  { %v5676_v46 = vpack.c.bf16 %v7948_v13, %v7947_v44  ;;  %7935 = vmatprep.mubr.msk.bf16.mxu1 %vm1868_vm1, %v8263_v27 }
0x1ae3   :  { %v5652_v14 = vpop.f32.mrf.mxu0 }
0x1ae4   :  { %v5675_v21 = vpack.c.bf16 %v5652_v14, %v5649_v6  ;;  %7949 = vmatprep.subr.bf16.mxu1 %v5676_v46 }
0x1ae5   :  { %7950 = vmatpush3.bf16.msra.mxu1 %v5676_v46  ;;  %v9597_v35 = vpop.f32.mrf.mxu0 }
0x1ae6   :  { %7951 = vmatprep.subr.bf16.mxu1 %v5675_v21  ;;  %v6141_v62 = vsel %vm1916_vm3, %v9597_v35, 0.0 }
0x1ae7   :  { %v9602_v55 = vpop.f32.mrf.mxu0  ;;  %6142 = vadd.xlane.f32.xlu1 %v6141_v62 }
0x1ae9   :  { %7936 = vmatmul.mubr.msk.bf16.gmra.mxu1 %vm1868_vm1, %v8264_v38  ;;  %v9605_v60 = vpop.f32.mrf.mxu0 }
0x1aea   :  { %7952 = vmatpush3.bf16.msra.mxu1 %v5675_v21  ;;  %7957 = vmatprep.mubr.msk.bf16.mxu1 %vm1868_vm1, %v8265_v47  ;;  %v6144_v61 = vsel %vm1916_vm3, %v9605_v60, 0.0 }
0x1aeb   :  { %7953 = vmatprep.subr.bf16.mxu1 %v5674_v24  ;;  %6145 = vadd.xlane.f32.xlu0 %v6144_v61  ;;  %v9610_v30 = vpop.f32.mrf.mxu0 }
0x1aed   :  { %v9612_v50 = vpop.f32.mrf.mxu0 }
0x1aee   :  { %7954 = vmatpush3.bf16.msra.mxu1 %v5674_v24  ;;  %v6165_v42 = vmul.f32 %v9612_v50, %v9612_v50  ;;  %v6153_v58 = vsel %vm1916_vm3, %v9612_v50, 0.0 }
0x1aef   :  { %7955 = vmatprep.subr.bf16.mxu1 %v5673_v56  ;;  %6154 = vadd.xlane.f32.xlu0 %v6153_v58  ;;  %v9618_v40 = vpop.f32.mrf.mxu0 }
0x1af0   :  { %v6185_v16 = vsel %vm1916_vm3, %v6165_v42, 0.0  ;;  %v6163_v2 = vmul.f32 %v9618_v40, %v9618_v40  ;;  %v6147_v63 = vsel %vm1916_vm3, %v9618_v40, 0.0  ;;  %v6162_v42 = vmul.f32 %v9605_v60, %v9605_v60 }
0x1af1   :  { %v9622_v3 = vpop.f32.mrf.mxu0  ;;  %6186 = vadd.xlane.f32.xlu1 %v6185_v16 }
0x1af2   :  { %7956 = vmatpush3.bf16.msra.mxu1 %v5673_v56  ;;  %v6166_v5 = vmul.f32 %v9622_v3, %v9622_v3  ;;  %v6156_v8 = vsel %vm1916_vm3, %v9622_v3, 0.0  ;;  %v6179_v59 = vsel %vm1916_vm3, %v6163_v2, 0.0 }
0x1af3   :  { %6157 = vadd.xlane.f32.xlu0 %v6156_v8  ;;  %7977 = vmatprep.subr.bf16.mxu1 %v8429_v11  ;;  %v9636_v0 = vpop.f32.mrf.mxu0  ;;  %v6161_v8 = vmul.f32 %v9597_v35, %v9597_v35 }
0x1af4   :  { %v6188_v10 = vsel %vm1916_vm3, %v6166_v5, 0.0  ;;  %v6164_v18 = vmul.f32 %v9636_v0, %v9636_v0  ;;  %v6150_v9 = vsel %vm1916_vm3, %v9636_v0, 0.0 }
0x1af5   :  { %7958 = vmatmul.mubr.msk.bf16.vlgmr.msra.gmra.mxu1 %vm1868_vm1, %v8266_v34  ;;  %6148 = vadd.xlane.f32.xlu1 %v6147_v63  ;;  %v6176_v34 = vsel %vm1916_vm3, %v6162_v42, 0.0 }
0x1af6   :  { %7961 = vmatprep.mubr.msk.bf16.mxu1 %vm1868_vm1, %v8267_v26  ;;  %v6182_v17 = vsel %vm1916_vm3, %v6164_v18, 0.0 }
0x1af7   :  { %6189 = vadd.xlane.f32.xlu0 %v6188_v10 }
0x1af9   :  { %6180 = vadd.xlane.f32.xlu1 %v6179_v59 }
0x1afb   :  { %6151 = vadd.xlane.f32.xlu0 %v6150_v9 }
0x1afd   :  { %7962 = vmatmul.mubr.msk.bf16.gmra.mxu1 %vm1868_vm1, %v8268_v12 }
0x1afe   :  { %7985 = vmatprep.mubr.msk.bf16.mxu1 %vm8430_vm0, %v8429_v11 }
0x1aff   :  { %6183 = vadd.xlane.f32.xlu0 %v6182_v17 }
0x1b70   :  { %v9689_v16 = vpop.xlane.xlu1 %6142 }
0x1b74   :  { %v9658_v48 = vpop.xlane.xlu0 %6145 }
0x1b78   :  { %v6155_v13 = vpop.xlane.xlu0 %6154 }
0x1b79   :  { %v9701_v18 = vmul.f32 0.125, %v6155_v13 }
0x1b7a   :  { %v6187_v59 = vpop.xlane.xlu1 %6186 }
0x1b7c   :  { %v6158_v56 = vpop.xlane.xlu0 %6157 }
0x1b7d   :  { %v9703_v9 = vmul.f32 0.125, %v6158_v56 }
0x1b80   :  { %v6190_v5 = vpop.xlane.xlu0 %6189 }
0x1ba1   :  { %v7933_v57 = vpop.f32.mrf.mxu1 }
0x1ba2   :  { %v5572_v33 = vadd.f32 %v7933_v57, %v9576_v20  ;;  %v6173_v57 = vsel %vm1916_vm3, %v6161_v8, 0.0 }
0x1ba3   :  { %v9649_v43 = vpop.f32.mrf.mxu1 }
0x1ba5   :  { %v7934_v19 = vpop.f32.mrf.mxu1 }
0x1ba6   :  { %v5575_v39 = vadd.f32 %v7934_v19, %v9580_v28 }
0x1ba7   :  { %v9651_v22 = vpop.f32.mrf.mxu1 }
0x1ba9   :  { %v7937_v23 = vpop.f32.mrf.mxu1 }
0x1baa   :  { %v5588_v44 = vadd.f32 %v7937_v23, %v9584_v31  ;;  %v6213_v23 = vmul.f32 %v9701_v18, %v9701_v18 }
0x1bab   :  { %v5579_v54 = vpop.f32.mrf.mxu1 }
0x1bac   :  { %v5580_v21 = vadd.f32 %v5579_v54, %v9586_v7  ;;  %v6205_v54 = vmul.f32 0.125, %v6187_v59 }
0x1bad   :  { %v7938_v29 = vpop.f32.mrf.mxu1 }
0x1bae   :  { %v5591_v62 = vadd.f32 %v7938_v29, %v9588_v36  ;;  %v6214_v29 = vmul.f32 %v9703_v9, %v9703_v9 }
0x1baf   :  { %v5582_v4 = vpop.f32.mrf.mxu1 }
0x1bb0   :  { %v5583_v63 = vadd.f32 %v5582_v4, %v9590_v37  ;;  %v6149_v37 = vpop.xlane.xlu1 %6148  ;;  %v6152_v4 = vpop.xlane.xlu0 %6151 }
0x1bb4   :  { %v6181_v13 = vpop.xlane.xlu1 %6180 }
0x1bb5   :  { %v7959_v1 = vpop.f32.mrf.mxu1 }
0x1bb6   :  { %v9654_v53 = vadd.f32 %v7959_v1, %v5572_v33  ;;  %v5564_v33 = vadd.f32 %v9649_v43, %v9578_v25 }
0x1bb7   :  { %v9656_v32 = vpop.f32.mrf.mxu1 }
0x1bb8   :  { %v5788_v15 = vsel %vm1916_vm3, %v9654_v53, 0.0  ;;  %v5808_v49 = vmul.f32 %v9654_v53, %v9654_v53 }
0x1bb9   :  { %5789 = vadd.xlane.f32.xlu1 %v5788_v15  ;;  %v7960_v41 = vpop.f32.mrf.mxu1  ;;  %v6206_v15 = vmul.f32 0.125, %v6190_v5 }
0x1bba   :  { %v9665_v51 = vadd.f32 %v7960_v41, %v5575_v39  ;;  %v5820_v45 = vsel %vm1916_vm3, %v5808_v49, 0.0  ;;  %v5567_v49 = vadd.f32 %v9651_v22, %v9582_v52  ;;  %v9724_v41 = vadd.f32 %v9656_v32, %v5564_v33 }
0x1bbb   :  { %v5746_v20 = vpop.f32.mrf.mxu1 }
0x1bbc   :  { %v5791_v27 = vsel %vm1916_vm3, %v9665_v51, 0.0  ;;  %v5809_v28 = vmul.f32 %v9665_v51, %v9665_v51  ;;  %v9729_v25 = vadd.f32 %v5746_v20, %v5567_v49  ;;  %v5782_v52 = vsel %vm1916_vm3, %v9724_v41, 0.0  ;;  %v6269_v49 = vld [vmem:[%s8670_s29 + $0x30] sm:$0xff] }
0x1bbd   :  { %5821 = vadd.xlane.f32.xlu1 %v5820_v45  ;;  %5792 = vadd.xlane.f32.xlu0 %v5791_v27  ;;  %v7963_v6 = vpop.f32.mrf.mxu1  ;;  %v6221_v45 = vsub.f32 %v6205_v54, %v6213_v23  ;;  %v9727_v27 = vmul.f32 0.125, %v6149_v37 }
0x1bbe   :  { %v9673_v46 = vadd.f32 %v7963_v6, %v5588_v44  ;;  %v5823_v38 = vsel %vm1916_vm3, %v5809_v28, 0.0  ;;  %v6222_v28 = vsub.f32 %v6206_v15, %v6214_v29  ;;  %v9732_v6 = vmul.f32 0.125, %v6152_v4  ;;  %v6237_v29 = vld [vmem:[%s8665_s3 + $0x30] sm:$0xff]  ;;  %v6238_v4 = vld [vmem:[%s8665_s3 + $0x38] sm:$0xff] }
0x1bbf   :  { %v5759_v14 = vpop.f32.mrf.mxu1  ;;  %v6229_v22 = vmax.f32 %v6221_v45, 0.0  ;;  %v6211_v32 = vmul.f32 %v9727_v27, %v9727_v27  ;;  %v5785_v20 = vsel %vm1916_vm3, %v9729_v25, 0.0  ;;  %v6235_v45 = vld [vmem:[%s8665_s3 + $0x20] sm:$0xff] }
0x1bc0   :  { %v5812_v31 = vmul.f32 %v9673_v46, %v9673_v46  ;;  %v9680_v24 = vadd.f32 %v5759_v14, %v5580_v21  ;;  %v5800_v7 = vsel %vm1916_vm3, %v9673_v46, 0.0  ;;  %v6184_v14 = vpop.xlane.xlu0 %6183  ;;  %v6203_v21 = vmul.f32 0.125, %v6181_v13  ;;  %v6236_v13 = vld [vmem:[%s8665_s3 + $0x28] sm:$0xff] }
0x1bc1   :  { %5824 = vadd.xlane.f32.xlu0 %v5823_v38  ;;  %v7964_v47 = vpop.f32.mrf.mxu1  ;;  %v6230_v38 = vmax.f32 %v6222_v28, 0.0  ;;  %v6245_v56 = vadd.f32 1e-05, %v6229_v22  ;;  %v6270_v28 = vld [vmem:[%s8670_s29 + $0x38] sm:$0xff] }
0x1bc2   :  { %v5832_v61 = vsel %vm1916_vm3, %v5812_v31, 0.0  ;;  %v9685_v58 = vadd.f32 %v7964_v47, %v5591_v62  ;;  %v5794_v36 = vsel %vm1916_vm3, %v9680_v24, 0.0  ;;  %v5810_v19 = vmul.f32 %v9680_v24, %v9680_v24 }
0x1bc3   :  { %5833 = vadd.xlane.f32.xlu1 %v5832_v61  ;;  %v5762_v2 = vpop.f32.mrf.mxu1  ;;  %v6212_v31 = vmul.f32 %v9732_v6, %v9732_v6  ;;  %v6204_v47 = vmul.f32 0.125, %v6184_v14  ;;  %v6135_v62 = vsel %vm1916_vm3, %v9602_v55, 0.0  ;;  %v5806_v61 = vmul.f32 %v9724_v41, %v9724_v41 }
0x1bc4   :  { %v5813_v26 = vmul.f32 %v9685_v58, %v9685_v58  ;;  %v5803_v10 = vsel %vm1916_vm3, %v9685_v58, 0.0  ;;  %v9705_v12 = vadd.f32 %v5762_v2, %v5583_v63  ;;  %v5826_v44 = vsel %vm1916_vm3, %v5810_v19, 0.0 }
0x1bc5   :  { %5801 = vadd.xlane.f32.xlu0 %v5800_v7  ;;  %v6219_v42 = vsub.f32 %v6203_v21, %v6211_v32  ;;  %v6138_v7 = vsel %vm1916_vm3, %v9610_v30, 0.0  ;;  %v6159_v2 = vmul.f32 %v9602_v55, %v9602_v55  ;;  %v5814_v5 = vsel %vm1916_vm3, %v5806_v61, 0.0 }
0x1bc6   :  { %v5835_v17 = vsel %vm1916_vm3, %v5813_v26, 0.0  ;;  %v5797_v1 = vsel %vm1916_vm3, %v9705_v12, 0.0  ;;  %v5811_v39 = vmul.f32 %v9705_v12, %v9705_v12  ;;  %v6220_v26 = vsub.f32 %v6204_v47, %v6212_v31 }
0x1bc7   :  { %5795 = vadd.xlane.f32.xlu1 %v5794_v36  ;;  %v6246_v36 = vadd.f32 1e-05, %v6230_v38  ;;  %8327 = vrsqrt.f32 %v6245_v56  ;;  %v6227_v8 = vmax.f32 %v6219_v42, 0.0  ;;  %v6160_v63 = vmul.f32 %v9610_v30, %v9610_v30  ;;  %v6268_v38 = vld [vmem:[%s8670_s29 + $0x28] sm:$0xff] }
0x1bc8   :  { %v5829_v43 = vsel %vm1916_vm3, %v5811_v39, 0.0  ;;  %v6228_v59 = vmax.f32 %v6220_v26, 0.0 }
0x1bc9   :  { %6177 = vadd.xlane.f32.xlu0 %v6176_v34  ;;  %v5807_v34 = vmul.f32 %v9729_v25, %v9729_v25  ;;  %8329 = vrsqrt.f32 %v6246_v36  ;;  %v6170_v19 = vsel %vm1916_vm3, %v6160_v63, 0.0 }
0x1bca   :  { %v6244_v37 = vadd.f32 1e-05, %v6228_v59 }
0x1bcb   :  { %5804 = vadd.xlane.f32.xlu1 %v5803_v10  ;;  %v5817_v10 = vsel %vm1916_vm3, %v5807_v34, 0.0 }
0x1bcd   :  { %5836 = vadd.xlane.f32.xlu0 %v5835_v17  ;;  %v6167_v17 = vsel %vm1916_vm3, %v6159_v2, 0.0 }
0x1bcf   :  { %6174 = vadd.xlane.f32.xlu1 %v6173_v57  ;;  %v6243_v57 = vadd.f32 1e-05, %v6227_v8 }
0x1bd1   :  { %5798 = vadd.xlane.f32.xlu0 %v5797_v1  ;;  %8331 = vrsqrt.f32 %v6243_v57 }
0x1bd2   :  { %8333 = vrsqrt.f32 %v6244_v37 }
0x1bd3   :  { %5827 = vadd.xlane.f32.xlu1 %v5826_v44 }
0x1bd4   :  { %v8328_v23 = vpop.eup %8327 }
0x1bd5   :  { %5830 = vadd.xlane.f32.xlu0 %v5829_v43  ;;  %v6261_v33 = vmul.f32 %v8328_v23, %v6237_v29  ;;  %v9788_v23 = vmul.f32 0.125, %v9689_v16 }
0x1bd6   :  { %v8330_v54 = vpop.eup %8329 }
0x1bd7   :  { %5783 = vadd.xlane.f32.xlu1 %v5782_v52  ;;  %v6262_v1 = vmul.f32 %v8330_v54, %v6238_v4  ;;  %v6277_v39 = vmul.f32 %v6261_v33, %v9701_v18  ;;  %v6267_v18 = vld [vmem:[%s8670_s29 + $0x20] sm:$0xff] }
0x1bd9   :  { %5786 = vadd.xlane.f32.xlu0 %v5785_v20  ;;  %v6278_v44 = vmul.f32 %v6262_v1, %v9703_v9  ;;  %v6285_v14 = vsub.f32 %v6269_v49, %v6277_v39 }
0x1bdb   :  { %6136 = vadd.xlane.f32.xlu1 %v6135_v62  ;;  %v6286_v22 = vsub.f32 %v6270_v28, %v6278_v44 }
0x1bdd   :  { %6139 = vadd.xlane.f32.xlu0 %v6138_v7 }
0x1bde   :  { %v8332_v15 = vpop.eup %8331 }
0x1bdf   :  { %5815 = vadd.xlane.f32.xlu1 %v5814_v5  ;;  %v8334_v43 = vpop.eup %8333  ;;  %v6259_v52 = vmul.f32 %v8332_v15, %v6235_v45 }
0x1be0   :  { %v6260_v32 = vmul.f32 %v8334_v43, %v6236_v13  ;;  %v6209_v43 = vmul.f32 %v9788_v23, %v9788_v23 }
0x1be1   :  { %5818 = vadd.xlane.f32.xlu0 %v5817_v10  ;;  %v6275_v21 = vmul.f32 %v6259_v52, %v9727_v27 }
0x1be2   :  { %v6276_v20 = vmul.f32 %v6260_v32, %v9732_v6  ;;  %v9775_v6 = vmul.f32 0.125, %v9658_v48 }
0x1be3   :  { %6168 = vadd.xlane.f32.xlu1 %v6167_v17  ;;  %v6283_v31 = vsub.f32 %v6267_v18, %v6275_v21 }
0x1be4   :  { %v6284_v9 = vsub.f32 %v6268_v38, %v6276_v20  ;;  %v6210_v48 = vmul.f32 %v9775_v6, %v9775_v6 }
0x1be5   :  { %6171 = vadd.xlane.f32.xlu0 %v6170_v19 }
0x1bf4   :  { %6319 = vperm.xlu1 %8048, %v6261_v33  }
0x1bf8   :  { %6324 = vperm.xlu1 %8048, %v6262_v1  }
0x1bfb   :  { %6367 = vperm.xlu0 %8042, %v6285_v14  }
0x1bfc   :  { %6372 = vperm.xlu1 %8048, %v6286_v22  }
0x1bff   :  { %6309 = vperm.xlu0 %8042, %v6259_v52  }
0x1c00   :  { %6314 = vperm.xlu1 %8048, %v6260_v32  }
0x1c03   :  { %6357 = vperm.xlu0 %8042, %v6283_v31  }
0x1c04   :  { %6362 = vperm.xlu1 %8048, %v6284_v9  }
0x1c42   :  { %v5790_v47 = vpop.xlane.xlu1 %5789 }
0x1c43   :  { %v9772_v36 = vmul.f32 0.125, %v5790_v47 }
0x1c45   :  { %v5856_v63 = vmul.f32 %v9772_v36, %v9772_v36 }
0x1c46   :  { %v5793_v62 = vpop.xlane.xlu0 %5792  ;;  %v5822_v61 = vpop.xlane.xlu1 %5821 }
0x1c47   :  { %v9770_v42 = vmul.f32 0.125, %v5793_v62  ;;  %v5848_v26 = vmul.f32 0.125, %v5822_v61 }
0x1c49   :  { %v5857_v2 = vmul.f32 %v9770_v42, %v9770_v42  ;;  %v5864_v19 = vsub.f32 %v5848_v26, %v5856_v63 }
0x1c4a   :  { %v5825_v56 = vpop.xlane.xlu0 %5824 }
0x1c4b   :  { %v5849_v27 = vmul.f32 0.125, %v5825_v56  ;;  %v5872_v15 = vmax.f32 %v5864_v19, 0.0 }
0x1c4c   :  { %v5834_v7 = vpop.xlane.xlu1 %5833 }
0x1c4d   :  { %v5865_v10 = vsub.f32 %v5849_v27, %v5857_v2  ;;  %v5852_v17 = vmul.f32 0.125, %v5834_v7  ;;  %v5888_v18 = vadd.f32 1e-05, %v5872_v15 }
0x1c4e   :  { %v5802_v34 = vpop.xlane.xlu0 %5801 }
0x1c4f   :  { %v9779_v5 = vmul.f32 0.125, %v5802_v34  ;;  %v5873_v4 = vmax.f32 %v5865_v10, 0.0 }
0x1c50   :  { %v5796_v8 = vpop.xlane.xlu1 %5795 }
0x1c51   :  { %v5860_v59 = vmul.f32 %v9779_v5, %v9779_v5  ;;  %v5889_v16 = vadd.f32 1e-05, %v5873_v4  ;;  %v9796_v32 = vmul.f32 0.125, %v5796_v8 }
0x1c52   :  { %v6178_v57 = vpop.xlane.xlu0 %6177 }
0x1c53   :  { %v6202_v37 = vmul.f32 0.125, %v6178_v57  ;;  %v5868_v54 = vsub.f32 %v5852_v17, %v5860_v59  ;;  %v5858_v56 = vmul.f32 %v9796_v32, %v9796_v32 }
0x1c54   :  { %v5805_v29 = vpop.xlane.xlu1 %5804 }
0x1c55   :  { %v6218_v33 = vsub.f32 %v6202_v37, %v6210_v48  ;;  %v9790_v1 = vmul.f32 0.125, %v5805_v29  ;;  %v5876_v28 = vmax.f32 %v5868_v54, 0.0  ;;  %v6234_v54 = vld [vmem:[%s8665_s3 + $0x18] sm:$0xff] }
0x1c56   :  { %v5837_v39 = vpop.xlane.xlu0 %5836 }
0x1c57   :  { %v6226_v49 = vmax.f32 %v6218_v33, 0.0  ;;  %v5861_v44 = vmul.f32 %v9790_v1, %v9790_v1  ;;  %v5853_v45 = vmul.f32 0.125, %v5837_v39  ;;  %v5892_v31 = vadd.f32 1e-05, %v5876_v28 }
0x1c58   :  { %v6175_v13 = vpop.xlane.xlu1 %6174 }
0x1c59   :  { %v6242_v14 = vadd.f32 1e-05, %v6226_v49  ;;  %v5869_v52 = vsub.f32 %v5853_v45, %v5861_v44  ;;  %v6201_v22 = vmul.f32 0.125, %v6175_v13  ;;  %v5881_v44 = vld [vmem:[%s9972_s8 + $0x18] sm:$0xff] }
0x1c5a   :  { %v5799_v21 = vpop.xlane.xlu0 %5798 }
0x1c5b   :  { %8335 = vrsqrt.f32 %v6242_v14  ;;  %v6217_v20 = vsub.f32 %v6201_v22, %v6209_v43  ;;  %v9798_v38 = vmul.f32 0.125, %v5799_v21  ;;  %v5877_v47 = vmax.f32 %v5869_v52, 0.0  ;;  %v6233_v21 = vld [vmem:[%s8665_s3 + $0x10] sm:$0xff] }
0x1c5c   :  { %v5828_v9 = vpop.xlane.xlu1 %5827  ;;  %8337 = vrsqrt.f32 %v5889_v16 }
0x1c5d   :  { %v6225_v62 = vmax.f32 %v6217_v20, 0.0  ;;  %v5850_v61 = vmul.f32 0.125, %v5828_v9  ;;  %8339 = vrsqrt.f32 %v5888_v18  ;;  %v5859_v34 = vmul.f32 %v9798_v38, %v9798_v38  ;;  %v5880_v18 = vld [vmem:[%s9972_s8 + $0x10] sm:$0xff] }
0x1c5e   :  { %v5831_v7 = vpop.xlane.xlu0 %5830  ;;  %8341 = vrsqrt.f32 %v5892_v31  ;;  %v5893_v63 = vadd.f32 1e-05, %v5877_v47  ;;  %v5884_v31 = vld [vmem:[%s9972_s8 + $0x30] sm:$0xff] }
0x1c5f   :  { %v6241_v27 = vadd.f32 1e-05, %v6225_v62  ;;  %v5851_v26 = vmul.f32 0.125, %v5831_v7  ;;  %v5866_v2 = vsub.f32 %v5850_v61, %v5858_v56 }
0x1c60   :  { %v5784_v8 = vpop.xlane.xlu1 %5783 }
0x1c61   :  { %8343 = vrsqrt.f32 %v6241_v27  ;;  %v5867_v10 = vsub.f32 %v5851_v26, %v5859_v34  ;;  %v5874_v57 = vmax.f32 %v5866_v2, 0.0  ;;  %v9818_v9 = vmul.f32 0.125, %v5784_v8 }
0x1c62   :  { %v5787_v59 = vpop.xlane.xlu0 %5786  ;;  %8345 = vrsqrt.f32 %v5893_v63 }
0x1c63   :  { %v5875_v17 = vmax.f32 %v5867_v10, 0.0  ;;  %v9805_v29 = vmul.f32 0.125, %v5787_v59  ;;  %v5890_v33 = vadd.f32 1e-05, %v5874_v57  ;;  %v5854_v59 = vmul.f32 %v9818_v9, %v9818_v9  ;;  %v5913_v57 = vld [vmem:[%s9973_s0 + $0x18] sm:$0xff] }
0x1c64   :  { %v6137_v19 = vpop.xlane.xlu1 %6136 }
0x1c65   :  { %v5891_v48 = vadd.f32 1e-05, %v5875_v17  ;;  %v5855_v45 = vmul.f32 %v9805_v29, %v9805_v29  ;;  %v9825_v17 = vmul.f32 0.125, %v6137_v19 }
0x1c66   :  { %v6140_v37 = vpop.xlane.xlu0 %6139 }
0x1c67   :  { %8347 = vrsqrt.f32 %v5891_v48  ;;  %v9812_v43 = vmul.f32 0.125, %v6140_v37  ;;  %v5885_v48 = vld [vmem:[%s9972_s8 + $0x38] sm:$0xff]  ;;  %v6207_v19 = vmul.f32 %v9825_v17, %v9825_v17 }
0x1c68   :  { %v8336_v4 = vpop.eup %8335  ;;  %v5816_v28 = vpop.xlane.xlu1 %5815  ;;  %8349 = vrsqrt.f32 %v5890_v33 }
0x1c69   :  { %v9807_v39 = vmul.f32 %v8336_v4, %v6234_v54  ;;  %v8338_v15 = vpop.eup %8337  ;;  %v6208_v62 = vmul.f32 %v9812_v43, %v9812_v43  ;;  %v5846_v56 = vmul.f32 0.125, %v5816_v28  ;;  %v5883_v28 = vld [vmem:[%s9972_s8 + $0x28] sm:$0xff] }
0x1c6a   :  { %v5819_v49 = vpop.xlane.xlu0 %5818  ;;  %v8340_v16 = vpop.eup %8339  ;;  %v5905_v22 = vmul.f32 %v8338_v15, %v5881_v44 }
0x1c6b   :  { %v5847_v13 = vmul.f32 0.125, %v5819_v49  ;;  %6304 = vperm.xlu1 %8048, %v9807_v39   ;;  %v8342_v14 = vpop.eup %8341  ;;  %v5904_v27 = vmul.f32 %v8340_v16, %v5880_v18  ;;  %v5862_v37 = vsub.f32 %v5846_v56, %v5854_v59  ;;  %v6274_v56 = vmul.f32 %v9807_v39, %v9775_v6 }
0x1c6c   :  { %v5908_v34 = vmul.f32 %v8342_v14, %v5884_v31  ;;  %v6169_v2 = vpop.xlane.xlu1 %6168  ;;  %v5921_v10 = vmul.f32 %v5905_v22, %v9770_v42  ;;  %v5912_v42 = vld [vmem:[%s9973_s0 + $0x10] sm:$0xff] }
0x1c6d   :  { %v5863_v52 = vsub.f32 %v5847_v13, %v5855_v45  ;;  %v6199_v54 = vmul.f32 0.125, %v6169_v2  ;;  %v5920_v4 = vmul.f32 %v5904_v27, %v9772_v36  ;;  %v5870_v13 = vmax.f32 %v5862_v37, 0.0  ;;  %v5916_v2 = vld [vmem:[%s9973_s0 + $0x30] sm:$0xff] }
0x1c6e   :  { %v8344_v20 = vpop.eup %8343  ;;  %v6172_v47 = vpop.xlane.xlu0 %6171  ;;  %v5929_v49 = vsub.f32 %v5913_v57, %v5921_v10  ;;  %v6265_v57 = vld [vmem:[%s8670_s29 + $0x10] sm:$0xff] }
0x1c6f   :  { %v6200_v61 = vmul.f32 0.125, %v6172_v47  ;;  %5951 = vperm.xlu1 %8048, %v5905_v22   ;;  %v6257_v7 = vmul.f32 %v8344_v20, %v6233_v21  ;;  %v5871_v26 = vmax.f32 %v5863_v52, 0.0  ;;  %v8346_v8 = vpop.eup %8345  ;;  %v6215_v16 = vsub.f32 %v6199_v54, %v6207_v19  ;;  %v5882_v21 = vld [vmem:[%s9972_s8 + $0x20] sm:$0xff]  ;;  %v5917_v20 = vld [vmem:[%s9973_s0 + $0x38] sm:$0xff] }
0x1c70   :  { %v5909_v44 = vmul.f32 %v8346_v8, %v5885_v48  ;;  %v5928_v14 = vsub.f32 %v5912_v42, %v5920_v4  ;;  %v5886_v31 = vadd.f32 1e-05, %v5870_v13  ;;  %v5915_v8 = vld [vmem:[%s9973_s0 + $0x28] sm:$0xff]  ;;  %v5914_v54 = vld [vmem:[%s9973_s0 + $0x20] sm:$0xff] }
0x1c71   :  { %v6216_v63 = vsub.f32 %v6200_v61, %v6208_v62  ;;  %6299 = vperm.xlu0 %8042, %v6257_v7   ;;  %v5887_v33 = vadd.f32 1e-05, %v5871_v26  ;;  %v6223_v47 = vmax.f32 %v6215_v16, 0.0  ;;  %v5924_v26 = vmul.f32 %v5908_v34, %v9779_v5  ;;  %v6264_v16 = vld [vmem:[%s8670_s29 + $0x8] sm:$0xff] }
0x1c72   :  { %v5925_v18 = vmul.f32 %v5909_v44, %v9790_v1  ;;  %v6273_v6 = vmul.f32 %v6257_v7, %v9788_v23 }
0x1c73   :  { %5966 = vperm.xlu1 %8048, %v5908_v34   ;;  %v6224_v15 = vmax.f32 %v6216_v63, 0.0  ;;  %8351 = vrsqrt.f32 %v5887_v33  ;;  %v6239_v1 = vadd.f32 1e-05, %v6223_v47  ;;  %v5932_v59 = vsub.f32 %v5916_v2, %v5924_v26  ;;  %v5879_v34 = vld [vmem:[%s9972_s8 + $0x8] sm:$0xff] }
0x1c74   :  { %v8348_v45 = vpop.eup %8347  ;;  %v5933_v61 = vsub.f32 %v5917_v20, %v5925_v18  ;;  %v6281_v48 = vsub.f32 %v6265_v57, %v6273_v6  ;;  %v6232_v33 = vld [vmem:[%s8665_s3 + $0x8] sm:$0xff]  ;;  %v6263_v18 = vld [vmem:[%s8670_s29] sm:$0xff] }
0x1c75   :  { %5946 = vperm.xlu0 %8042, %v5904_v27   ;;  %v8350_v52 = vpop.eup %8349  ;;  %v6240_v36 = vadd.f32 1e-05, %v6224_v15  ;;  %v5907_v22 = vmul.f32 %v8348_v45, %v5883_v28  ;;  %v6266_v27 = vld [vmem:[%s8670_s29 + $0x18] sm:$0xff]  ;;  %v6231_v28 = vld [vmem:[%s8665_s3] sm:$0xff]  ;;  %s9974_s29 = sld [smem:[#allocation10_spill]]  ;;  %s8431_s3 = smov [#allocation2]  }
0x1c76   :  { %v5906_v62 = vmul.f32 %v8350_v52, %v5882_v21  ;;  %v6282_v63 = vsub.f32 %v6266_v27, %v6274_v56  ;;  %s6468_s5 = sshll.u32 %s8431_s3, 4  ;;  %s6469_s5 = int_to_ptr.vmem [resolvable:$true] %s6468_s5 }
0x1c77   :  { %5999 = vperm.xlu1 %8048, %v5929_v49   ;;  %8353 = vrsqrt.f32 %v6240_v36  ;;  %v5923_v10 = vmul.f32 %v5907_v22, %v9798_v38  ;;  %v5878_v49 = vld [vmem:[%s9972_s8] sm:$0xff]  ;;  %s8359_s9 = scalar_lea.vmem %s6469_s5, 32  ;;  %p8364_p1 = scmp.lt.s32.totalorder %s6469_s5, %s6469_s5 }
0x1c78   :  { %8355 = vrsqrt.f32 %v5886_v31  ;;  %v5922_v38 = vmul.f32 %v5906_v62, %v9796_v32  ;;  %v6320_v31 = vpop.permute.xlu1 %6319  ;;  %p8360_p0 = scmp.ne.s32.totalorder %s6469_s5, %s8359_s9  ;;  %p8365_p2 = scmp.lt.s32.totalorder %s8359_s9, %s8359_s9 }
0x1c79   :  { %5994 = vperm.xlu0 %8042, %v5928_v14   ;;  %8357 = vrsqrt.f32 %v6239_v1  ;;  %v5931_v39 = vsub.f32 %v5915_v8, %v5923_v10 }
0x1c7a   :  { %v5930_v23 = vsub.f32 %v5914_v54, %v5922_v38  ;;  %v6333_v38 = vmul.f32 %v9612_v50, %v6320_v31  ;;  %p8366_p3 = por %p8365_p2, %p8364_p1 }
0x1c7b   :  { %5961 = vperm.xlu1 %8048, %v5907_v22   ;;  %v5910_v22 = vld [vmem:[%s9973_s0] sm:$0xff] }
0x1c7c   :  { %v6325_v47 = vpop.permute.xlu1 %6324  ;;  %p8367_p4 = pnand %p8366_p3, %p8360_p0 }
0x1c7d   :  { %5956 = vperm.xlu0 %8042, %v5906_v62  }
0x1c7f   :  { %6019 = vperm.xlu1 %8048, %v5933_v61   ;;  %v6368_v61 = vpop.permute.xlu0 %6367 }
0x1c80   :  { %v8352_v5 = vpop.eup %8351 }
0x1c81   :  { %5971 = vperm.xlu0 %8042, %v5909_v44   ;;  %v5903_v37 = vmul.f32 %v8352_v5, %v5879_v34  ;;  %v5911_v44 = vld [vmem:[%s9973_s0 + $0x8] sm:$0xff]  ;;  %v6334_v5 = vmul.f32 %v9622_v3, %v6325_v47 }
0x1c83   :  { %6352 = vperm.xlu1 %8048, %v6282_v63   ;;  %v5919_v42 = vmul.f32 %v5903_v37, %v9805_v29  ;;  %v6310_v27 = vpop.permute.xlu0 %6309 }
0x1c84   :  { %v8354_v4 = vpop.eup %8353  ;;  %v6331_v50 = vmul.f32 %v6310_v27, %v9618_v40 }
0x1c85   :  { %6014 = vperm.xlu0 %8042, %v5932_v59   ;;  %v8356_v7 = vpop.eup %8355  ;;  %v6256_v15 = vmul.f32 %v8354_v4, %v6232_v33  ;;  %v5927_v19 = vsub.f32 %v5911_v44, %v5919_v42 }
0x1c86   :  { %v5902_v45 = vmul.f32 %v8356_v7, %v5878_v49  ;;  %v8358_v32 = vpop.eup %8357 }
0x1c87   :  { %6009 = vperm.xlu1 %8048, %v5931_v39   ;;  %v6272_v13 = vmul.f32 %v6256_v15, %v9812_v43  ;;  %v6255_v14 = vmul.f32 %v8358_v32, %v6231_v28  ;;  %v6373_v43 = vpop.permute.xlu1 %6372 }
0x1c88   :  { %v5918_v52 = vmul.f32 %v5902_v45, %v9818_v9  ;;  %v6358_v9 = vpop.permute.xlu0 %6357 }
0x1c89   :  { %6347 = vperm.xlu0 %8042, %v6281_v48   ;;  %v6280_v36 = vsub.f32 %v6264_v16, %v6272_v13  ;;  %v6271_v21 = vmul.f32 %v6255_v14, %v9825_v17 }
0x1c8a   :  { %v5926_v29 = vsub.f32 %v5910_v22, %v5918_v52  ;;  %v6379_v52 = vadd.f32 %v6358_v9, %v6331_v50 }
0x1c8b   :  { %5941 = vperm.xlu1 %8048, %v5903_v37   ;;  %v6279_v20 = vsub.f32 %v6263_v18, %v6271_v21  ;;  %v6315_v62 = vpop.permute.xlu1 %6314  ;;  %v6382_v37 = vadd.f32 %v6373_v43, %v6334_v5 }
0x1c8c   :  { %v6332_v3 = vmul.f32 %v6315_v62, %v9636_v0 }
0x1c8d   :  { %6004 = vperm.xlu0 %8042, %v5930_v23   ;;  %v6381_v23 = vadd.f32 %v6368_v61, %v6333_v38 }
0x1c8f   :  { %6294 = vperm.xlu1 %8048, %v6256_v15   ;;  %v6363_v56 = vpop.permute.xlu1 %6362 }
0x1c90   :  { %v6380_v13 = vadd.f32 %v6363_v56, %v6332_v3 }
0x1c91   :  { %5936 = vperm.xlu0 %8042, %v5902_v45  }
0x1c93   :  { %5989 = vperm.xlu1 %8048, %v5927_v19  }
0x1c95   :  { %6289 = vperm.xlu0 %8042, %v6255_v14  }
0x1c97   :  { %6342 = vperm.xlu1 %8048, %v6280_v36  }
0x1c99   :  { %5984 = vperm.xlu0 %8042, %v5926_v29  }
0x1c9d   :  { %6337 = vperm.xlu0 %8042, %v6279_v20  }
0x1ce6   :  { %v6305_v26 = vpop.permute.xlu1 %6304 }
0x1ce7   :  { %v6330_v36 = vmul.f32 %v9605_v60, %v6305_v26 }
0x1cea   :  { %v5952_v1 = vpop.permute.xlu1 %5951 }
0x1ceb   :  { %v5977_v40 = vmul.f32 %v5952_v1, %v9665_v51 }
0x1cec   :  { %v6300_v2 = vpop.permute.xlu0 %6299 }
0x1cee   :  { %v5967_v63 = vpop.permute.xlu1 %5966 }
0x1cef   :  { %v5980_v54 = vmul.f32 %v5967_v63, %v9673_v46  ;;  %v6329_v46 = vmul.f32 %v9597_v35, %v6300_v2 }
0x1cf0   :  { %v5947_v10 = vpop.permute.xlu0 %5946 }
0x1cf2   :  { %v6000_v8 = vpop.permute.xlu1 %5999 }
0x1cf3   :  { %v6025_v43 = vadd.f32 %v6000_v8, %v5977_v40 }
0x1cf4   :  { %v5995_v59 = vpop.permute.xlu0 %5994 }
0x1cf6   :  { %v5962_v17 = vpop.permute.xlu1 %5961 }
0x1cf7   :  { %v5979_v42 = vmul.f32 %v5962_v17, %v9705_v12  ;;  %v5976_v12 = vmul.f32 %v5947_v10, %v9654_v53 }
0x1cf8   :  { %v5957_v6 = vpop.permute.xlu0 %5956 }
0x1cf9   :  { %v5978_v16 = vmul.f32 %v5957_v6, %v9680_v24  ;;  %v6024_v31 = vadd.f32 %v5995_v59, %v5976_v12 }
0x1cfa   :  { %v6020_v39 = vpop.permute.xlu1 %6019 }
0x1cfc   :  { %v5972_v57 = vpop.permute.xlu0 %5971 }
0x1cfd   :  { %v5981_v34 = vmul.f32 %v5972_v57, %v9685_v58 }
0x1cfe   :  { %v6353_v48 = vpop.permute.xlu1 %6352 }
0x1cff   :  { %v6029_v4 = vadd.f32 %v6020_v39, %v5981_v34  ;;  %v6378_v35 = vadd.f32 %v6353_v48, %v6330_v36 }
0x1d00   :  { %v6015_v33 = vpop.permute.xlu0 %6014 }
0x1d01   :  { %v6390_v7 = vadd.f32 %v6382_v37, %v6029_v4  ;;  %v6028_v15 = vadd.f32 %v6015_v33, %v5980_v54  ;;  %v6386_v56 = vadd.f32 %v6378_v35, %v6025_v43 }
0x1d02   :  { %v6010_v49 = vpop.permute.xlu1 %6009 }
0x1d03   :  { %v6389_v44 = vadd.f32 %v6381_v23, %v6028_v15  ;;  %v6398_v32 = vmax.f32 %v6390_v7, 0.0  ;;  %v6027_v19 = vadd.f32 %v6010_v49, %v5979_v42  ;;  %v6394_v51 = vmax.f32 %v6386_v56, 0.0 }
0x1d04   :  { %v6348_v45 = vpop.permute.xlu0 %6347 }
0x1d05   :  { %v6397_v58 = vmax.f32 %v6389_v44, 0.0  ;;  %v6388_v29 = vadd.f32 %v6380_v13, %v6027_v19  ;;  %v6377_v0 = vadd.f32 %v6348_v45, %v6329_v46 }
0x1d06   :  { %v5942_v28 = vpop.permute.xlu1 %5941 }
0x1d07   :  { %v6403_v14 = vpack.c.bf16 %v6398_v32, %v6397_v58  ;;  %v6396_v60 = vmax.f32 %v6388_v29, 0.0  ;;  %v6385_v62 = vadd.f32 %v6377_v0, %v6024_v31  ;;  %v5975_v8 = vmul.f32 %v5942_v28, %v9729_v25 }
0x1d08   :  { %v6005_v22 = vpop.permute.xlu0 %6004 }
0x1d09   :  { %v6026_v21 = vadd.f32 %v6005_v22, %v5978_v16  ;;  %v6417_v18 = vsel %vm1916_vm3, %v6403_v14, 0  ;;  %v6393_v9 = vmax.f32 %v6385_v62, 0.0 }
0x1d0a   :  { %v6295_v20 = vpop.permute.xlu1 %6294  ;;  %7978 = vmatpush3.bf16.xpose.msra.mxu1 %v6417_v18 }
0x1d0b   :  { %v6387_v47 = vadd.f32 %v6379_v52, %v6026_v21  ;;  %7979 = vmatprep.subr.bf16.mxu1 %v8429_v11  ;;  %v6328_v1 = vmul.f32 %v6295_v20, %v9610_v30  ;;  %v6401_v59 = vpack.c.bf16 %v6394_v51, %v6393_v9 }
0x1d0c   :  { %v5937_v24 = vpop.permute.xlu0 %5936 }
0x1d0d   :  { %v6395_v53 = vmax.f32 %v6387_v47, 0.0  ;;  %v5974_v6 = vmul.f32 %v5937_v24, %v9724_v41  ;;  %v6411_v37 = vsel %vm1916_vm3, %v6401_v59, 0  ;;  %v6399_v41 = vld [vmem:[%s9974_s29] sm:$0x1] }
0x1d0e   :  { %v5990_v61 = vpop.permute.xlu1 %5989 }
0x1d0f   :  { %v6402_v27 = vpack.c.bf16 %v6396_v60, %v6395_v53  ;;  %v6023_v39 = vadd.f32 %v5990_v61, %v5975_v8 }
0x1d10   :  { %v6290_v26 = vpop.permute.xlu0 %6289 }
0x1d11   :  { %v6414_v2 = vsel %vm1916_vm3, %v6402_v27, 0  ;;  %v6327_v57 = vmul.f32 %v6290_v26, %v9602_v55 }
0x1d12   :  { %7980 = vmatpush3.bf16.xpose.msra.mxu1 %v6414_v2  ;;  %v6343_v63 = vpop.permute.xlu1 %6342 }
0x1d13   :  { %7981 = vmatprep.subr.bf16.mxu1 %v8429_v11  ;;  %v6376_v17 = vadd.f32 %v6343_v63, %v6328_v1 }
0x1d14   :  { %v5985_v10 = vpop.permute.xlu0 %5984 }
0x1d15   :  { %v6384_v34 = vadd.f32 %v6376_v17, %v6023_v39  ;;  %v6022_v48 = vadd.f32 %v5985_v10, %v5974_v6 }
0x1d17   :  { %v6392_v54 = vmax.f32 %v6384_v34, 0.0 }
0x1d18   :  { %v6338_v5 = vpop.permute.xlu0 %6337 }
0x1d19   :  { %v6375_v38 = vadd.f32 %v6338_v5, %v6327_v57 }
0x1d1a   :  { %7982 = vmatpush3.bf16.xpose.msra.mxu1 %v6411_v37 }
0x1d1b   :  { %v6383_v30 = vadd.f32 %v6375_v38, %v6022_v48  ;;  %7983 = vmatprep.subr.bf16.mxu1 %v8429_v11 }
0x1d1d   :  { %v6391_v4 = vmax.f32 %v6383_v30, 0.0 }
0x1d1f   :  { %v6400_v25 = vpack.c.bf16 %v6392_v54, %v6391_v4 }
0x1d21   :  { %v6408_v33 = vsel %vm1916_vm3, %v6400_v25, 0 }
0x1d22   :  { %7984 = vmatpush3.bf16.xpose.msra.mxu1 %v6408_v33 }
0x1d29   :  { %7986 = vmatmul.mubr.msk.bf16.vlgmr.msra.gmra.mxu1 %vm1916_vm3, %v6399_v41 }
0x1de9   :  { %v6453_v55 = vpop.f32.mrf.mxu1 }
0x1dea   :  { %v6459_v23 = vmul.f32 0.25, %v6453_v55 }
0x1deb   :  { %v7987_v7 = vpop.f32.mrf.mxu1 }
0x1dec   :  { %6461 = vst.msk [vmem:[#allocation2] sm:$0x3] %vm6460_vm6, %v6459_v23 }
0x1ded   :  { %v6456_v15 = vpop.f32.mrf.mxu1 }
0x1dee   :  { %8370 = shalt.err (!%p8367_p4)
}
0x1def   :  { %6471 = dma.vmem_to_hbm [thread:$0]  %s6469_s5, 32, %s8675_s25, [#allocation3]   ;;  %v7988_v11 = vpop.f32.mrf.mxu1 }
0x1df0   :  { %8379 = dma.done.wait [#allocation3], 32  }
0x1df1   :  { %8380 = vsyncadd [#allocation3], 4294967264 }
0x1df2   :  { %6475 = vsyncpa [#allocation3], 1 }

</bundles_post_ra>
